<compile_context>
chip_gen: v5e
topology: v5e:2x2
jax: 0.10.0
libtpu: 0.0.40
codegen_flags: <defaults>
</compile_context>

<pallas_src>
import functools

import jax
import jax.numpy as jnp
from jax import lax
from jax.experimental import pallas as pl
from jax.experimental.pallas import tpu as pltpu


LANE = 128
SUBLANE = 8


def round_up(x, m):
    return ((x + m - 1) // m) * m


# ----------------------------------------------------------------------------
# Pallas kernel: GRU recurrence for one layer.
#   gi_ref : (T_CHUNK, TB, 3*Hp) f32  -- precomputed x @ W_ih (+ folded biases)
#   len_ref: (TB, 1)             i32  -- per-row sequence lengths
#   whh_ref: (Hp, 3*Hp)               -- fused recurrent weights (f32 or bf16)
#   bhn_ref: (1, Hp)             f32  -- b_hn (needed inside r * (...))
#   o_ref  : (T_CHUNK, TB, Hp)   f32  -- per-step outputs (zeroed past length)
#   h_ref  : (TB, Hp)            f32  -- hidden state at last valid step
#   h_state: (TB, Hp)            f32  -- VMEM-resident recurrent state
# ----------------------------------------------------------------------------
def _gru_recurrent_kernel(gi_ref, len_ref, whh_ref, bhn_ref,
                          o_ref, h_ref, h_state):
    t_chunk = o_ref.shape[0]
    H = o_ref.shape[-1]                      # padded hidden width (lane-dense)
    tc = pl.program_id(1)                    # time-chunk index (sequential)
    t0 = tc * t_chunk                        # global timestep of chunk start
    lens = len_ref[...]                      # (TB, 1) int32

    @pl.when(tc == 0)
    def _init():
        h_state[...] = jnp.zeros_like(h_state)

    # Hoist invariant loads out of the unrolled timestep loop.
    whh = whh_ref[...]                       # (Hp, 3*Hp), f32 or bf16
    bhn = bhn_ref[...]                       # (1, Hp) f32

    def step(tt, h_prev):
        gi = gi_ref[tt]                      # (TB, 3H) f32, biases folded in
        # Single fused recurrent matmul (one MXU push instead of three).
        gh = jnp.dot(h_prev.astype(whh.dtype), whh,
                     preferred_element_type=jnp.float32)
        # Gate order follows torch.nn.GRU: r, z, n (lane-aligned slices).
        r = jax.nn.sigmoid(gi[:, :H] + gh[:, :H])
        z = jax.nn.sigmoid(gi[:, H:2 * H] + gh[:, H:2 * H])
        n = jnp.tanh(gi[:, 2 * H:] + r * (gh[:, 2 * H:] + bhn))
        h_new = n + z * (h_prev - n)         # == (1-z)*n + z*h_prev
        # pack_padded_sequence semantics: freeze h and zero outputs past len.
        valid = lens > (t0 + tt)             # (TB, 1) broadcast over H lanes
        h_upd = jnp.where(valid, h_new, h_prev)
        o_ref[tt] = jnp.where(valid, h_new, 0.0).astype(o_ref.dtype)
        return h_upd

    h_last = lax.fori_loop(0, t_chunk, step, h_state[...], unroll=True)
    h_state[...] = h_last

    @pl.when(tc == pl.num_programs(1) - 1)
    def _finalize():
        h_ref[...] = h_last.astype(h_ref.dtype)


def gru_recurrent(gi, lens2d, whh_f, bhn, *, t_chunk, tb):
    """gi:(T_pad,B_pad,3*Hp) f32, lens2d:(B_pad,1) i32, whh_f:(Hp,3*Hp),
    bhn:(1,Hp). Returns o:(T_pad,B_pad,Hp) f32, h:(B_pad,Hp) f32."""
    T_pad, B_pad, G = gi.shape
    H_pad = G // 3
    grid = (B_pad // tb, T_pad // t_chunk)   # (parallel batch tiles, time)
    o, h = pl.pallas_call(
        _gru_recurrent_kernel,
        out_shape=(jax.ShapeDtypeStruct((T_pad, B_pad, H_pad), jnp.float32),
                   jax.ShapeDtypeStruct((B_pad, H_pad), jnp.float32)),
        grid_spec=pltpu.PrefetchScalarGridSpec(
            num_scalar_prefetch=0,
            grid=grid,
            in_specs=[
                pl.BlockSpec((t_chunk, tb, G), lambda b, t: (t, b, 0)),  # gi
                pl.BlockSpec((tb, 1),          lambda b, t: (b, 0)),     # lens
                # Constant index maps -> fetched once, never re-DMAed.
                # TODO(synk): pipeline_mode=pl.Buffered(1) here for v7x at
                #             very large H to halve the weight VMEM footprint.
                pl.BlockSpec((H_pad, G),       lambda b, t: (0, 0)),     # W_hh
                pl.BlockSpec((1, H_pad),       lambda b, t: (0, 0)),     # b_hn
            ],
            out_specs=(
                pl.BlockSpec((t_chunk, tb, H_pad), lambda b, t: (t, b, 0)),
                pl.BlockSpec((tb, H_pad),          lambda b, t: (b, 0)),
            ),
            scratch_shapes=[pltpu.VMEM((tb, H_pad), jnp.float32)],
        ),
        compiler_params=pltpu.CompilerParams(
            dimension_semantics=("parallel", "arbitrary")),
    )(gi, lens2d, whh_f, bhn)
    return o, h


# ----------------------------------------------------------------------------
# Parameter construction (deterministic, matches nn.GRU / nn.Embedding shapes).
# ----------------------------------------------------------------------------
def init_params(key, n_vocab, n_embed, n_hiddens, n_layers):
    keys = jax.random.split(key, 1 + 4 * n_layers)
    emb = jax.random.normal(keys[0], (n_vocab, n_embed), jnp.float32)
    k = 1.0 / jnp.sqrt(jnp.float32(n_hiddens))
    gru = []
    for layer in range(n_layers):
        d_in = n_embed if layer == 0 else n_hiddens
        kw = keys[1 + 4 * layer: 1 + 4 * (layer + 1)]
        # PyTorch stores weight_ih_l{k}: (3H, D); we keep per-gate (3, D, H).
        wih = jax.random.uniform(kw[0], (3, d_in, n_hiddens), jnp.float32, -k, k)
        whh = jax.random.uniform(kw[1], (3, n_hiddens, n_hiddens), jnp.float32, -k, k)
        bih = jax.random.uniform(kw[2], (3, n_hiddens), jnp.float32, -k, k)
        bhh = jax.random.uniform(kw[3], (3, n_hiddens), jnp.float32, -k, k)
        gru.append((wih, whh, bih, bhh))
    return {"emb": emb, "gru": gru}


def prepare_params(params, mxu_dtype=jnp.float32):
    """Build fused, lane-padded kernel-ready parameters."""
    H = params["gru"][0][1].shape[-1]
    H_pad = max(round_up(H, LANE), LANE)
    layers = []
    for li, (wih, whh, bih, bhh) in enumerate(params["gru"]):
        D = wih.shape[1]
        d_pad = D if li == 0 else H_pad      # layer>=1 consumes padded acts
        wih_f = jnp.concatenate(
            [jnp.pad(wih[g], ((0, d_pad - D), (0, H_pad - H))) for g in range(3)],
            axis=1)                                            # (d_pad, 3*Hp)
        whh_f = jnp.concatenate(
            [jnp.pad(whh[g], ((0, H_pad - H), (0, H_pad - H))) for g in range(3)],
            axis=1)                                            # (Hp, 3*Hp)
        # Fold b_ih (all gates) and b_hh (r, z gates) into the hoisted input
        # projection's bias; b_hn stays separate (needed inside r * (...)).
        gi_b = jnp.concatenate(
            [jnp.pad(bih[g] + (bhh[g] if g < 2 else 0.0), (0, H_pad - H))
             for g in range(3)])                               # (3*Hp,)
        bhn = jnp.pad(bhh[2], (0, H_pad - H))[None, :]         # (1, Hp)
        layers.append(dict(
            wih_f=wih_f.astype(mxu_dtype),
            whh_f=whh_f.astype(mxu_dtype),
            gi_b=gi_b.reshape(1, 1, 3 * H_pad).astype(jnp.float32),
            bhn=bhn.astype(jnp.float32)))
    return dict(emb=params["emb"], layers=layers, H=H, H_pad=H_pad,
                mxu_dtype=mxu_dtype)


# ----------------------------------------------------------------------------
# Forward pass (== LuongEncoder.forward in eval mode, use_birnn=False).
# ----------------------------------------------------------------------------
def luong_encoder_forward(kparams, x_tokens, lengths, *, t_chunk=8, tb=SUBLANE):
    B, T = x_tokens.shape
    H = kparams["H"]
    mxu = kparams["mxu_dtype"]
    # Keep the hoisted XLA-side matmul at full f32 accuracy on the f32 path
    # (XLA's DEFAULT precision may demote f32 matmuls to bf16 on TPU).
    prec = lax.Precision.HIGHEST if mxu == jnp.float32 else lax.Precision.DEFAULT

    emb = jnp.take(kparams["emb"], x_tokens, axis=0)          # (B, T, E) glue
    # dropout -> identity (eval mode)
    x = jnp.transpose(emb, (1, 0, 2))                         # time-major

    T_pad = round_up(T, t_chunk)
    B_pad = round_up(B, tb)
    x = jnp.pad(x, ((0, T_pad - T), (0, B_pad - B), (0, 0)))
    lens2d = jnp.pad(lengths.astype(jnp.int32), (0, B_pad - B))[:, None]

    hs = []
    inp = x                                                   # (T_pad, B_pad, D)
    o = None
    for lp in kparams["layers"]:
        # Hoisted input-to-hidden projection for ALL timesteps: one big
        # MXU-friendly matmul outside the recurrence (biases pre-folded).
        gi = jnp.einsum("tbd,dg->tbg", inp.astype(mxu), lp["wih_f"],
                        preferred_element_type=jnp.float32,
                        precision=prec) + lp["gi_b"]
        o, h = gru_recurrent(gi, lens2d, lp["whh_f"], lp["bhn"],
                             t_chunk=t_chunk, tb=tb)
        hs.append(h[:B, :H])
        inp = o                        # inter-layer dropout = identity (eval)

    o_bf = jnp.transpose(o[:T, :B, :H], (1, 0, 2))            # (B, T, H)
    h_all = jnp.stack(hs, axis=0)                             # (n_layers, B, H)
    return o_bf, h_all


# ----------------------------------------------------------------------------
# Pure-JAX reference (same math, lax.scan) for correctness checks.
# ----------------------------------------------------------------------------
def gru_layer_ref(x_seq, lengths, wih, whh, bih, bhh):
    T, B, _ = x_seq.shape
    H = whh.shape[-1]
    hi = lax.Precision.HIGHEST

    def mm(a, b):
        return jnp.dot(a, b, precision=hi)

    def stepf(h_prev, inp):
        x_t, t = inp
        r = jax.nn.sigmoid(mm(x_t, wih[0]) + bih[0] + mm(h_prev, whh[0]) + bhh[0])
        z = jax.nn.sigmoid(mm(x_t, wih[1]) + bih[1] + mm(h_prev, whh[1]) + bhh[1])
        n = jnp.tanh(mm(x_t, wih[2]) + bih[2] + r * (mm(h_prev, whh[2]) + bhh[2]))
        h_new = (1.0 - z) * n + z * h_prev
        valid = lengths[:, None] > t
        h_upd = jnp.where(valid, h_new, h_prev)
        return h_upd, jnp.where(valid, h_new, 0.0)

    h_last, o = lax.scan(stepf, jnp.zeros((B, H), jnp.float32),
                         (x_seq, jnp.arange(T)))
    return o, h_last


def luong_encoder_ref(params, x_tokens, lengths):
    emb = jnp.take(params["emb"], x_tokens, axis=0)
    inp = jnp.transpose(emb, (1, 0, 2))
    hs = []
    for (wih, whh, bih, bhh) in params["gru"]:
        o, h = gru_layer_ref(inp, lengths, wih, whh, bih, bhh)
        hs.append(h)
        inp = o
    return jnp.transpose(inp, (1, 0, 2)), jnp.stack(hs, axis=0)


# ----------------------------------------------------------------------------
if __name__ == "__main__":
    n_vocab, n_embed, n_hiddens, n_layers = 50, 16, 32, 2
    B, T = 2, 8

    key = jax.random.PRNGKey(0)
    k_param, k_tok = jax.random.split(key)
    params = init_params(k_param, n_vocab, n_embed, n_hiddens, n_layers)

    x_tokens = jax.random.randint(k_tok, (B, T), 0, n_vocab, dtype=jnp.int32)
    lengths = jnp.array([T, 5], dtype=jnp.int32)   # variable-length sequences

    o_gold, h_gold = luong_encoder_ref(params, x_tokens, lengths)

    # f32 MXU path (tight correctness check).
    kp32 = prepare_params(params, jnp.float32)
    fwd32 = jax.jit(functools.partial(luong_encoder_forward, kp32))
    o32, h32 = jax.block_until_ready(fwd32(x_tokens, lengths))
    assert o32.shape == (B, T, n_hiddens) and h32.shape == (n_layers, B, n_hiddens)
    assert jnp.allclose(o32, o_gold, atol=2e-3, rtol=2e-3), \
        float(jnp.max(jnp.abs(o32 - o_gold)))
    assert jnp.allclose(h32, h_gold, atol=2e-3, rtol=2e-3), \
        float(jnp.max(jnp.abs(h32 - h_gold)))

    # bf16 matmul operands (v6e/v7x fast path; gate math stays f32).
    kp16 = prepare_params(params, jnp.bfloat16)
    fwd16 = jax.jit(functools.partial(luong_encoder_forward, kp16))
    o16, h16 = jax.block_until_ready(fwd16(x_tokens, lengths))
    assert o16.shape == (B, T, n_hiddens) and h16.shape == (n_layers, B, n_hiddens)
    assert jnp.allclose(o16, o_gold, atol=5e-2, rtol=5e-2)
    assert jnp.allclose(h16, h_gold, atol=5e-2, rtol=5e-2)

    print("KERNEL_OK")
</pallas_src>

<mosaic_0001>
module attributes {stable_mosaic.version = 11 : i64} {
  func.func @_gru_recurrent_kernel(%arg0: i32, %arg1: i32, %arg2: memref<8x8x384xf32, #tpu.memory_space<vmem>>, %arg3: memref<8x1xi32, #tpu.memory_space<vmem>>, %arg4: memref<128x384xf32, #tpu.memory_space<vmem>>, %arg5: memref<1x128xf32, #tpu.memory_space<vmem>>, %arg6: memref<8x8x128xf32, #tpu.memory_space<vmem>>, %arg7: memref<8x128xf32, #tpu.memory_space<vmem>>, %arg8: memref<8x128xf32, #tpu.memory_space<vmem>>) attributes {dimension_semantics = [#tpu.dimension_semantics<parallel>, #tpu.dimension_semantics<arbitrary>], iteration_bounds = array<i64: 1, 1>, scalar_prefetch = 0 : i64, scratch_operands = 1 : i64, tpu.core_type = #tpu.core_type<tc>, window_params = [{transform_indices = @transform_0, window_bounds = array<i64: 8, 8, 384>}, {transform_indices = @transform_1, window_bounds = array<i64: 8, 1>}, {pipeline_mode = #tpu.pipeline_mode<synchronous>, transform_indices = @transform_2, window_bounds = array<i64: 128, 384>}, {pipeline_mode = #tpu.pipeline_mode<synchronous>, transform_indices = @transform_3, window_bounds = array<i64: 1, 128>}, {transform_indices = @transform_4, window_bounds = array<i64: 8, 8, 128>}, {transform_indices = @transform_5, window_bounds = array<i64: 8, 128>}]} {
    %c8_i32 = arith.constant 8 : i32
    %0 = arith.muli %arg1, %c8_i32 : i32
    %c0 = arith.constant 0 : index
    %c0_0 = arith.constant 0 : index
    %1 = vector.load %arg3[%c0, %c0_0] : memref<8x1xi32, #tpu.memory_space<vmem>>, vector<8x1xi32>
    %c0_i32 = arith.constant 0 : i32
    %2 = arith.cmpi eq, %arg1, %c0_i32 : i32
    %3 = arith.extui %2 : i1 to i32
    %c0_i32_1 = arith.constant 0 : i32
    %4 = arith.cmpi ne, %3, %c0_i32_1 : i32
    scf.if %4 {
      %cst_77 = arith.constant 0.000000e+00 : f32
      %364 = vector.broadcast %cst_77 : f32 to vector<8x128xf32>
      %c0_78 = arith.constant 0 : index
      %c0_79 = arith.constant 0 : index
      %365 = vector.load %arg8[%c0_78, %c0_79] : memref<8x128xf32, #tpu.memory_space<vmem>>, vector<8x128xf32>
      tpu.vector_store %arg8[%c0_78, %c0_79], %364 {strides = array<i32>} : memref<8x128xf32, #tpu.memory_space<vmem>>, vector<8x128xf32>,
    } else {
    }
    %c0_2 = arith.constant 0 : index
    %c0_3 = arith.constant 0 : index
    %5 = vector.load %arg4[%c0_2, %c0_3] : memref<128x384xf32, #tpu.memory_space<vmem>>, vector<128x384xf32>
    %c0_4 = arith.constant 0 : index
    %c0_5 = arith.constant 0 : index
    %6 = vector.load %arg5[%c0_4, %c0_5] : memref<1x128xf32, #tpu.memory_space<vmem>>, vector<1x128xf32>
    %c0_6 = arith.constant 0 : index
    %c0_7 = arith.constant 0 : index
    %7 = vector.load %arg8[%c0_6, %c0_7] : memref<8x128xf32, #tpu.memory_space<vmem>>, vector<8x128xf32>
    %c0_i32_8 = arith.constant 0 : i32
    %8 = arith.index_cast %c0_i32_8 : i32 to index
    %c0_9 = arith.constant 0 : index
    %c0_10 = arith.constant 0 : index
    %9 = vector.load %arg2[%8, %c0_9, %c0_10] : memref<8x8x384xf32, #tpu.memory_space<vmem>>, vector<1x8x384xf32>
    %10 = vector.shape_cast %9 : vector<1x8x384xf32> to vector<8x384xf32>
    %cst = arith.constant dense<0.000000e+00> : vector<8x384xf32>
    %11 = tpu.matmul %7, %5, %cst {dimension_numbers = #tpu.dot_dimension_numbers<[1], [0], [0], [1], [0, 0, 1, 1], [], []>} : vector<8x128xf32>, vector<128x384xf32>, vector<8x384xf32> -> vector<8x384xf32>
    %12 = vector.extract_strided_slice %10 {offsets = [0, 0], sizes = [8, 128], strides = [1, 1]} : vector<8x384xf32> to vector<8x128xf32>
    %13 = vector.extract_strided_slice %11 {offsets = [0, 0], sizes = [8, 128], strides = [1, 1]} : vector<8x384xf32> to vector<8x128xf32>
    %14 = arith.addf %12, %13 : vector<8x128xf32>
    %15 = arith.negf %14 : vector<8x128xf32>
    %16 = math.exp %15 : vector<8x128xf32>
    %cst_11 = arith.constant 1.000000e+00 : f32
    %17 = vector.broadcast %cst_11 : f32 to vector<8x128xf32>
    %18 = arith.addf %17, %16 : vector<8x128xf32>
    %19 = arith.divf %17, %18 : vector<8x128xf32>
    %20 = vector.extract_strided_slice %10 {offsets = [0, 128], sizes = [8, 128], strides = [1, 1]} : vector<8x384xf32> to vector<8x128xf32>
    %21 = vector.extract_strided_slice %11 {offsets = [0, 128], sizes = [8, 128], strides = [1, 1]} : vector<8x384xf32> to vector<8x128xf32>
    %22 = arith.addf %20, %21 : vector<8x128xf32>
    %23 = arith.negf %22 : vector<8x128xf32>
    %24 = math.exp %23 : vector<8x128xf32>
    %cst_12 = arith.constant 1.000000e+00 : f32
    %25 = vector.broadcast %cst_12 : f32 to vector<8x128xf32>
    %26 = arith.addf %25, %24 : vector<8x128xf32>
    %27 = arith.divf %25, %26 : vector<8x128xf32>
    %28 = vector.extract_strided_slice %10 {offsets = [0, 256], sizes = [8, 128], strides = [1, 1]} : vector<8x384xf32> to vector<8x128xf32>
    %29 = vector.extract_strided_slice %11 {offsets = [0, 256], sizes = [8, 128], strides = [1, 1]} : vector<8x384xf32> to vector<8x128xf32>
    %30 = vector.broadcast %6 : vector<1x128xf32> to vector<8x128xf32>
    %31 = arith.addf %29, %30 : vector<8x128xf32>
    %32 = arith.mulf %19, %31 : vector<8x128xf32>
    %33 = arith.addf %28, %32 : vector<8x128xf32>
    %34 = math.tanh %33 : vector<8x128xf32>
    %35 = arith.subf %7, %34 : vector<8x128xf32>
    %36 = arith.mulf %27, %35 : vector<8x128xf32>
    %37 = arith.addf %34, %36 : vector<8x128xf32>
    %38 = arith.addi %0, %c0_i32_8 : i32
    %39 = vector.broadcast %38 : i32 to vector<8x1xi32>
    %40 = arith.cmpi sgt, %1, %39 : vector<8x1xi32>
    %41 = vector.shape_cast %40 : vector<8x1xi1> to vector<8x1xi1>
    %42 = vector.broadcast %41 : vector<8x1xi1> to vector<8x128xi1>
    %43 = arith.select %42, %37, %7 : vector<8x128xi1>, vector<8x128xf32>
    %cst_13 = arith.constant 0.000000e+00 : f32
    %44 = vector.shape_cast %40 : vector<8x1xi1> to vector<8x1xi1>
    %45 = vector.broadcast %44 : vector<8x1xi1> to vector<8x128xi1>
    %46 = vector.broadcast %cst_13 : f32 to vector<8x128xf32>
    %47 = arith.select %45, %37, %46 : vector<8x128xi1>, vector<8x128xf32>
    %48 = arith.index_cast %c0_i32_8 : i32 to index
    %c0_14 = arith.constant 0 : index
    %c0_15 = arith.constant 0 : index
    %49 = vector.load %arg6[%48, %c0_14, %c0_15] : memref<8x8x128xf32, #tpu.memory_space<vmem>>, vector<1x8x128xf32>
    %50 = vector.shape_cast %49 : vector<1x8x128xf32> to vector<8x128xf32>
    %51 = vector.shape_cast %47 : vector<8x128xf32> to vector<1x8x128xf32>
    tpu.vector_store %arg6[%48, %c0_14, %c0_15], %51 {strides = array<i32>} : memref<8x8x128xf32, #tpu.memory_space<vmem>>, vector<1x8x128xf32>,
    %c1_i32 = arith.constant 1 : i32
    %52 = arith.index_cast %c1_i32 : i32 to index
    %c0_16 = arith.constant 0 : index
    %c0_17 = arith.constant 0 : index
    %53 = vector.load %arg2[%52, %c0_16, %c0_17] : memref<8x8x384xf32, #tpu.memory_space<vmem>>, vector<1x8x384xf32>
    %54 = vector.shape_cast %53 : vector<1x8x384xf32> to vector<8x384xf32>
    %cst_18 = arith.constant dense<0.000000e+00> : vector<8x384xf32>
    %55 = tpu.matmul %43, %5, %cst_18 {dimension_numbers = #tpu.dot_dimension_numbers<[1], [0], [0], [1], [0, 0, 1, 1], [], []>} : vector<8x128xf32>, vector<128x384xf32>, vector<8x384xf32> -> vector<8x384xf32>
    %56 = vector.extract_strided_slice %54 {offsets = [0, 0], sizes = [8, 128], strides = [1, 1]} : vector<8x384xf32> to vector<8x128xf32>
    %57 = vector.extract_strided_slice %55 {offsets = [0, 0], sizes = [8, 128], strides = [1, 1]} : vector<8x384xf32> to vector<8x128xf32>
    %58 = arith.addf %56, %57 : vector<8x128xf32>
    %59 = arith.negf %58 : vector<8x128xf32>
    %60 = math.exp %59 : vector<8x128xf32>
    %cst_19 = arith.constant 1.000000e+00 : f32
    %61 = vector.broadcast %cst_19 : f32 to vector<8x128xf32>
    %62 = arith.addf %61, %60 : vector<8x128xf32>
    %63 = arith.divf %61, %62 : vector<8x128xf32>
    %64 = vector.extract_strided_slice %54 {offsets = [0, 128], sizes = [8, 128], strides = [1, 1]} : vector<8x384xf32> to vector<8x128xf32>
    %65 = vector.extract_strided_slice %55 {offsets = [0, 128], sizes = [8, 128], strides = [1, 1]} : vector<8x384xf32> to vector<8x128xf32>
    %66 = arith.addf %64, %65 : vector<8x128xf32>
    %67 = arith.negf %66 : vector<8x128xf32>
    %68 = math.exp %67 : vector<8x128xf32>
    %cst_20 = arith.constant 1.000000e+00 : f32
    %69 = vector.broadcast %cst_20 : f32 to vector<8x128xf32>
    %70 = arith.addf %69, %68 : vector<8x128xf32>
    %71 = arith.divf %69, %70 : vector<8x128xf32>
    %72 = vector.extract_strided_slice %54 {offsets = [0, 256], sizes = [8, 128], strides = [1, 1]} : vector<8x384xf32> to vector<8x128xf32>
    %73 = vector.extract_strided_slice %55 {offsets = [0, 256], sizes = [8, 128], strides = [1, 1]} : vector<8x384xf32> to vector<8x128xf32>
    %74 = vector.broadcast %6 : vector<1x128xf32> to vector<8x128xf32>
    %75 = arith.addf %73, %74 : vector<8x128xf32>
    %76 = arith.mulf %63, %75 : vector<8x128xf32>
    %77 = arith.addf %72, %76 : vector<8x128xf32>
    %78 = math.tanh %77 : vector<8x128xf32>
    %79 = arith.subf %43, %78 : vector<8x128xf32>
    %80 = arith.mulf %71, %79 : vector<8x128xf32>
    %81 = arith.addf %78, %80 : vector<8x128xf32>
    %82 = arith.addi %0, %c1_i32 : i32
    %83 = vector.broadcast %82 : i32 to vector<8x1xi32>
    %84 = arith.cmpi sgt, %1, %83 : vector<8x1xi32>
    %85 = vector.shape_cast %84 : vector<8x1xi1> to vector<8x1xi1>
    %86 = vector.broadcast %85 : vector<8x1xi1> to vector<8x128xi1>
    %87 = arith.select %86, %81, %43 : vector<8x128xi1>, vector<8x128xf32>
    %cst_21 = arith.constant 0.000000e+00 : f32
    %88 = vector.shape_cast %84 : vector<8x1xi1> to vector<8x1xi1>
    %89 = vector.broadcast %88 : vector<8x1xi1> to vector<8x128xi1>
    %90 = vector.broadcast %cst_21 : f32 to vector<8x128xf32>
    %91 = arith.select %89, %81, %90 : vector<8x128xi1>, vector<8x128xf32>
    %92 = arith.index_cast %c1_i32 : i32 to index
    %c0_22 = arith.constant 0 : index
    %c0_23 = arith.constant 0 : index
    %93 = vector.load %arg6[%92, %c0_22, %c0_23] : memref<8x8x128xf32, #tpu.memory_space<vmem>>, vector<1x8x128xf32>
    %94 = vector.shape_cast %93 : vector<1x8x128xf32> to vector<8x128xf32>
    %95 = vector.shape_cast %91 : vector<8x128xf32> to vector<1x8x128xf32>
    tpu.vector_store %arg6[%92, %c0_22, %c0_23], %95 {strides = array<i32>} : memref<8x8x128xf32, #tpu.memory_space<vmem>>, vector<1x8x128xf32>,
    %c2_i32 = arith.constant 2 : i32
    %96 = arith.index_cast %c2_i32 : i32 to index
    %c0_24 = arith.constant 0 : index
    %c0_25 = arith.constant 0 : index
    %97 = vector.load %arg2[%96, %c0_24, %c0_25] : memref<8x8x384xf32, #tpu.memory_space<vmem>>, vector<1x8x384xf32>
    %98 = vector.shape_cast %97 : vector<1x8x384xf32> to vector<8x384xf32>
    %cst_26 = arith.constant dense<0.000000e+00> : vector<8x384xf32>
    %99 = tpu.matmul %87, %5, %cst_26 {dimension_numbers = #tpu.dot_dimension_numbers<[1], [0], [0], [1], [0, 0, 1, 1], [], []>} : vector<8x128xf32>, vector<128x384xf32>, vector<8x384xf32> -> vector<8x384xf32>
    %100 = vector.extract_strided_slice %98 {offsets = [0, 0], sizes = [8, 128], strides = [1, 1]} : vector<8x384xf32> to vector<8x128xf32>
    %101 = vector.extract_strided_slice %99 {offsets = [0, 0], sizes = [8, 128], strides = [1, 1]} : vector<8x384xf32> to vector<8x128xf32>
    %102 = arith.addf %100, %101 : vector<8x128xf32>
    %103 = arith.negf %102 : vector<8x128xf32>
    %104 = math.exp %103 : vector<8x128xf32>
    %cst_27 = arith.constant 1.000000e+00 : f32
    %105 = vector.broadcast %cst_27 : f32 to vector<8x128xf32>
    %106 = arith.addf %105, %104 : vector<8x128xf32>
    %107 = arith.divf %105, %106 : vector<8x128xf32>
    %108 = vector.extract_strided_slice %98 {offsets = [0, 128], sizes = [8, 128], strides = [1, 1]} : vector<8x384xf32> to vector<8x128xf32>
    %109 = vector.extract_strided_slice %99 {offsets = [0, 128], sizes = [8, 128], strides = [1, 1]} : vector<8x384xf32> to vector<8x128xf32>
    %110 = arith.addf %108, %109 : vector<8x128xf32>
    %111 = arith.negf %110 : vector<8x128xf32>
    %112 = math.exp %111 : vector<8x128xf32>
    %cst_28 = arith.constant 1.000000e+00 : f32
    %113 = vector.broadcast %cst_28 : f32 to vector<8x128xf32>
    %114 = arith.addf %113, %112 : vector<8x128xf32>
    %115 = arith.divf %113, %114 : vector<8x128xf32>
    %116 = vector.extract_strided_slice %98 {offsets = [0, 256], sizes = [8, 128], strides = [1, 1]} : vector<8x384xf32> to vector<8x128xf32>
    %117 = vector.extract_strided_slice %99 {offsets = [0, 256], sizes = [8, 128], strides = [1, 1]} : vector<8x384xf32> to vector<8x128xf32>
    %118 = vector.broadcast %6 : vector<1x128xf32> to vector<8x128xf32>
    %119 = arith.addf %117, %118 : vector<8x128xf32>
    %120 = arith.mulf %107, %119 : vector<8x128xf32>
    %121 = arith.addf %116, %120 : vector<8x128xf32>
    %122 = math.tanh %121 : vector<8x128xf32>
    %123 = arith.subf %87, %122 : vector<8x128xf32>
    %124 = arith.mulf %115, %123 : vector<8x128xf32>
    %125 = arith.addf %122, %124 : vector<8x128xf32>
    %126 = arith.addi %0, %c2_i32 : i32
    %127 = vector.broadcast %126 : i32 to vector<8x1xi32>
    %128 = arith.cmpi sgt, %1, %127 : vector<8x1xi32>
    %129 = vector.shape_cast %128 : vector<8x1xi1> to vector<8x1xi1>
    %130 = vector.broadcast %129 : vector<8x1xi1> to vector<8x128xi1>
    %131 = arith.select %130, %125, %87 : vector<8x128xi1>, vector<8x128xf32>
    %cst_29 = arith.constant 0.000000e+00 : f32
    %132 = vector.shape_cast %128 : vector<8x1xi1> to vector<8x1xi1>
    %133 = vector.broadcast %132 : vector<8x1xi1> to vector<8x128xi1>
    %134 = vector.broadcast %cst_29 : f32 to vector<8x128xf32>
    %135 = arith.select %133, %125, %134 : vector<8x128xi1>, vector<8x128xf32>
    %136 = arith.index_cast %c2_i32 : i32 to index
    %c0_30 = arith.constant 0 : index
    %c0_31 = arith.constant 0 : index
    %137 = vector.load %arg6[%136, %c0_30, %c0_31] : memref<8x8x128xf32, #tpu.memory_space<vmem>>, vector<1x8x128xf32>
    %138 = vector.shape_cast %137 : vector<1x8x128xf32> to vector<8x128xf32>
    %139 = vector.shape_cast %135 : vector<8x128xf32> to vector<1x8x128xf32>
    tpu.vector_store %arg6[%136, %c0_30, %c0_31], %139 {strides = array<i32>} : memref<8x8x128xf32, #tpu.memory_space<vmem>>, vector<1x8x128xf32>,
    %c3_i32 = arith.constant 3 : i32
    %140 = arith.index_cast %c3_i32 : i32 to index
    %c0_32 = arith.constant 0 : index
    %c0_33 = arith.constant 0 : index
    %141 = vector.load %arg2[%140, %c0_32, %c0_33] : memref<8x8x384xf32, #tpu.memory_space<vmem>>, vector<1x8x384xf32>
    %142 = vector.shape_cast %141 : vector<1x8x384xf32> to vector<8x384xf32>
    %cst_34 = arith.constant dense<0.000000e+00> : vector<8x384xf32>
    %143 = tpu.matmul %131, %5, %cst_34 {dimension_numbers = #tpu.dot_dimension_numbers<[1], [0], [0], [1], [0, 0, 1, 1], [], []>} : vector<8x128xf32>, vector<128x384xf32>, vector<8x384xf32> -> vector<8x384xf32>
    %144 = vector.extract_strided_slice %142 {offsets = [0, 0], sizes = [8, 128], strides = [1, 1]} : vector<8x384xf32> to vector<8x128xf32>
    %145 = vector.extract_strided_slice %143 {offsets = [0, 0], sizes = [8, 128], strides = [1, 1]} : vector<8x384xf32> to vector<8x128xf32>
    %146 = arith.addf %144, %145 : vector<8x128xf32>
    %147 = arith.negf %146 : vector<8x128xf32>
    %148 = math.exp %147 : vector<8x128xf32>
    %cst_35 = arith.constant 1.000000e+00 : f32
    %149 = vector.broadcast %cst_35 : f32 to vector<8x128xf32>
    %150 = arith.addf %149, %148 : vector<8x128xf32>
    %151 = arith.divf %149, %150 : vector<8x128xf32>
    %152 = vector.extract_strided_slice %142 {offsets = [0, 128], sizes = [8, 128], strides = [1, 1]} : vector<8x384xf32> to vector<8x128xf32>
    %153 = vector.extract_strided_slice %143 {offsets = [0, 128], sizes = [8, 128], strides = [1, 1]} : vector<8x384xf32> to vector<8x128xf32>
    %154 = arith.addf %152, %153 : vector<8x128xf32>
    %155 = arith.negf %154 : vector<8x128xf32>
    %156 = math.exp %155 : vector<8x128xf32>
    %cst_36 = arith.constant 1.000000e+00 : f32
    %157 = vector.broadcast %cst_36 : f32 to vector<8x128xf32>
    %158 = arith.addf %157, %156 : vector<8x128xf32>
    %159 = arith.divf %157, %158 : vector<8x128xf32>
    %160 = vector.extract_strided_slice %142 {offsets = [0, 256], sizes = [8, 128], strides = [1, 1]} : vector<8x384xf32> to vector<8x128xf32>
    %161 = vector.extract_strided_slice %143 {offsets = [0, 256], sizes = [8, 128], strides = [1, 1]} : vector<8x384xf32> to vector<8x128xf32>
    %162 = vector.broadcast %6 : vector<1x128xf32> to vector<8x128xf32>
    %163 = arith.addf %161, %162 : vector<8x128xf32>
    %164 = arith.mulf %151, %163 : vector<8x128xf32>
    %165 = arith.addf %160, %164 : vector<8x128xf32>
    %166 = math.tanh %165 : vector<8x128xf32>
    %167 = arith.subf %131, %166 : vector<8x128xf32>
    %168 = arith.mulf %159, %167 : vector<8x128xf32>
    %169 = arith.addf %166, %168 : vector<8x128xf32>
    %170 = arith.addi %0, %c3_i32 : i32
    %171 = vector.broadcast %170 : i32 to vector<8x1xi32>
    %172 = arith.cmpi sgt, %1, %171 : vector<8x1xi32>
    %173 = vector.shape_cast %172 : vector<8x1xi1> to vector<8x1xi1>
    %174 = vector.broadcast %173 : vector<8x1xi1> to vector<8x128xi1>
    %175 = arith.select %174, %169, %131 : vector<8x128xi1>, vector<8x128xf32>
    %cst_37 = arith.constant 0.000000e+00 : f32
    %176 = vector.shape_cast %172 : vector<8x1xi1> to vector<8x1xi1>
    %177 = vector.broadcast %176 : vector<8x1xi1> to vector<8x128xi1>
    %178 = vector.broadcast %cst_37 : f32 to vector<8x128xf32>
    %179 = arith.select %177, %169, %178 : vector<8x128xi1>, vector<8x128xf32>
    %180 = arith.index_cast %c3_i32 : i32 to index
    %c0_38 = arith.constant 0 : index
    %c0_39 = arith.constant 0 : index
    %181 = vector.load %arg6[%180, %c0_38, %c0_39] : memref<8x8x128xf32, #tpu.memory_space<vmem>>, vector<1x8x128xf32>
    %182 = vector.shape_cast %181 : vector<1x8x128xf32> to vector<8x128xf32>
    %183 = vector.shape_cast %179 : vector<8x128xf32> to vector<1x8x128xf32>
    tpu.vector_store %arg6[%180, %c0_38, %c0_39], %183 {strides = array<i32>} : memref<8x8x128xf32, #tpu.memory_space<vmem>>, vector<1x8x128xf32>,
    %c4_i32 = arith.constant 4 : i32
    %184 = arith.index_cast %c4_i32 : i32 to index
    %c0_40 = arith.constant 0 : index
    %c0_41 = arith.constant 0 : index
    %185 = vector.load %arg2[%184, %c0_40, %c0_41] : memref<8x8x384xf32, #tpu.memory_space<vmem>>, vector<1x8x384xf32>
    %186 = vector.shape_cast %185 : vector<1x8x384xf32> to vector<8x384xf32>
    %cst_42 = arith.constant dense<0.000000e+00> : vector<8x384xf32>
    %187 = tpu.matmul %175, %5, %cst_42 {dimension_numbers = #tpu.dot_dimension_numbers<[1], [0], [0], [1], [0, 0, 1, 1], [], []>} : vector<8x128xf32>, vector<128x384xf32>, vector<8x384xf32> -> vector<8x384xf32>
    %188 = vector.extract_strided_slice %186 {offsets = [0, 0], sizes = [8, 128], strides = [1, 1]} : vector<8x384xf32> to vector<8x128xf32>
    %189 = vector.extract_strided_slice %187 {offsets = [0, 0], sizes = [8, 128], strides = [1, 1]} : vector<8x384xf32> to vector<8x128xf32>
    %190 = arith.addf %188, %189 : vector<8x128xf32>
    %191 = arith.negf %190 : vector<8x128xf32>
    %192 = math.exp %191 : vector<8x128xf32>
    %cst_43 = arith.constant 1.000000e+00 : f32
    %193 = vector.broadcast %cst_43 : f32 to vector<8x128xf32>
    %194 = arith.addf %193, %192 : vector<8x128xf32>
    %195 = arith.divf %193, %194 : vector<8x128xf32>
    %196 = vector.extract_strided_slice %186 {offsets = [0, 128], sizes = [8, 128], strides = [1, 1]} : vector<8x384xf32> to vector<8x128xf32>
    %197 = vector.extract_strided_slice %187 {offsets = [0, 128], sizes = [8, 128], strides = [1, 1]} : vector<8x384xf32> to vector<8x128xf32>
    %198 = arith.addf %196, %197 : vector<8x128xf32>
    %199 = arith.negf %198 : vector<8x128xf32>
    %200 = math.exp %199 : vector<8x128xf32>
    %cst_44 = arith.constant 1.000000e+00 : f32
    %201 = vector.broadcast %cst_44 : f32 to vector<8x128xf32>
    %202 = arith.addf %201, %200 : vector<8x128xf32>
    %203 = arith.divf %201, %202 : vector<8x128xf32>
    %204 = vector.extract_strided_slice %186 {offsets = [0, 256], sizes = [8, 128], strides = [1, 1]} : vector<8x384xf32> to vector<8x128xf32>
    %205 = vector.extract_strided_slice %187 {offsets = [0, 256], sizes = [8, 128], strides = [1, 1]} : vector<8x384xf32> to vector<8x128xf32>
    %206 = vector.broadcast %6 : vector<1x128xf32> to vector<8x128xf32>
    %207 = arith.addf %205, %206 : vector<8x128xf32>
    %208 = arith.mulf %195, %207 : vector<8x128xf32>
    %209 = arith.addf %204, %208 : vector<8x128xf32>
    %210 = math.tanh %209 : vector<8x128xf32>
    %211 = arith.subf %175, %210 : vector<8x128xf32>
    %212 = arith.mulf %203, %211 : vector<8x128xf32>
    %213 = arith.addf %210, %212 : vector<8x128xf32>
    %214 = arith.addi %0, %c4_i32 : i32
    %215 = vector.broadcast %214 : i32 to vector<8x1xi32>
    %216 = arith.cmpi sgt, %1, %215 : vector<8x1xi32>
    %217 = vector.shape_cast %216 : vector<8x1xi1> to vector<8x1xi1>
    %218 = vector.broadcast %217 : vector<8x1xi1> to vector<8x128xi1>
    %219 = arith.select %218, %213, %175 : vector<8x128xi1>, vector<8x128xf32>
    %cst_45 = arith.constant 0.000000e+00 : f32
    %220 = vector.shape_cast %216 : vector<8x1xi1> to vector<8x1xi1>
    %221 = vector.broadcast %220 : vector<8x1xi1> to vector<8x128xi1>
    %222 = vector.broadcast %cst_45 : f32 to vector<8x128xf32>
    %223 = arith.select %221, %213, %222 : vector<8x128xi1>, vector<8x128xf32>
    %224 = arith.index_cast %c4_i32 : i32 to index
    %c0_46 = arith.constant 0 : index
    %c0_47 = arith.constant 0 : index
    %225 = vector.load %arg6[%224, %c0_46, %c0_47] : memref<8x8x128xf32, #tpu.memory_space<vmem>>, vector<1x8x128xf32>
    %226 = vector.shape_cast %225 : vector<1x8x128xf32> to vector<8x128xf32>
    %227 = vector.shape_cast %223 : vector<8x128xf32> to vector<1x8x128xf32>
    tpu.vector_store %arg6[%224, %c0_46, %c0_47], %227 {strides = array<i32>} : memref<8x8x128xf32, #tpu.memory_space<vmem>>, vector<1x8x128xf32>,
    %c5_i32 = arith.constant 5 : i32
    %228 = arith.index_cast %c5_i32 : i32 to index
    %c0_48 = arith.constant 0 : index
    %c0_49 = arith.constant 0 : index
    %229 = vector.load %arg2[%228, %c0_48, %c0_49] : memref<8x8x384xf32, #tpu.memory_space<vmem>>, vector<1x8x384xf32>
    %230 = vector.shape_cast %229 : vector<1x8x384xf32> to vector<8x384xf32>
    %cst_50 = arith.constant dense<0.000000e+00> : vector<8x384xf32>
    %231 = tpu.matmul %219, %5, %cst_50 {dimension_numbers = #tpu.dot_dimension_numbers<[1], [0], [0], [1], [0, 0, 1, 1], [], []>} : vector<8x128xf32>, vector<128x384xf32>, vector<8x384xf32> -> vector<8x384xf32>
    %232 = vector.extract_strided_slice %230 {offsets = [0, 0], sizes = [8, 128], strides = [1, 1]} : vector<8x384xf32> to vector<8x128xf32>
    %233 = vector.extract_strided_slice %231 {offsets = [0, 0], sizes = [8, 128], strides = [1, 1]} : vector<8x384xf32> to vector<8x128xf32>
    %234 = arith.addf %232, %233 : vector<8x128xf32>
    %235 = arith.negf %234 : vector<8x128xf32>
    %236 = math.exp %235 : vector<8x128xf32>
    %cst_51 = arith.constant 1.000000e+00 : f32
    %237 = vector.broadcast %cst_51 : f32 to vector<8x128xf32>
    %238 = arith.addf %237, %236 : vector<8x128xf32>
    %239 = arith.divf %237, %238 : vector<8x128xf32>
    %240 = vector.extract_strided_slice %230 {offsets = [0, 128], sizes = [8, 128], strides = [1, 1]} : vector<8x384xf32> to vector<8x128xf32>
    %241 = vector.extract_strided_slice %231 {offsets = [0, 128], sizes = [8, 128], strides = [1, 1]} : vector<8x384xf32> to vector<8x128xf32>
    %242 = arith.addf %240, %241 : vector<8x128xf32>
    %243 = arith.negf %242 : vector<8x128xf32>
    %244 = math.exp %243 : vector<8x128xf32>
    %cst_52 = arith.constant 1.000000e+00 : f32
    %245 = vector.broadcast %cst_52 : f32 to vector<8x128xf32>
    %246 = arith.addf %245, %244 : vector<8x128xf32>
    %247 = arith.divf %245, %246 : vector<8x128xf32>
    %248 = vector.extract_strided_slice %230 {offsets = [0, 256], sizes = [8, 128], strides = [1, 1]} : vector<8x384xf32> to vector<8x128xf32>
    %249 = vector.extract_strided_slice %231 {offsets = [0, 256], sizes = [8, 128], strides = [1, 1]} : vector<8x384xf32> to vector<8x128xf32>
    %250 = vector.broadcast %6 : vector<1x128xf32> to vector<8x128xf32>
    %251 = arith.addf %249, %250 : vector<8x128xf32>
    %252 = arith.mulf %239, %251 : vector<8x128xf32>
    %253 = arith.addf %248, %252 : vector<8x128xf32>
    %254 = math.tanh %253 : vector<8x128xf32>
    %255 = arith.subf %219, %254 : vector<8x128xf32>
    %256 = arith.mulf %247, %255 : vector<8x128xf32>
    %257 = arith.addf %254, %256 : vector<8x128xf32>
    %258 = arith.addi %0, %c5_i32 : i32
    %259 = vector.broadcast %258 : i32 to vector<8x1xi32>
    %260 = arith.cmpi sgt, %1, %259 : vector<8x1xi32>
    %261 = vector.shape_cast %260 : vector<8x1xi1> to vector<8x1xi1>
    %262 = vector.broadcast %261 : vector<8x1xi1> to vector<8x128xi1>
    %263 = arith.select %262, %257, %219 : vector<8x128xi1>, vector<8x128xf32>
    %cst_53 = arith.constant 0.000000e+00 : f32
    %264 = vector.shape_cast %260 : vector<8x1xi1> to vector<8x1xi1>
    %265 = vector.broadcast %264 : vector<8x1xi1> to vector<8x128xi1>
    %266 = vector.broadcast %cst_53 : f32 to vector<8x128xf32>
    %267 = arith.select %265, %257, %266 : vector<8x128xi1>, vector<8x128xf32>
    %268 = arith.index_cast %c5_i32 : i32 to index
    %c0_54 = arith.constant 0 : index
    %c0_55 = arith.constant 0 : index
    %269 = vector.load %arg6[%268, %c0_54, %c0_55] : memref<8x8x128xf32, #tpu.memory_space<vmem>>, vector<1x8x128xf32>
    %270 = vector.shape_cast %269 : vector<1x8x128xf32> to vector<8x128xf32>
    %271 = vector.shape_cast %267 : vector<8x128xf32> to vector<1x8x128xf32>
    tpu.vector_store %arg6[%268, %c0_54, %c0_55], %271 {strides = array<i32>} : memref<8x8x128xf32, #tpu.memory_space<vmem>>, vector<1x8x128xf32>,
    %c6_i32 = arith.constant 6 : i32
    %272 = arith.index_cast %c6_i32 : i32 to index
    %c0_56 = arith.constant 0 : index
    %c0_57 = arith.constant 0 : index
    %273 = vector.load %arg2[%272, %c0_56, %c0_57] : memref<8x8x384xf32, #tpu.memory_space<vmem>>, vector<1x8x384xf32>
    %274 = vector.shape_cast %273 : vector<1x8x384xf32> to vector<8x384xf32>
    %cst_58 = arith.constant dense<0.000000e+00> : vector<8x384xf32>
    %275 = tpu.matmul %263, %5, %cst_58 {dimension_numbers = #tpu.dot_dimension_numbers<[1], [0], [0], [1], [0, 0, 1, 1], [], []>} : vector<8x128xf32>, vector<128x384xf32>, vector<8x384xf32> -> vector<8x384xf32>
    %276 = vector.extract_strided_slice %274 {offsets = [0, 0], sizes = [8, 128], strides = [1, 1]} : vector<8x384xf32> to vector<8x128xf32>
    %277 = vector.extract_strided_slice %275 {offsets = [0, 0], sizes = [8, 128], strides = [1, 1]} : vector<8x384xf32> to vector<8x128xf32>
    %278 = arith.addf %276, %277 : vector<8x128xf32>
    %279 = arith.negf %278 : vector<8x128xf32>
    %280 = math.exp %279 : vector<8x128xf32>
    %cst_59 = arith.constant 1.000000e+00 : f32
    %281 = vector.broadcast %cst_59 : f32 to vector<8x128xf32>
    %282 = arith.addf %281, %280 : vector<8x128xf32>
    %283 = arith.divf %281, %282 : vector<8x128xf32>
    %284 = vector.extract_strided_slice %274 {offsets = [0, 128], sizes = [8, 128], strides = [1, 1]} : vector<8x384xf32> to vector<8x128xf32>
    %285 = vector.extract_strided_slice %275 {offsets = [0, 128], sizes = [8, 128], strides = [1, 1]} : vector<8x384xf32> to vector<8x128xf32>
    %286 = arith.addf %284, %285 : vector<8x128xf32>
    %287 = arith.negf %286 : vector<8x128xf32>
    %288 = math.exp %287 : vector<8x128xf32>
    %cst_60 = arith.constant 1.000000e+00 : f32
    %289 = vector.broadcast %cst_60 : f32 to vector<8x128xf32>
    %290 = arith.addf %289, %288 : vector<8x128xf32>
    %291 = arith.divf %289, %290 : vector<8x128xf32>
    %292 = vector.extract_strided_slice %274 {offsets = [0, 256], sizes = [8, 128], strides = [1, 1]} : vector<8x384xf32> to vector<8x128xf32>
    %293 = vector.extract_strided_slice %275 {offsets = [0, 256], sizes = [8, 128], strides = [1, 1]} : vector<8x384xf32> to vector<8x128xf32>
    %294 = vector.broadcast %6 : vector<1x128xf32> to vector<8x128xf32>
    %295 = arith.addf %293, %294 : vector<8x128xf32>
    %296 = arith.mulf %283, %295 : vector<8x128xf32>
    %297 = arith.addf %292, %296 : vector<8x128xf32>
    %298 = math.tanh %297 : vector<8x128xf32>
    %299 = arith.subf %263, %298 : vector<8x128xf32>
    %300 = arith.mulf %291, %299 : vector<8x128xf32>
    %301 = arith.addf %298, %300 : vector<8x128xf32>
    %302 = arith.addi %0, %c6_i32 : i32
    %303 = vector.broadcast %302 : i32 to vector<8x1xi32>
    %304 = arith.cmpi sgt, %1, %303 : vector<8x1xi32>
    %305 = vector.shape_cast %304 : vector<8x1xi1> to vector<8x1xi1>
    %306 = vector.broadcast %305 : vector<8x1xi1> to vector<8x128xi1>
    %307 = arith.select %306, %301, %263 : vector<8x128xi1>, vector<8x128xf32>
    %cst_61 = arith.constant 0.000000e+00 : f32
    %308 = vector.shape_cast %304 : vector<8x1xi1> to vector<8x1xi1>
    %309 = vector.broadcast %308 : vector<8x1xi1> to vector<8x128xi1>
    %310 = vector.broadcast %cst_61 : f32 to vector<8x128xf32>
    %311 = arith.select %309, %301, %310 : vector<8x128xi1>, vector<8x128xf32>
    %312 = arith.index_cast %c6_i32 : i32 to index
    %c0_62 = arith.constant 0 : index
    %c0_63 = arith.constant 0 : index
    %313 = vector.load %arg6[%312, %c0_62, %c0_63] : memref<8x8x128xf32, #tpu.memory_space<vmem>>, vector<1x8x128xf32>
    %314 = vector.shape_cast %313 : vector<1x8x128xf32> to vector<8x128xf32>
    %315 = vector.shape_cast %311 : vector<8x128xf32> to vector<1x8x128xf32>
    tpu.vector_store %arg6[%312, %c0_62, %c0_63], %315 {strides = array<i32>} : memref<8x8x128xf32, #tpu.memory_space<vmem>>, vector<1x8x128xf32>,
    %c7_i32 = arith.constant 7 : i32
    %316 = arith.index_cast %c7_i32 : i32 to index
    %c0_64 = arith.constant 0 : index
    %c0_65 = arith.constant 0 : index
    %317 = vector.load %arg2[%316, %c0_64, %c0_65] : memref<8x8x384xf32, #tpu.memory_space<vmem>>, vector<1x8x384xf32>
    %318 = vector.shape_cast %317 : vector<1x8x384xf32> to vector<8x384xf32>
    %cst_66 = arith.constant dense<0.000000e+00> : vector<8x384xf32>
    %319 = tpu.matmul %307, %5, %cst_66 {dimension_numbers = #tpu.dot_dimension_numbers<[1], [0], [0], [1], [0, 0, 1, 1], [], []>} : vector<8x128xf32>, vector<128x384xf32>, vector<8x384xf32> -> vector<8x384xf32>
    %320 = vector.extract_strided_slice %318 {offsets = [0, 0], sizes = [8, 128], strides = [1, 1]} : vector<8x384xf32> to vector<8x128xf32>
    %321 = vector.extract_strided_slice %319 {offsets = [0, 0], sizes = [8, 128], strides = [1, 1]} : vector<8x384xf32> to vector<8x128xf32>
    %322 = arith.addf %320, %321 : vector<8x128xf32>
    %323 = arith.negf %322 : vector<8x128xf32>
    %324 = math.exp %323 : vector<8x128xf32>
    %cst_67 = arith.constant 1.000000e+00 : f32
    %325 = vector.broadcast %cst_67 : f32 to vector<8x128xf32>
    %326 = arith.addf %325, %324 : vector<8x128xf32>
    %327 = arith.divf %325, %326 : vector<8x128xf32>
    %328 = vector.extract_strided_slice %318 {offsets = [0, 128], sizes = [8, 128], strides = [1, 1]} : vector<8x384xf32> to vector<8x128xf32>
    %329 = vector.extract_strided_slice %319 {offsets = [0, 128], sizes = [8, 128], strides = [1, 1]} : vector<8x384xf32> to vector<8x128xf32>
    %330 = arith.addf %328, %329 : vector<8x128xf32>
    %331 = arith.negf %330 : vector<8x128xf32>
    %332 = math.exp %331 : vector<8x128xf32>
    %cst_68 = arith.constant 1.000000e+00 : f32
    %333 = vector.broadcast %cst_68 : f32 to vector<8x128xf32>
    %334 = arith.addf %333, %332 : vector<8x128xf32>
    %335 = arith.divf %333, %334 : vector<8x128xf32>
    %336 = vector.extract_strided_slice %318 {offsets = [0, 256], sizes = [8, 128], strides = [1, 1]} : vector<8x384xf32> to vector<8x128xf32>
    %337 = vector.extract_strided_slice %319 {offsets = [0, 256], sizes = [8, 128], strides = [1, 1]} : vector<8x384xf32> to vector<8x128xf32>
    %338 = vector.broadcast %6 : vector<1x128xf32> to vector<8x128xf32>
    %339 = arith.addf %337, %338 : vector<8x128xf32>
    %340 = arith.mulf %327, %339 : vector<8x128xf32>
    %341 = arith.addf %336, %340 : vector<8x128xf32>
    %342 = math.tanh %341 : vector<8x128xf32>
    %343 = arith.subf %307, %342 : vector<8x128xf32>
    %344 = arith.mulf %335, %343 : vector<8x128xf32>
    %345 = arith.addf %342, %344 : vector<8x128xf32>
    %346 = arith.addi %0, %c7_i32 : i32
    %347 = vector.broadcast %346 : i32 to vector<8x1xi32>
    %348 = arith.cmpi sgt, %1, %347 : vector<8x1xi32>
    %349 = vector.shape_cast %348 : vector<8x1xi1> to vector<8x1xi1>
    %350 = vector.broadcast %349 : vector<8x1xi1> to vector<8x128xi1>
    %351 = arith.select %350, %345, %307 : vector<8x128xi1>, vector<8x128xf32>
    %cst_69 = arith.constant 0.000000e+00 : f32
    %352 = vector.shape_cast %348 : vector<8x1xi1> to vector<8x1xi1>
    %353 = vector.broadcast %352 : vector<8x1xi1> to vector<8x128xi1>
    %354 = vector.broadcast %cst_69 : f32 to vector<8x128xf32>
    %355 = arith.select %353, %345, %354 : vector<8x128xi1>, vector<8x128xf32>
    %356 = arith.index_cast %c7_i32 : i32 to index
    %c0_70 = arith.constant 0 : index
    %c0_71 = arith.constant 0 : index
    %357 = vector.load %arg6[%356, %c0_70, %c0_71] : memref<8x8x128xf32, #tpu.memory_space<vmem>>, vector<1x8x128xf32>
    %358 = vector.shape_cast %357 : vector<1x8x128xf32> to vector<8x128xf32>
    %359 = vector.shape_cast %355 : vector<8x128xf32> to vector<1x8x128xf32>
    tpu.vector_store %arg6[%356, %c0_70, %c0_71], %359 {strides = array<i32>} : memref<8x8x128xf32, #tpu.memory_space<vmem>>, vector<1x8x128xf32>,
    %c8_i32_72 = arith.constant 8 : i32
    %c0_73 = arith.constant 0 : index
    %c0_74 = arith.constant 0 : index
    %360 = vector.load %arg8[%c0_73, %c0_74] : memref<8x128xf32, #tpu.memory_space<vmem>>, vector<8x128xf32>
    tpu.vector_store %arg8[%c0_73, %c0_74], %351 {strides = array<i32>} : memref<8x128xf32, #tpu.memory_space<vmem>>, vector<8x128xf32>,
    %c0_i32_75 = arith.constant 0 : i32
    %361 = arith.cmpi eq, %arg1, %c0_i32_75 : i32
    %362 = arith.extui %361 : i1 to i32
    %c0_i32_76 = arith.constant 0 : i32
    %363 = arith.cmpi ne, %362, %c0_i32_76 : i32
    scf.if %363 {
      %c0_77 = arith.constant 0 : index
      %c0_78 = arith.constant 0 : index
      %364 = vector.load %arg7[%c0_77, %c0_78] : memref<8x128xf32, #tpu.memory_space<vmem>>, vector<8x128xf32>
      tpu.vector_store %arg7[%c0_77, %c0_78], %351 {strides = array<i32>} : memref<8x128xf32, #tpu.memory_space<vmem>>, vector<8x128xf32>,
    } else {
    }
    return
  }
  func.func @transform_0(%arg0: i32, %arg1: i32) -> (i32, i32, i32) {
    %c0_i32 = arith.constant 0 : i32
    %c0_i32_0 = arith.constant 0 : i32
    return %arg1, %arg0, %c0_i32 : i32, i32, i32
  }
  func.func @transform_1(%arg0: i32, %arg1: i32) -> (i32, i32) {
    %c0_i32 = arith.constant 0 : i32
    %c0_i32_0 = arith.constant 0 : i32
    return %arg0, %c0_i32 : i32, i32
  }
  func.func @transform_2(%arg0: i32, %arg1: i32) -> (i32, i32) {
    %c0_i32 = arith.constant 0 : i32
    %c0_i32_0 = arith.constant 0 : i32
    %c0_i32_1 = arith.constant 0 : i32
    return %c0_i32, %c0_i32_0 : i32, i32
  }
  func.func @transform_3(%arg0: i32, %arg1: i32) -> (i32, i32) {
    %c0_i32 = arith.constant 0 : i32
    %c0_i32_0 = arith.constant 0 : i32
    %c0_i32_1 = arith.constant 0 : i32
    return %c0_i32, %c0_i32_0 : i32, i32
  }
  func.func @transform_4(%arg0: i32, %arg1: i32) -> (i32, i32, i32) {
    %c0_i32 = arith.constant 0 : i32
    %c0_i32_0 = arith.constant 0 : i32
    return %arg1, %arg0, %c0_i32 : i32, i32, i32
  }
  func.func @transform_5(%arg0: i32, %arg1: i32) -> (i32, i32) {
    %c0_i32 = arith.constant 0 : i32
    %c0_i32_0 = arith.constant 0 : i32
    return %arg0, %c0_i32 : i32, i32
  }
}

module attributes {stable_mosaic.version = 11 : i64} {
  func.func @_gru_recurrent_kernel(%arg0: i32, %arg1: i32, %arg2: memref<8x8x384xf32, #tpu.memory_space<vmem>>, %arg3: memref<8x1xi32, #tpu.memory_space<vmem>>, %arg4: memref<128x384xf32, #tpu.memory_space<vmem>>, %arg5: memref<1x128xf32, #tpu.memory_space<vmem>>, %arg6: memref<8x8x128xf32, #tpu.memory_space<vmem>>, %arg7: memref<8x128xf32, #tpu.memory_space<vmem>>, %arg8: memref<8x128xf32, #tpu.memory_space<vmem>>) attributes {dimension_semantics = [#tpu.dimension_semantics<parallel>, #tpu.dimension_semantics<arbitrary>], iteration_bounds = array<i64: 1, 1>, scalar_prefetch = 0 : i64, scratch_operands = 1 : i64, tpu.core_type = #tpu.core_type<tc>, window_params = [{transform_indices = @transform_0, window_bounds = array<i64: 8, 8, 384>}, {transform_indices = @transform_1, window_bounds = array<i64: 8, 1>}, {pipeline_mode = #tpu.pipeline_mode<synchronous>, transform_indices = @transform_2, window_bounds = array<i64: 128, 384>}, {pipeline_mode = #tpu.pipeline_mode<synchronous>, transform_indices = @transform_3, window_bounds = array<i64: 1, 128>}, {transform_indices = @transform_4, window_bounds = array<i64: 8, 8, 128>}, {transform_indices = @transform_5, window_bounds = array<i64: 8, 128>}]} {
    %c8_i32 = arith.constant 8 : i32
    %0 = arith.muli %arg1, %c8_i32 : i32
    %c0 = arith.constant 0 : index
    %c0_0 = arith.constant 0 : index
    %1 = vector.load %arg3[%c0, %c0_0] : memref<8x1xi32, #tpu.memory_space<vmem>>, vector<8x1xi32>
    %c0_i32 = arith.constant 0 : i32
    %2 = arith.cmpi eq, %arg1, %c0_i32 : i32
    %3 = arith.extui %2 : i1 to i32
    %c0_i32_1 = arith.constant 0 : i32
    %4 = arith.cmpi ne, %3, %c0_i32_1 : i32
    scf.if %4 {
      %cst_77 = arith.constant 0.000000e+00 : f32
      %364 = vector.broadcast %cst_77 : f32 to vector<8x128xf32>
      %c0_78 = arith.constant 0 : index
      %c0_79 = arith.constant 0 : index
      %365 = vector.load %arg8[%c0_78, %c0_79] : memref<8x128xf32, #tpu.memory_space<vmem>>, vector<8x128xf32>
      tpu.vector_store %arg8[%c0_78, %c0_79], %364 {strides = array<i32>} : memref<8x128xf32, #tpu.memory_space<vmem>>, vector<8x128xf32>,
    } else {
    }
    %c0_2 = arith.constant 0 : index
    %c0_3 = arith.constant 0 : index
    %5 = vector.load %arg4[%c0_2, %c0_3] : memref<128x384xf32, #tpu.memory_space<vmem>>, vector<128x384xf32>
    %c0_4 = arith.constant 0 : index
    %c0_5 = arith.constant 0 : index
    %6 = vector.load %arg5[%c0_4, %c0_5] : memref<1x128xf32, #tpu.memory_space<vmem>>, vector<1x128xf32>
    %c0_6 = arith.constant 0 : index
    %c0_7 = arith.constant 0 : index
    %7 = vector.load %arg8[%c0_6, %c0_7] : memref<8x128xf32, #tpu.memory_space<vmem>>, vector<8x128xf32>
    %c0_i32_8 = arith.constant 0 : i32
    %8 = arith.index_cast %c0_i32_8 : i32 to index
    %c0_9 = arith.constant 0 : index
    %c0_10 = arith.constant 0 : index
    %9 = vector.load %arg2[%8, %c0_9, %c0_10] : memref<8x8x384xf32, #tpu.memory_space<vmem>>, vector<1x8x384xf32>
    %10 = vector.shape_cast %9 : vector<1x8x384xf32> to vector<8x384xf32>
    %cst = arith.constant dense<0.000000e+00> : vector<8x384xf32>
    %11 = tpu.matmul %7, %5, %cst {dimension_numbers = #tpu.dot_dimension_numbers<[1], [0], [0], [1], [0, 0, 1, 1], [], []>} : vector<8x128xf32>, vector<128x384xf32>, vector<8x384xf32> -> vector<8x384xf32>
    %12 = vector.extract_strided_slice %10 {offsets = [0, 0], sizes = [8, 128], strides = [1, 1]} : vector<8x384xf32> to vector<8x128xf32>
    %13 = vector.extract_strided_slice %11 {offsets = [0, 0], sizes = [8, 128], strides = [1, 1]} : vector<8x384xf32> to vector<8x128xf32>
    %14 = arith.addf %12, %13 : vector<8x128xf32>
    %15 = arith.negf %14 : vector<8x128xf32>
    %16 = math.exp %15 : vector<8x128xf32>
    %cst_11 = arith.constant 1.000000e+00 : f32
    %17 = vector.broadcast %cst_11 : f32 to vector<8x128xf32>
    %18 = arith.addf %17, %16 : vector<8x128xf32>
    %19 = arith.divf %17, %18 : vector<8x128xf32>
    %20 = vector.extract_strided_slice %10 {offsets = [0, 128], sizes = [8, 128], strides = [1, 1]} : vector<8x384xf32> to vector<8x128xf32>
    %21 = vector.extract_strided_slice %11 {offsets = [0, 128], sizes = [8, 128], strides = [1, 1]} : vector<8x384xf32> to vector<8x128xf32>
    %22 = arith.addf %20, %21 : vector<8x128xf32>
    %23 = arith.negf %22 : vector<8x128xf32>
    %24 = math.exp %23 : vector<8x128xf32>
    %cst_12 = arith.constant 1.000000e+00 : f32
    %25 = vector.broadcast %cst_12 : f32 to vector<8x128xf32>
    %26 = arith.addf %25, %24 : vector<8x128xf32>
    %27 = arith.divf %25, %26 : vector<8x128xf32>
    %28 = vector.extract_strided_slice %10 {offsets = [0, 256], sizes = [8, 128], strides = [1, 1]} : vector<8x384xf32> to vector<8x128xf32>
    %29 = vector.extract_strided_slice %11 {offsets = [0, 256], sizes = [8, 128], strides = [1, 1]} : vector<8x384xf32> to vector<8x128xf32>
    %30 = vector.broadcast %6 : vector<1x128xf32> to vector<8x128xf32>
    %31 = arith.addf %29, %30 : vector<8x128xf32>
    %32 = arith.mulf %19, %31 : vector<8x128xf32>
    %33 = arith.addf %28, %32 : vector<8x128xf32>
    %34 = math.tanh %33 : vector<8x128xf32>
    %35 = arith.subf %7, %34 : vector<8x128xf32>
    %36 = arith.mulf %27, %35 : vector<8x128xf32>
    %37 = arith.addf %34, %36 : vector<8x128xf32>
    %38 = arith.addi %0, %c0_i32_8 : i32
    %39 = vector.broadcast %38 : i32 to vector<8x1xi32>
    %40 = arith.cmpi sgt, %1, %39 : vector<8x1xi32>
    %41 = vector.shape_cast %40 : vector<8x1xi1> to vector<8x1xi1>
    %42 = vector.broadcast %41 : vector<8x1xi1> to vector<8x128xi1>
    %43 = arith.select %42, %37, %7 : vector<8x128xi1>, vector<8x128xf32>
    %cst_13 = arith.constant 0.000000e+00 : f32
    %44 = vector.shape_cast %40 : vector<8x1xi1> to vector<8x1xi1>
    %45 = vector.broadcast %44 : vector<8x1xi1> to vector<8x128xi1>
    %46 = vector.broadcast %cst_13 : f32 to vector<8x128xf32>
    %47 = arith.select %45, %37, %46 : vector<8x128xi1>, vector<8x128xf32>
    %48 = arith.index_cast %c0_i32_8 : i32 to index
    %c0_14 = arith.constant 0 : index
    %c0_15 = arith.constant 0 : index
    %49 = vector.load %arg6[%48, %c0_14, %c0_15] : memref<8x8x128xf32, #tpu.memory_space<vmem>>, vector<1x8x128xf32>
    %50 = vector.shape_cast %49 : vector<1x8x128xf32> to vector<8x128xf32>
    %51 = vector.shape_cast %47 : vector<8x128xf32> to vector<1x8x128xf32>
    tpu.vector_store %arg6[%48, %c0_14, %c0_15], %51 {strides = array<i32>} : memref<8x8x128xf32, #tpu.memory_space<vmem>>, vector<1x8x128xf32>,
    %c1_i32 = arith.constant 1 : i32
    %52 = arith.index_cast %c1_i32 : i32 to index
    %c0_16 = arith.constant 0 : index
    %c0_17 = arith.constant 0 : index
    %53 = vector.load %arg2[%52, %c0_16, %c0_17] : memref<8x8x384xf32, #tpu.memory_space<vmem>>, vector<1x8x384xf32>
    %54 = vector.shape_cast %53 : vector<1x8x384xf32> to vector<8x384xf32>
    %cst_18 = arith.constant dense<0.000000e+00> : vector<8x384xf32>
    %55 = tpu.matmul %43, %5, %cst_18 {dimension_numbers = #tpu.dot_dimension_numbers<[1], [0], [0], [1], [0, 0, 1, 1], [], []>} : vector<8x128xf32>, vector<128x384xf32>, vector<8x384xf32> -> vector<8x384xf32>
    %56 = vector.extract_strided_slice %54 {offsets = [0, 0], sizes = [8, 128], strides = [1, 1]} : vector<8x384xf32> to vector<8x128xf32>
    %57 = vector.extract_strided_slice %55 {offsets = [0, 0], sizes = [8, 128], strides = [1, 1]} : vector<8x384xf32> to vector<8x128xf32>
    %58 = arith.addf %56, %57 : vector<8x128xf32>
    %59 = arith.negf %58 : vector<8x128xf32>
    %60 = math.exp %59 : vector<8x128xf32>
    %cst_19 = arith.constant 1.000000e+00 : f32
    %61 = vector.broadcast %cst_19 : f32 to vector<8x128xf32>
    %62 = arith.addf %61, %60 : vector<8x128xf32>
    %63 = arith.divf %61, %62 : vector<8x128xf32>
    %64 = vector.extract_strided_slice %54 {offsets = [0, 128], sizes = [8, 128], strides = [1, 1]} : vector<8x384xf32> to vector<8x128xf32>
    %65 = vector.extract_strided_slice %55 {offsets = [0, 128], sizes = [8, 128], strides = [1, 1]} : vector<8x384xf32> to vector<8x128xf32>
    %66 = arith.addf %64, %65 : vector<8x128xf32>
    %67 = arith.negf %66 : vector<8x128xf32>
    %68 = math.exp %67 : vector<8x128xf32>
    %cst_20 = arith.constant 1.000000e+00 : f32
    %69 = vector.broadcast %cst_20 : f32 to vector<8x128xf32>
    %70 = arith.addf %69, %68 : vector<8x128xf32>
    %71 = arith.divf %69, %70 : vector<8x128xf32>
    %72 = vector.extract_strided_slice %54 {offsets = [0, 256], sizes = [8, 128], strides = [1, 1]} : vector<8x384xf32> to vector<8x128xf32>
    %73 = vector.extract_strided_slice %55 {offsets = [0, 256], sizes = [8, 128], strides = [1, 1]} : vector<8x384xf32> to vector<8x128xf32>
    %74 = vector.broadcast %6 : vector<1x128xf32> to vector<8x128xf32>
    %75 = arith.addf %73, %74 : vector<8x128xf32>
    %76 = arith.mulf %63, %75 : vector<8x128xf32>
    %77 = arith.addf %72, %76 : vector<8x128xf32>
    %78 = math.tanh %77 : vector<8x128xf32>
    %79 = arith.subf %43, %78 : vector<8x128xf32>
    %80 = arith.mulf %71, %79 : vector<8x128xf32>
    %81 = arith.addf %78, %80 : vector<8x128xf32>
    %82 = arith.addi %0, %c1_i32 : i32
    %83 = vector.broadcast %82 : i32 to vector<8x1xi32>
    %84 = arith.cmpi sgt, %1, %83 : vector<8x1xi32>
    %85 = vector.shape_cast %84 : vector<8x1xi1> to vector<8x1xi1>
    %86 = vector.broadcast %85 : vector<8x1xi1> to vector<8x128xi1>
    %87 = arith.select %86, %81, %43 : vector<8x128xi1>, vector<8x128xf32>
    %cst_21 = arith.constant 0.000000e+00 : f32
    %88 = vector.shape_cast %84 : vector<8x1xi1> to vector<8x1xi1>
    %89 = vector.broadcast %88 : vector<8x1xi1> to vector<8x128xi1>
    %90 = vector.broadcast %cst_21 : f32 to vector<8x128xf32>
    %91 = arith.select %89, %81, %90 : vector<8x128xi1>, vector<8x128xf32>
    %92 = arith.index_cast %c1_i32 : i32 to index
    %c0_22 = arith.constant 0 : index
    %c0_23 = arith.constant 0 : index
    %93 = vector.load %arg6[%92, %c0_22, %c0_23] : memref<8x8x128xf32, #tpu.memory_space<vmem>>, vector<1x8x128xf32>
    %94 = vector.shape_cast %93 : vector<1x8x128xf32> to vector<8x128xf32>
    %95 = vector.shape_cast %91 : vector<8x128xf32> to vector<1x8x128xf32>
    tpu.vector_store %arg6[%92, %c0_22, %c0_23], %95 {strides = array<i32>} : memref<8x8x128xf32, #tpu.memory_space<vmem>>, vector<1x8x128xf32>,
    %c2_i32 = arith.constant 2 : i32
    %96 = arith.index_cast %c2_i32 : i32 to index
    %c0_24 = arith.constant 0 : index
    %c0_25 = arith.constant 0 : index
    %97 = vector.load %arg2[%96, %c0_24, %c0_25] : memref<8x8x384xf32, #tpu.memory_space<vmem>>, vector<1x8x384xf32>
    %98 = vector.shape_cast %97 : vector<1x8x384xf32> to vector<8x384xf32>
    %cst_26 = arith.constant dense<0.000000e+00> : vector<8x384xf32>
    %99 = tpu.matmul %87, %5, %cst_26 {dimension_numbers = #tpu.dot_dimension_numbers<[1], [0], [0], [1], [0, 0, 1, 1], [], []>} : vector<8x128xf32>, vector<128x384xf32>, vector<8x384xf32> -> vector<8x384xf32>
    %100 = vector.extract_strided_slice %98 {offsets = [0, 0], sizes = [8, 128], strides = [1, 1]} : vector<8x384xf32> to vector<8x128xf32>
    %101 = vector.extract_strided_slice %99 {offsets = [0, 0], sizes = [8, 128], strides = [1, 1]} : vector<8x384xf32> to vector<8x128xf32>
    %102 = arith.addf %100, %101 : vector<8x128xf32>
    %103 = arith.negf %102 : vector<8x128xf32>
    %104 = math.exp %103 : vector<8x128xf32>
    %cst_27 = arith.constant 1.000000e+00 : f32
    %105 = vector.broadcast %cst_27 : f32 to vector<8x128xf32>
    %106 = arith.addf %105, %104 : vector<8x128xf32>
    %107 = arith.divf %105, %106 : vector<8x128xf32>
    %108 = vector.extract_strided_slice %98 {offsets = [0, 128], sizes = [8, 128], strides = [1, 1]} : vector<8x384xf32> to vector<8x128xf32>
    %109 = vector.extract_strided_slice %99 {offsets = [0, 128], sizes = [8, 128], strides = [1, 1]} : vector<8x384xf32> to vector<8x128xf32>
    %110 = arith.addf %108, %109 : vector<8x128xf32>
    %111 = arith.negf %110 : vector<8x128xf32>
    %112 = math.exp %111 : vector<8x128xf32>
    %cst_28 = arith.constant 1.000000e+00 : f32
    %113 = vector.broadcast %cst_28 : f32 to vector<8x128xf32>
    %114 = arith.addf %113, %112 : vector<8x128xf32>
    %115 = arith.divf %113, %114 : vector<8x128xf32>
    %116 = vector.extract_strided_slice %98 {offsets = [0, 256], sizes = [8, 128], strides = [1, 1]} : vector<8x384xf32> to vector<8x128xf32>
    %117 = vector.extract_strided_slice %99 {offsets = [0, 256], sizes = [8, 128], strides = [1, 1]} : vector<8x384xf32> to vector<8x128xf32>
    %118 = vector.broadcast %6 : vector<1x128xf32> to vector<8x128xf32>
    %119 = arith.addf %117, %118 : vector<8x128xf32>
    %120 = arith.mulf %107, %119 : vector<8x128xf32>
    %121 = arith.addf %116, %120 : vector<8x128xf32>
    %122 = math.tanh %121 : vector<8x128xf32>
    %123 = arith.subf %87, %122 : vector<8x128xf32>
    %124 = arith.mulf %115, %123 : vector<8x128xf32>
    %125 = arith.addf %122, %124 : vector<8x128xf32>
    %126 = arith.addi %0, %c2_i32 : i32
    %127 = vector.broadcast %126 : i32 to vector<8x1xi32>
    %128 = arith.cmpi sgt, %1, %127 : vector<8x1xi32>
    %129 = vector.shape_cast %128 : vector<8x1xi1> to vector<8x1xi1>
    %130 = vector.broadcast %129 : vector<8x1xi1> to vector<8x128xi1>
    %131 = arith.select %130, %125, %87 : vector<8x128xi1>, vector<8x128xf32>
    %cst_29 = arith.constant 0.000000e+00 : f32
    %132 = vector.shape_cast %128 : vector<8x1xi1> to vector<8x1xi1>
    %133 = vector.broadcast %132 : vector<8x1xi1> to vector<8x128xi1>
    %134 = vector.broadcast %cst_29 : f32 to vector<8x128xf32>
    %135 = arith.select %133, %125, %134 : vector<8x128xi1>, vector<8x128xf32>
    %136 = arith.index_cast %c2_i32 : i32 to index
    %c0_30 = arith.constant 0 : index
    %c0_31 = arith.constant 0 : index
    %137 = vector.load %arg6[%136, %c0_30, %c0_31] : memref<8x8x128xf32, #tpu.memory_space<vmem>>, vector<1x8x128xf32>
    %138 = vector.shape_cast %137 : vector<1x8x128xf32> to vector<8x128xf32>
    %139 = vector.shape_cast %135 : vector<8x128xf32> to vector<1x8x128xf32>
    tpu.vector_store %arg6[%136, %c0_30, %c0_31], %139 {strides = array<i32>} : memref<8x8x128xf32, #tpu.memory_space<vmem>>, vector<1x8x128xf32>,
    %c3_i32 = arith.constant 3 : i32
    %140 = arith.index_cast %c3_i32 : i32 to index
    %c0_32 = arith.constant 0 : index
    %c0_33 = arith.constant 0 : index
    %141 = vector.load %arg2[%140, %c0_32, %c0_33] : memref<8x8x384xf32, #tpu.memory_space<vmem>>, vector<1x8x384xf32>
    %142 = vector.shape_cast %141 : vector<1x8x384xf32> to vector<8x384xf32>
    %cst_34 = arith.constant dense<0.000000e+00> : vector<8x384xf32>
    %143 = tpu.matmul %131, %5, %cst_34 {dimension_numbers = #tpu.dot_dimension_numbers<[1], [0], [0], [1], [0, 0, 1, 1], [], []>} : vector<8x128xf32>, vector<128x384xf32>, vector<8x384xf32> -> vector<8x384xf32>
    %144 = vector.extract_strided_slice %142 {offsets = [0, 0], sizes = [8, 128], strides = [1, 1]} : vector<8x384xf32> to vector<8x128xf32>
    %145 = vector.extract_strided_slice %143 {offsets = [0, 0], sizes = [8, 128], strides = [1, 1]} : vector<8x384xf32> to vector<8x128xf32>
    %146 = arith.addf %144, %145 : vector<8x128xf32>
    %147 = arith.negf %146 : vector<8x128xf32>
    %148 = math.exp %147 : vector<8x128xf32>
    %cst_35 = arith.constant 1.000000e+00 : f32
    %149 = vector.broadcast %cst_35 : f32 to vector<8x128xf32>
    %150 = arith.addf %149, %148 : vector<8x128xf32>
    %151 = arith.divf %149, %150 : vector<8x128xf32>
    %152 = vector.extract_strided_slice %142 {offsets = [0, 128], sizes = [8, 128], strides = [1, 1]} : vector<8x384xf32> to vector<8x128xf32>
    %153 = vector.extract_strided_slice %143 {offsets = [0, 128], sizes = [8, 128], strides = [1, 1]} : vector<8x384xf32> to vector<8x128xf32>
    %154 = arith.addf %152, %153 : vector<8x128xf32>
    %155 = arith.negf %154 : vector<8x128xf32>
    %156 = math.exp %155 : vector<8x128xf32>
    %cst_36 = arith.constant 1.000000e+00 : f32
    %157 = vector.broadcast %cst_36 : f32 to vector<8x128xf32>
    %158 = arith.addf %157, %156 : vector<8x128xf32>
    %159 = arith.divf %157, %158 : vector<8x128xf32>
    %160 = vector.extract_strided_slice %142 {offsets = [0, 256], sizes = [8, 128], strides = [1, 1]} : vector<8x384xf32> to vector<8x128xf32>
    %161 = vector.extract_strided_slice %143 {offsets = [0, 256], sizes = [8, 128], strides = [1, 1]} : vector<8x384xf32> to vector<8x128xf32>
    %162 = vector.broadcast %6 : vector<1x128xf32> to vector<8x128xf32>
    %163 = arith.addf %161, %162 : vector<8x128xf32>
    %164 = arith.mulf %151, %163 : vector<8x128xf32>
    %165 = arith.addf %160, %164 : vector<8x128xf32>
    %166 = math.tanh %165 : vector<8x128xf32>
    %167 = arith.subf %131, %166 : vector<8x128xf32>
    %168 = arith.mulf %159, %167 : vector<8x128xf32>
    %169 = arith.addf %166, %168 : vector<8x128xf32>
    %170 = arith.addi %0, %c3_i32 : i32
    %171 = vector.broadcast %170 : i32 to vector<8x1xi32>
    %172 = arith.cmpi sgt, %1, %171 : vector<8x1xi32>
    %173 = vector.shape_cast %172 : vector<8x1xi1> to vector<8x1xi1>
    %174 = vector.broadcast %173 : vector<8x1xi1> to vector<8x128xi1>
    %175 = arith.select %174, %169, %131 : vector<8x128xi1>, vector<8x128xf32>
    %cst_37 = arith.constant 0.000000e+00 : f32
    %176 = vector.shape_cast %172 : vector<8x1xi1> to vector<8x1xi1>
    %177 = vector.broadcast %176 : vector<8x1xi1> to vector<8x128xi1>
    %178 = vector.broadcast %cst_37 : f32 to vector<8x128xf32>
    %179 = arith.select %177, %169, %178 : vector<8x128xi1>, vector<8x128xf32>
    %180 = arith.index_cast %c3_i32 : i32 to index
    %c0_38 = arith.constant 0 : index
    %c0_39 = arith.constant 0 : index
    %181 = vector.load %arg6[%180, %c0_38, %c0_39] : memref<8x8x128xf32, #tpu.memory_space<vmem>>, vector<1x8x128xf32>
    %182 = vector.shape_cast %181 : vector<1x8x128xf32> to vector<8x128xf32>
    %183 = vector.shape_cast %179 : vector<8x128xf32> to vector<1x8x128xf32>
    tpu.vector_store %arg6[%180, %c0_38, %c0_39], %183 {strides = array<i32>} : memref<8x8x128xf32, #tpu.memory_space<vmem>>, vector<1x8x128xf32>,
    %c4_i32 = arith.constant 4 : i32
    %184 = arith.index_cast %c4_i32 : i32 to index
    %c0_40 = arith.constant 0 : index
    %c0_41 = arith.constant 0 : index
    %185 = vector.load %arg2[%184, %c0_40, %c0_41] : memref<8x8x384xf32, #tpu.memory_space<vmem>>, vector<1x8x384xf32>
    %186 = vector.shape_cast %185 : vector<1x8x384xf32> to vector<8x384xf32>
    %cst_42 = arith.constant dense<0.000000e+00> : vector<8x384xf32>
    %187 = tpu.matmul %175, %5, %cst_42 {dimension_numbers = #tpu.dot_dimension_numbers<[1], [0], [0], [1], [0, 0, 1, 1], [], []>} : vector<8x128xf32>, vector<128x384xf32>, vector<8x384xf32> -> vector<8x384xf32>
    %188 = vector.extract_strided_slice %186 {offsets = [0, 0], sizes = [8, 128], strides = [1, 1]} : vector<8x384xf32> to vector<8x128xf32>
    %189 = vector.extract_strided_slice %187 {offsets = [0, 0], sizes = [8, 128], strides = [1, 1]} : vector<8x384xf32> to vector<8x128xf32>
    %190 = arith.addf %188, %189 : vector<8x128xf32>
    %191 = arith.negf %190 : vector<8x128xf32>
    %192 = math.exp %191 : vector<8x128xf32>
    %cst_43 = arith.constant 1.000000e+00 : f32
    %193 = vector.broadcast %cst_43 : f32 to vector<8x128xf32>
    %194 = arith.addf %193, %192 : vector<8x128xf32>
    %195 = arith.divf %193, %194 : vector<8x128xf32>
    %196 = vector.extract_strided_slice %186 {offsets = [0, 128], sizes = [8, 128], strides = [1, 1]} : vector<8x384xf32> to vector<8x128xf32>
    %197 = vector.extract_strided_slice %187 {offsets = [0, 128], sizes = [8, 128], strides = [1, 1]} : vector<8x384xf32> to vector<8x128xf32>
    %198 = arith.addf %196, %197 : vector<8x128xf32>
    %199 = arith.negf %198 : vector<8x128xf32>
    %200 = math.exp %199 : vector<8x128xf32>
    %cst_44 = arith.constant 1.000000e+00 : f32
    %201 = vector.broadcast %cst_44 : f32 to vector<8x128xf32>
    %202 = arith.addf %201, %200 : vector<8x128xf32>
    %203 = arith.divf %201, %202 : vector<8x128xf32>
    %204 = vector.extract_strided_slice %186 {offsets = [0, 256], sizes = [8, 128], strides = [1, 1]} : vector<8x384xf32> to vector<8x128xf32>
    %205 = vector.extract_strided_slice %187 {offsets = [0, 256], sizes = [8, 128], strides = [1, 1]} : vector<8x384xf32> to vector<8x128xf32>
    %206 = vector.broadcast %6 : vector<1x128xf32> to vector<8x128xf32>
    %207 = arith.addf %205, %206 : vector<8x128xf32>
    %208 = arith.mulf %195, %207 : vector<8x128xf32>
    %209 = arith.addf %204, %208 : vector<8x128xf32>
    %210 = math.tanh %209 : vector<8x128xf32>
    %211 = arith.subf %175, %210 : vector<8x128xf32>
    %212 = arith.mulf %203, %211 : vector<8x128xf32>
    %213 = arith.addf %210, %212 : vector<8x128xf32>
    %214 = arith.addi %0, %c4_i32 : i32
    %215 = vector.broadcast %214 : i32 to vector<8x1xi32>
    %216 = arith.cmpi sgt, %1, %215 : vector<8x1xi32>
    %217 = vector.shape_cast %216 : vector<8x1xi1> to vector<8x1xi1>
    %218 = vector.broadcast %217 : vector<8x1xi1> to vector<8x128xi1>
    %219 = arith.select %218, %213, %175 : vector<8x128xi1>, vector<8x128xf32>
    %cst_45 = arith.constant 0.000000e+00 : f32
    %220 = vector.shape_cast %216 : vector<8x1xi1> to vector<8x1xi1>
    %221 = vector.broadcast %220 : vector<8x1xi1> to vector<8x128xi1>
    %222 = vector.broadcast %cst_45 : f32 to vector<8x128xf32>
    %223 = arith.select %221, %213, %222 : vector<8x128xi1>, vector<8x128xf32>
    %224 = arith.index_cast %c4_i32 : i32 to index
    %c0_46 = arith.constant 0 : index
    %c0_47 = arith.constant 0 : index
    %225 = vector.load %arg6[%224, %c0_46, %c0_47] : memref<8x8x128xf32, #tpu.memory_space<vmem>>, vector<1x8x128xf32>
    %226 = vector.shape_cast %225 : vector<1x8x128xf32> to vector<8x128xf32>
    %227 = vector.shape_cast %223 : vector<8x128xf32> to vector<1x8x128xf32>
    tpu.vector_store %arg6[%224, %c0_46, %c0_47], %227 {strides = array<i32>} : memref<8x8x128xf32, #tpu.memory_space<vmem>>, vector<1x8x128xf32>,
    %c5_i32 = arith.constant 5 : i32
    %228 = arith.index_cast %c5_i32 : i32 to index
    %c0_48 = arith.constant 0 : index
    %c0_49 = arith.constant 0 : index
    %229 = vector.load %arg2[%228, %c0_48, %c0_49] : memref<8x8x384xf32, #tpu.memory_space<vmem>>, vector<1x8x384xf32>
    %230 = vector.shape_cast %229 : vector<1x8x384xf32> to vector<8x384xf32>
    %cst_50 = arith.constant dense<0.000000e+00> : vector<8x384xf32>
    %231 = tpu.matmul %219, %5, %cst_50 {dimension_numbers = #tpu.dot_dimension_numbers<[1], [0], [0], [1], [0, 0, 1, 1], [], []>} : vector<8x128xf32>, vector<128x384xf32>, vector<8x384xf32> -> vector<8x384xf32>
    %232 = vector.extract_strided_slice %230 {offsets = [0, 0], sizes = [8, 128], strides = [1, 1]} : vector<8x384xf32> to vector<8x128xf32>
    %233 = vector.extract_strided_slice %231 {offsets = [0, 0], sizes = [8, 128], strides = [1, 1]} : vector<8x384xf32> to vector<8x128xf32>
    %234 = arith.addf %232, %233 : vector<8x128xf32>
    %235 = arith.negf %234 : vector<8x128xf32>
    %236 = math.exp %235 : vector<8x128xf32>
    %cst_51 = arith.constant 1.000000e+00 : f32
    %237 = vector.broadcast %cst_51 : f32 to vector<8x128xf32>
    %238 = arith.addf %237, %236 : vector<8x128xf32>
    %239 = arith.divf %237, %238 : vector<8x128xf32>
    %240 = vector.extract_strided_slice %230 {offsets = [0, 128], sizes = [8, 128], strides = [1, 1]} : vector<8x384xf32> to vector<8x128xf32>
    %241 = vector.extract_strided_slice %231 {offsets = [0, 128], sizes = [8, 128], strides = [1, 1]} : vector<8x384xf32> to vector<8x128xf32>
    %242 = arith.addf %240, %241 : vector<8x128xf32>
    %243 = arith.negf %242 : vector<8x128xf32>
    %244 = math.exp %243 : vector<8x128xf32>
    %cst_52 = arith.constant 1.000000e+00 : f32
    %245 = vector.broadcast %cst_52 : f32 to vector<8x128xf32>
    %246 = arith.addf %245, %244 : vector<8x128xf32>
    %247 = arith.divf %245, %246 : vector<8x128xf32>
    %248 = vector.extract_strided_slice %230 {offsets = [0, 256], sizes = [8, 128], strides = [1, 1]} : vector<8x384xf32> to vector<8x128xf32>
    %249 = vector.extract_strided_slice %231 {offsets = [0, 256], sizes = [8, 128], strides = [1, 1]} : vector<8x384xf32> to vector<8x128xf32>
    %250 = vector.broadcast %6 : vector<1x128xf32> to vector<8x128xf32>
    %251 = arith.addf %249, %250 : vector<8x128xf32>
    %252 = arith.mulf %239, %251 : vector<8x128xf32>
    %253 = arith.addf %248, %252 : vector<8x128xf32>
    %254 = math.tanh %253 : vector<8x128xf32>
    %255 = arith.subf %219, %254 : vector<8x128xf32>
    %256 = arith.mulf %247, %255 : vector<8x128xf32>
    %257 = arith.addf %254, %256 : vector<8x128xf32>
    %258 = arith.addi %0, %c5_i32 : i32
    %259 = vector.broadcast %258 : i32 to vector<8x1xi32>
    %260 = arith.cmpi sgt, %1, %259 : vector<8x1xi32>
    %261 = vector.shape_cast %260 : vector<8x1xi1> to vector<8x1xi1>
    %262 = vector.broadcast %261 : vector<8x1xi1> to vector<8x128xi1>
    %263 = arith.select %262, %257, %219 : vector<8x128xi1>, vector<8x128xf32>
    %cst_53 = arith.constant 0.000000e+00 : f32
    %264 = vector.shape_cast %260 : vector<8x1xi1> to vector<8x1xi1>
    %265 = vector.broadcast %264 : vector<8x1xi1> to vector<8x128xi1>
    %266 = vector.broadcast %cst_53 : f32 to vector<8x128xf32>
    %267 = arith.select %265, %257, %266 : vector<8x128xi1>, vector<8x128xf32>
    %268 = arith.index_cast %c5_i32 : i32 to index
    %c0_54 = arith.constant 0 : index
    %c0_55 = arith.constant 0 : index
    %269 = vector.load %arg6[%268, %c0_54, %c0_55] : memref<8x8x128xf32, #tpu.memory_space<vmem>>, vector<1x8x128xf32>
    %270 = vector.shape_cast %269 : vector<1x8x128xf32> to vector<8x128xf32>
    %271 = vector.shape_cast %267 : vector<8x128xf32> to vector<1x8x128xf32>
    tpu.vector_store %arg6[%268, %c0_54, %c0_55], %271 {strides = array<i32>} : memref<8x8x128xf32, #tpu.memory_space<vmem>>, vector<1x8x128xf32>,
    %c6_i32 = arith.constant 6 : i32
    %272 = arith.index_cast %c6_i32 : i32 to index
    %c0_56 = arith.constant 0 : index
    %c0_57 = arith.constant 0 : index
    %273 = vector.load %arg2[%272, %c0_56, %c0_57] : memref<8x8x384xf32, #tpu.memory_space<vmem>>, vector<1x8x384xf32>
    %274 = vector.shape_cast %273 : vector<1x8x384xf32> to vector<8x384xf32>
    %cst_58 = arith.constant dense<0.000000e+00> : vector<8x384xf32>
    %275 = tpu.matmul %263, %5, %cst_58 {dimension_numbers = #tpu.dot_dimension_numbers<[1], [0], [0], [1], [0, 0, 1, 1], [], []>} : vector<8x128xf32>, vector<128x384xf32>, vector<8x384xf32> -> vector<8x384xf32>
    %276 = vector.extract_strided_slice %274 {offsets = [0, 0], sizes = [8, 128], strides = [1, 1]} : vector<8x384xf32> to vector<8x128xf32>
    %277 = vector.extract_strided_slice %275 {offsets = [0, 0], sizes = [8, 128], strides = [1, 1]} : vector<8x384xf32> to vector<8x128xf32>
    %278 = arith.addf %276, %277 : vector<8x128xf32>
    %279 = arith.negf %278 : vector<8x128xf32>
    %280 = math.exp %279 : vector<8x128xf32>
    %cst_59 = arith.constant 1.000000e+00 : f32
    %281 = vector.broadcast %cst_59 : f32 to vector<8x128xf32>
    %282 = arith.addf %281, %280 : vector<8x128xf32>
    %283 = arith.divf %281, %282 : vector<8x128xf32>
    %284 = vector.extract_strided_slice %274 {offsets = [0, 128], sizes = [8, 128], strides = [1, 1]} : vector<8x384xf32> to vector<8x128xf32>
    %285 = vector.extract_strided_slice %275 {offsets = [0, 128], sizes = [8, 128], strides = [1, 1]} : vector<8x384xf32> to vector<8x128xf32>
    %286 = arith.addf %284, %285 : vector<8x128xf32>
    %287 = arith.negf %286 : vector<8x128xf32>
    %288 = math.exp %287 : vector<8x128xf32>
    %cst_60 = arith.constant 1.000000e+00 : f32
    %289 = vector.broadcast %cst_60 : f32 to vector<8x128xf32>
    %290 = arith.addf %289, %288 : vector<8x128xf32>
    %291 = arith.divf %289, %290 : vector<8x128xf32>
    %292 = vector.extract_strided_slice %274 {offsets = [0, 256], sizes = [8, 128], strides = [1, 1]} : vector<8x384xf32> to vector<8x128xf32>
    %293 = vector.extract_strided_slice %275 {offsets = [0, 256], sizes = [8, 128], strides = [1, 1]} : vector<8x384xf32> to vector<8x128xf32>
    %294 = vector.broadcast %6 : vector<1x128xf32> to vector<8x128xf32>
    %295 = arith.addf %293, %294 : vector<8x128xf32>
    %296 = arith.mulf %283, %295 : vector<8x128xf32>
    %297 = arith.addf %292, %296 : vector<8x128xf32>
    %298 = math.tanh %297 : vector<8x128xf32>
    %299 = arith.subf %263, %298 : vector<8x128xf32>
    %300 = arith.mulf %291, %299 : vector<8x128xf32>
    %301 = arith.addf %298, %300 : vector<8x128xf32>
    %302 = arith.addi %0, %c6_i32 : i32
    %303 = vector.broadcast %302 : i32 to vector<8x1xi32>
    %304 = arith.cmpi sgt, %1, %303 : vector<8x1xi32>
    %305 = vector.shape_cast %304 : vector<8x1xi1> to vector<8x1xi1>
    %306 = vector.broadcast %305 : vector<8x1xi1> to vector<8x128xi1>
    %307 = arith.select %306, %301, %263 : vector<8x128xi1>, vector<8x128xf32>
    %cst_61 = arith.constant 0.000000e+00 : f32
    %308 = vector.shape_cast %304 : vector<8x1xi1> to vector<8x1xi1>
    %309 = vector.broadcast %308 : vector<8x1xi1> to vector<8x128xi1>
    %310 = vector.broadcast %cst_61 : f32 to vector<8x128xf32>
    %311 = arith.select %309, %301, %310 : vector<8x128xi1>, vector<8x128xf32>
    %312 = arith.index_cast %c6_i32 : i32 to index
    %c0_62 = arith.constant 0 : index
    %c0_63 = arith.constant 0 : index
    %313 = vector.load %arg6[%312, %c0_62, %c0_63] : memref<8x8x128xf32, #tpu.memory_space<vmem>>, vector<1x8x128xf32>
    %314 = vector.shape_cast %313 : vector<1x8x128xf32> to vector<8x128xf32>
    %315 = vector.shape_cast %311 : vector<8x128xf32> to vector<1x8x128xf32>
    tpu.vector_store %arg6[%312, %c0_62, %c0_63], %315 {strides = array<i32>} : memref<8x8x128xf32, #tpu.memory_space<vmem>>, vector<1x8x128xf32>,
    %c7_i32 = arith.constant 7 : i32
    %316 = arith.index_cast %c7_i32 : i32 to index
    %c0_64 = arith.constant 0 : index
    %c0_65 = arith.constant 0 : index
    %317 = vector.load %arg2[%316, %c0_64, %c0_65] : memref<8x8x384xf32, #tpu.memory_space<vmem>>, vector<1x8x384xf32>
    %318 = vector.shape_cast %317 : vector<1x8x384xf32> to vector<8x384xf32>
    %cst_66 = arith.constant dense<0.000000e+00> : vector<8x384xf32>
    %319 = tpu.matmul %307, %5, %cst_66 {dimension_numbers = #tpu.dot_dimension_numbers<[1], [0], [0], [1], [0, 0, 1, 1], [], []>} : vector<8x128xf32>, vector<128x384xf32>, vector<8x384xf32> -> vector<8x384xf32>
    %320 = vector.extract_strided_slice %318 {offsets = [0, 0], sizes = [8, 128], strides = [1, 1]} : vector<8x384xf32> to vector<8x128xf32>
    %321 = vector.extract_strided_slice %319 {offsets = [0, 0], sizes = [8, 128], strides = [1, 1]} : vector<8x384xf32> to vector<8x128xf32>
    %322 = arith.addf %320, %321 : vector<8x128xf32>
    %323 = arith.negf %322 : vector<8x128xf32>
    %324 = math.exp %323 : vector<8x128xf32>
    %cst_67 = arith.constant 1.000000e+00 : f32
    %325 = vector.broadcast %cst_67 : f32 to vector<8x128xf32>
    %326 = arith.addf %325, %324 : vector<8x128xf32>
    %327 = arith.divf %325, %326 : vector<8x128xf32>
    %328 = vector.extract_strided_slice %318 {offsets = [0, 128], sizes = [8, 128], strides = [1, 1]} : vector<8x384xf32> to vector<8x128xf32>
    %329 = vector.extract_strided_slice %319 {offsets = [0, 128], sizes = [8, 128], strides = [1, 1]} : vector<8x384xf32> to vector<8x128xf32>
    %330 = arith.addf %328, %329 : vector<8x128xf32>
    %331 = arith.negf %330 : vector<8x128xf32>
    %332 = math.exp %331 : vector<8x128xf32>
    %cst_68 = arith.constant 1.000000e+00 : f32
    %333 = vector.broadcast %cst_68 : f32 to vector<8x128xf32>
    %334 = arith.addf %333, %332 : vector<8x128xf32>
    %335 = arith.divf %333, %334 : vector<8x128xf32>
    %336 = vector.extract_strided_slice %318 {offsets = [0, 256], sizes = [8, 128], strides = [1, 1]} : vector<8x384xf32> to vector<8x128xf32>
    %337 = vector.extract_strided_slice %319 {offsets = [0, 256], sizes = [8, 128], strides = [1, 1]} : vector<8x384xf32> to vector<8x128xf32>
    %338 = vector.broadcast %6 : vector<1x128xf32> to vector<8x128xf32>
    %339 = arith.addf %337, %338 : vector<8x128xf32>
    %340 = arith.mulf %327, %339 : vector<8x128xf32>
    %341 = arith.addf %336, %340 : vector<8x128xf32>
    %342 = math.tanh %341 : vector<8x128xf32>
    %343 = arith.subf %307, %342 : vector<8x128xf32>
    %344 = arith.mulf %335, %343 : vector<8x128xf32>
    %345 = arith.addf %342, %344 : vector<8x128xf32>
    %346 = arith.addi %0, %c7_i32 : i32
    %347 = vector.broadcast %346 : i32 to vector<8x1xi32>
    %348 = arith.cmpi sgt, %1, %347 : vector<8x1xi32>
    %349 = vector.shape_cast %348 : vector<8x1xi1> to vector<8x1xi1>
    %350 = vector.broadcast %349 : vector<8x1xi1> to vector<8x128xi1>
    %351 = arith.select %350, %345, %307 : vector<8x128xi1>, vector<8x128xf32>
    %cst_69 = arith.constant 0.000000e+00 : f32
    %352 = vector.shape_cast %348 : vector<8x1xi1> to vector<8x1xi1>
    %353 = vector.broadcast %352 : vector<8x1xi1> to vector<8x128xi1>
    %354 = vector.broadcast %cst_69 : f32 to vector<8x128xf32>
    %355 = arith.select %353, %345, %354 : vector<8x128xi1>, vector<8x128xf32>
    %356 = arith.index_cast %c7_i32 : i32 to index
    %c0_70 = arith.constant 0 : index
    %c0_71 = arith.constant 0 : index
    %357 = vector.load %arg6[%356, %c0_70, %c0_71] : memref<8x8x128xf32, #tpu.memory_space<vmem>>, vector<1x8x128xf32>
    %358 = vector.shape_cast %357 : vector<1x8x128xf32> to vector<8x128xf32>
    %359 = vector.shape_cast %355 : vector<8x128xf32> to vector<1x8x128xf32>
    tpu.vector_store %arg6[%356, %c0_70, %c0_71], %359 {strides = array<i32>} : memref<8x8x128xf32, #tpu.memory_space<vmem>>, vector<1x8x128xf32>,
    %c8_i32_72 = arith.constant 8 : i32
    %c0_73 = arith.constant 0 : index
    %c0_74 = arith.constant 0 : index
    %360 = vector.load %arg8[%c0_73, %c0_74] : memref<8x128xf32, #tpu.memory_space<vmem>>, vector<8x128xf32>
    tpu.vector_store %arg8[%c0_73, %c0_74], %351 {strides = array<i32>} : memref<8x128xf32, #tpu.memory_space<vmem>>, vector<8x128xf32>,
    %c0_i32_75 = arith.constant 0 : i32
    %361 = arith.cmpi eq, %arg1, %c0_i32_75 : i32
    %362 = arith.extui %361 : i1 to i32
    %c0_i32_76 = arith.constant 0 : i32
    %363 = arith.cmpi ne, %362, %c0_i32_76 : i32
    scf.if %363 {
      %c0_77 = arith.constant 0 : index
      %c0_78 = arith.constant 0 : index
      %364 = vector.load %arg7[%c0_77, %c0_78] : memref<8x128xf32, #tpu.memory_space<vmem>>, vector<8x128xf32>
      tpu.vector_store %arg7[%c0_77, %c0_78], %351 {strides = array<i32>} : memref<8x128xf32, #tpu.memory_space<vmem>>, vector<8x128xf32>,
    } else {
    }
    return
  }
  func.func @transform_0(%arg0: i32, %arg1: i32) -> (i32, i32, i32) {
    %c0_i32 = arith.constant 0 : i32
    %c0_i32_0 = arith.constant 0 : i32
    return %arg1, %arg0, %c0_i32 : i32, i32, i32
  }
  func.func @transform_1(%arg0: i32, %arg1: i32) -> (i32, i32) {
    %c0_i32 = arith.constant 0 : i32
    %c0_i32_0 = arith.constant 0 : i32
    return %arg0, %c0_i32 : i32, i32
  }
  func.func @transform_2(%arg0: i32, %arg1: i32) -> (i32, i32) {
    %c0_i32 = arith.constant 0 : i32
    %c0_i32_0 = arith.constant 0 : i32
    %c0_i32_1 = arith.constant 0 : i32
    return %c0_i32, %c0_i32_0 : i32, i32
  }
  func.func @transform_3(%arg0: i32, %arg1: i32) -> (i32, i32) {
    %c0_i32 = arith.constant 0 : i32
    %c0_i32_0 = arith.constant 0 : i32
    %c0_i32_1 = arith.constant 0 : i32
    return %c0_i32, %c0_i32_0 : i32, i32
  }
  func.func @transform_4(%arg0: i32, %arg1: i32) -> (i32, i32, i32) {
    %c0_i32 = arith.constant 0 : i32
    %c0_i32_0 = arith.constant 0 : i32
    return %arg1, %arg0, %c0_i32 : i32, i32, i32
  }
  func.func @transform_5(%arg0: i32, %arg1: i32) -> (i32, i32) {
    %c0_i32 = arith.constant 0 : i32
    %c0_i32_0 = arith.constant 0 : i32
    return %arg0, %c0_i32 : i32, i32
  }
}

</mosaic_0001>

<bundles_post_ra>
// kernel: luong_encoder_forward.2
= control target key start
LH: loop header
LB: loop body
LE: loop exit
PB: predicated region body
PF: predicated region fallthrough
CT: control target
= control target key end

     0   :  { %11 = vsyncpa [#allocation4], 0  ;;  %s1302_s21 = smov [#allocation3]   ;;  %s1303_s23 = smov 384   ;;  %s2069_s0 = inlined_call_operand.vmem [shape: f32[8,8,384], index: 0, kind: input, shape index: {}]   ;;  %s2070_s1 = inlined_call_operand.vmem [shape: s32[8,1], index: 1, kind: input, shape index: {}]   ;;  %s2071_s2 = inlined_call_operand.hbm [shape: f32[128,384], index: 2, kind: input, shape index: {}]   ;;  %s2072_s3 = inlined_call_operand.vmem [shape: f32[1,128], index: 3, kind: input, shape index: {}]   ;;  %s2073_s4 = inlined_call_operand.vmem [shape: f32[8,8,128], index: 4, kind: output, shape index: {0}]   ;;  %s2074_s5 = inlined_call_operand.vmem [shape: f32[8,128], index: 5, kind: output, shape index: {1}]  }
   0x1   :  { %s20_s20 = sshll.u32 %s2071_s2, 4  ;;  %s22_s22 = sshll.u32 %s1302_s21, 4  ;;  %s21_s20 = int_to_ptr.hbm [resolvable:$true] %s20_s20  ;;  %s23_s22 = int_to_ptr.vmem [resolvable:$true] %s22_s22 }
   0x2   :  { %s1304_s24 = smov 24  }
   0x3   :  { %28 = dma.hbm_to_vmem [thread:$0]  %s21_s20, 6144, %s23_s22, [#allocation4], %s1303_s23, %s1303_s23, %s1304_s24  }
   0x4   :  { %1300 = dma.done.wait [#allocation4], 6144  }
   0x5   :  { %1301 = vsyncadd [#allocation4], 4294961152  ;;  %v1340_v0 = vld [vmem:[#allocation3 + $0x168] sm:$0xff]  ;;  %v1342_v1 = vld [vmem:[#allocation3 + $0x170] sm:$0xff]  ;;  %v2075_v19 = vmov 0   ;;  %v1306_v48 = vmov 0.0  }
   0x6   :  { %v1344_v2 = vld [vmem:[#allocation3 + $0x150] sm:$0xff]  ;;  %95 = vmatpush.msra.mxu0 %v1340_v0  ;;  %115 = vmatpush.msra.mxu1 %v1342_v1  ;;  %v1348_v3 = vld [vmem:[#allocation3 + $0x158] sm:$0xff]  ;;  %v1352_v5 = vld [vmem:[#allocation3 + $0x140] sm:$0xff] }
   0x7   :  { %v1350_v4 = vld [vmem:[#allocation3 + $0x138] sm:$0xff]  ;;  %219 = vmatpush.msra.mxu3 %v1340_v0  ;;  %v1357_v6 = vld [vmem:[#allocation3 + $0x120] sm:$0xff]  ;;  %v1359_v7 = vld [vmem:[#allocation3 + $0x128] sm:$0xff]  ;;  %1142 = vset.pattern.permute.xlu0 %v2075_v19 }
   0x8   :  { %96 = vmatpush.msra.mxu0 %v1344_v2  ;;  %116 = vmatpush.msra.mxu1 %v1348_v3  ;;  %v1364_v8 = vld [vmem:[#allocation3 + $0x108] sm:$0xff]  ;;  %v1366_v9 = vld [vmem:[#allocation3 + $0x110] sm:$0xff]  ;;  %v1373_v11 = vld [vmem:[#allocation3 + $0xf8] sm:$0xff] }
   0x9   :  { %220 = vmatpush.msra.mxu3 %v1344_v2  ;;  %v1371_v10 = vld [vmem:[#allocation3 + $0xf0] sm:$0xff]  ;;  %v1375_v12 = vld [vmem:[#allocation3 + $0x178] sm:$0xff]  ;;  %v1380_v13 = vld [vmem:[#allocation3 + $0x160] sm:$0xff]  ;;  %1143 = vset.pattern.permute.xlu1 %v2075_v19 }
   0xa   :  { %97 = vmatpush.msra.mxu0 %v1350_v4  ;;  %117 = vmatpush.msra.mxu1 %v1352_v5  ;;  %v1382_v14 = vld [vmem:[#allocation3 + $0xd8] sm:$0xff]  ;;  %v1384_v15 = vld [vmem:[#allocation3 + $0xe0] sm:$0xff]  ;;  %v1390_v16 = vld [vmem:[#allocation3 + $0x148] sm:$0xff] }
   0xb   :  { %221 = vmatpush.msra.mxu3 %v1350_v4  ;;  %135 = vmatpush.msra.mxu2 %v1375_v12  ;;  %v1392_v17 = vld [vmem:[#allocation3 + $0xc0] sm:$0xff]  ;;  %v1394_v18 = vld [vmem:[#allocation3 + $0xc8] sm:$0xff]  ;;  %v1400_v20 = vld [vmem:[#allocation3 + $0x130] sm:$0xff] }
   0xc   :  { %98 = vmatpush.msra.mxu0 %v1357_v6  ;;  %118 = vmatpush.msra.mxu1 %v1359_v7  ;;  %v1402_v21 = vld [vmem:[#allocation3 + $0xa8] sm:$0xff]  ;;  %v1404_v22 = vld [vmem:[#allocation3 + $0xb0] sm:$0xff]  ;;  %v1412_v24 = vld [vmem:[#allocation3 + $0x118] sm:$0xff] }
   0xd   :  { %222 = vmatpush.msra.mxu3 %v1357_v6  ;;  %136 = vmatpush.msra.mxu2 %v1380_v13  ;;  %v1410_v23 = vld [vmem:[#allocation3 + $0x90] sm:$0xff]  ;;  %v1414_v25 = vld [vmem:[#allocation3 + $0x98] sm:$0xff]  ;;  %v1420_v26 = vld [vmem:[%s2070_s1] sm:$0xff] }
   0xe   :  { %99 = vmatpush.msra.mxu0 %v1364_v8  ;;  %119 = vmatpush.msra.mxu1 %v1366_v9  ;;  %2097 = vst [vmem:[#allocation6_spill] sm:$0xff] %v1420_v26  ;;  %v1425_v27 = vld [vmem:[#allocation3 + $0x100] sm:$0xff]  ;;  %vm206_vm0 = vcmp.gt.s32.totalorder %v1420_v26, 0  ;;  %v1428_v28 = vld [vmem:[#allocation3 + $0x78] sm:$0xff]  ;;  %v1437_v31 = vld [vmem:[#allocation3 + $0xe8] sm:$0xff]  ;;  %vm328_vm1 = vcmp.gt.s32.totalorder %v1420_v26, 1 }
   0xf   :  { %223 = vmatpush.msra.mxu3 %v1364_v8  ;;  %137 = vmatpush.msra.mxu2 %v1390_v16  ;;  %v1430_v29 = vld [vmem:[#allocation3 + $0x80] sm:$0xff]  ;;  %v207_v30 = vsel %vm206_vm0, 1, %v2075_v19  ;;  %v1441_v33 = vld [vmem:[#allocation3 + $0x68] sm:$0xff]  ;;  %v1446_v34 = vld [vmem:[#allocation3 + $0xd0] sm:$0xff]  ;;  %v329_v41 = vsel %vm328_vm1, 1, %v2075_v19  ;;  %vm943_vm2 = vcmp.gt.s32.totalorder %v1420_v26, 6 }
  0x10   :  { %100 = vmatpush.msra.mxu0 %v1371_v10  ;;  %120 = vmatpush.msra.mxu1 %v1373_v11  ;;  %v1439_v32 = vld [vmem:[#allocation3 + $0x60] sm:$0xff]  ;;  %v1448_v35 = vld [vmem:[#allocation3 + $0x48] sm:$0xff]  ;;  %v1450_v36 = vld [vmem:[#allocation3 + $0x50] sm:$0xff]  ;;  %v944_v50 = vsel %vm943_vm2, 1, %v2075_v19 }
  0x11   :  { %224 = vmatpush.msra.mxu3 %v1371_v10  ;;  %138 = vmatpush.msra.mxu2 %v1400_v20  ;;  %v1457_v37 = vld [vmem:[#allocation3 + $0xb8] sm:$0xff]  ;;  %v1459_v38 = vld [vmem:[#allocation3 + $0x30] sm:$0xff]  ;;  %v1467_v40 = vld [vmem:[#allocation3 + $0xa0] sm:$0xff] }
  0x12   :  { %101 = vmatpush.msra.mxu0 %v1382_v14  ;;  %121 = vmatpush.msra.mxu1 %v1384_v15  ;;  %2098 = vst [vmem:[#allocation7_spill] sm:$0xff] %v1459_v38  ;;  %v1461_v39 = vld [vmem:[#allocation3 + $0x38] sm:$0xff]  ;;  %v1472_v43 = vld [vmem:[#allocation3 + $0x20] sm:$0xff]  ;;  %v1478_v44 = vld [vmem:[#allocation3 + $0x88] sm:$0xff] }
  0x13   :  { %225 = vmatpush.msra.mxu3 %v1382_v14  ;;  %139 = vmatpush.msra.mxu2 %v1412_v24  ;;  %2099 = vst [vmem:[#allocation8_spill] sm:$0xff] %v1461_v39  ;;  %v1470_v42 = vld [vmem:[#allocation3 + $0x18] sm:$0xff]  ;;  %v1480_v45 = vld [vmem:[#allocation3] sm:$0xff]  ;;  %v1482_v46 = vld [vmem:[#allocation3 + $0x8] sm:$0xff] }
  0x14   :  { %102 = vmatpush.msra.mxu0 %v1392_v17  ;;  %122 = vmatpush.msra.mxu1 %v1394_v18  ;;  %2100 = vst [vmem:[#allocation9_spill] sm:$0xff] %v1470_v42  ;;  %v1488_v47 = vld [vmem:[#allocation3 + $0x70] sm:$0xff]  ;;  %v1494_v49 = vld [vmem:[#allocation3 + $0x58] sm:$0xff]  ;;  %v1499_v51 = vld [vmem:[#allocation3 + $0x40] sm:$0xff] }
  0x15   :  { %226 = vmatpush.msra.mxu3 %v1392_v17  ;;  %140 = vmatpush.msra.mxu2 %v1425_v27  ;;  %2101 = vst [vmem:[#allocation10_spill] sm:$0xff] %v1472_v43  ;;  %v1505_v52 = vld [vmem:[#allocation3 + $0x28] sm:$0xff]  ;;  %v1510_v53 = vld [vmem:[#allocation3 + $0x10] sm:$0xff]  ;;  %v92_v54 = vld [vmem:[%s2069_s0] sm:$0xff] }
  0x16   :  { %103 = vmatpush.msra.mxu0 %v1402_v21  ;;  %123 = vmatpush.msra.mxu1 %v1404_v22  ;;  %2102 = vst [vmem:[#allocation11_spill] sm:$0xff] %v1480_v45  ;;  %v93_v55 = vld [vmem:[%s2069_s0 + $0x8] sm:$0xff] }
  0x17   :  { %209 = vperm.xlu0 %1142, %v207_v30   ;;  %141 = vmatpush.msra.mxu2 %v1437_v31  ;;  %2103 = vst [vmem:[#allocation12_spill] sm:$0xff] %v1482_v46 }
  0x18   :  { %104 = vmatpush.msra.mxu0 %v1410_v23  ;;  %124 = vmatpush.msra.mxu1 %v1414_v25  ;;  %2104 = vst [vmem:[#allocation13_spill] sm:$0xff] %v1505_v52 }
  0x19   :  { %227 = vmatpush.msra.mxu3 %v1402_v21  ;;  %142 = vmatpush.msra.mxu2 %v1446_v34  ;;  %2105 = vst [vmem:[#allocation14_spill] sm:$0xff] %v1510_v53 }
  0x1a   :  { %105 = vmatpush.msra.mxu0 %v1428_v28  ;;  %125 = vmatpush.msra.mxu1 %v1430_v29 }
  0x1b   :  { %228 = vmatpush.msra.mxu3 %v1410_v23  ;;  %143 = vmatpush.msra.mxu2 %v1457_v37 }
  0x1c   :  { %106 = vmatpush.msra.mxu0 %v1439_v32  ;;  %126 = vmatpush.msra.mxu1 %v1441_v33 }
  0x1d   :  { %229 = vmatpush.msra.mxu3 %v1428_v28  ;;  %144 = vmatpush.msra.mxu2 %v1467_v40 }
  0x1e   :  { %107 = vmatpush.msra.mxu0 %v1448_v35  ;;  %127 = vmatpush.msra.mxu1 %v1450_v36 }
  0x1f   :  { %331 = vperm.xlu0 %1142, %v329_v41   ;;  %145 = vmatpush.msra.mxu2 %v1478_v44 }
  0x20   :  { %108 = vmatpush.msra.mxu0 %v1459_v38  ;;  %128 = vmatpush.msra.mxu1 %v1461_v39 }
  0x21   :  { %230 = vmatpush.msra.mxu3 %v1439_v32  ;;  %146 = vmatpush.msra.mxu2 %v1488_v47 }
  0x22   :  { %109 = vmatpush.msra.mxu0 %v1470_v42  ;;  %129 = vmatpush.msra.mxu1 %v1472_v43 }
  0x23   :  { %231 = vmatpush.msra.mxu3 %v1448_v35  ;;  %147 = vmatpush.msra.mxu2 %v1494_v49 }
  0x24   :  { %110 = vmatpush.msra.mxu0 %v1480_v45  ;;  %130 = vmatpush.msra.mxu1 %v1482_v46 }
  0x25   :  { %111 = vmatmul.f32.vlgmr.msra.gmra.mxu0 %v1306_v48  ;;  %131 = vmatmul.f32.vlgmr.msra.gmra.mxu1 %v1306_v48 }
  0x26   :  { %239 = vmatpush.msrb.mxu0 %v1342_v1  ;;  %259 = vmatpush.msrb.mxu1 %v1375_v12 }
  0x27   :  { %946 = vperm.xlu0 %1142, %v944_v50   ;;  %148 = vmatpush.msra.mxu2 %v1499_v51 }
  0x28   :  { %240 = vmatpush.msrb.mxu0 %v1348_v3  ;;  %260 = vmatpush.msrb.mxu1 %v1380_v13 }
  0x29   :  { %232 = vmatpush.msra.mxu3 %v1459_v38  ;;  %149 = vmatpush.msra.mxu2 %v1505_v52 }
  0x2a   :  { %241 = vmatpush.msrb.mxu0 %v1352_v5  ;;  %261 = vmatpush.msrb.mxu1 %v1390_v16 }
  0x2b   :  { %233 = vmatpush.msra.mxu3 %v1470_v42  ;;  %150 = vmatpush.msra.mxu2 %v1510_v53 }
  0x2c   :  { %242 = vmatpush.msrb.mxu0 %v1359_v7  ;;  %262 = vmatpush.msrb.mxu1 %v1400_v20 }
  0x2d   :  { %151 = vmatmul.f32.vlgmr.msra.gmra.mxu2 %v1306_v48  ;;  %234 = vmatpush.msra.mxu3 %v1480_v45 }
  0x2e   :  { %243 = vmatpush.msrb.mxu0 %v1366_v9  ;;  %263 = vmatpush.msrb.mxu1 %v1412_v24 }
  0x2f   :  { %342 = vmatpush.msrb.mxu2 %v1340_v0  ;;  %362 = vmatpush.msrb.mxu3 %v1342_v1 }
  0x30   :  { %244 = vmatpush.msrb.mxu0 %v1373_v11  ;;  %264 = vmatpush.msrb.mxu1 %v1425_v27 }
  0x31   :  { %343 = vmatpush.msrb.mxu2 %v1344_v2  ;;  %363 = vmatpush.msrb.mxu3 %v1348_v3 }
  0x32   :  { %245 = vmatpush.msrb.mxu0 %v1384_v15  ;;  %265 = vmatpush.msrb.mxu1 %v1437_v31 }
  0x33   :  { %344 = vmatpush.msrb.mxu2 %v1350_v4  ;;  %364 = vmatpush.msrb.mxu3 %v1352_v5 }
  0x34   :  { %246 = vmatpush.msrb.mxu0 %v1394_v18  ;;  %266 = vmatpush.msrb.mxu1 %v1446_v34 }
  0x35   :  { %345 = vmatpush.msrb.mxu2 %v1357_v6  ;;  %365 = vmatpush.msrb.mxu3 %v1359_v7 }
  0x36   :  { %247 = vmatpush.msrb.mxu0 %v1404_v22  ;;  %267 = vmatpush.msrb.mxu1 %v1457_v37 }
  0x37   :  { %346 = vmatpush.msrb.mxu2 %v1364_v8  ;;  %366 = vmatpush.msrb.mxu3 %v1366_v9 }
  0x38   :  { %248 = vmatpush.msrb.mxu0 %v1414_v25  ;;  %268 = vmatpush.msrb.mxu1 %v1467_v40 }
  0x39   :  { %347 = vmatpush.msrb.mxu2 %v1371_v10  ;;  %367 = vmatpush.msrb.mxu3 %v1373_v11 }
  0x3a   :  { %249 = vmatpush.msrb.mxu0 %v1430_v29  ;;  %269 = vmatpush.msrb.mxu1 %v1478_v44 }
  0x3b   :  { %348 = vmatpush.msrb.mxu2 %v1382_v14  ;;  %368 = vmatpush.msrb.mxu3 %v1384_v15 }
  0x3c   :  { %250 = vmatpush.msrb.mxu0 %v1441_v33  ;;  %270 = vmatpush.msrb.mxu1 %v1488_v47 }
  0x3d   :  { %349 = vmatpush.msrb.mxu2 %v1392_v17  ;;  %369 = vmatpush.msrb.mxu3 %v1394_v18 }
  0x3e   :  { %251 = vmatpush.msrb.mxu0 %v1450_v36  ;;  %271 = vmatpush.msrb.mxu1 %v1494_v49 }
  0x3f   :  { %350 = vmatpush.msrb.mxu2 %v1402_v21  ;;  %370 = vmatpush.msrb.mxu3 %v1404_v22 }
  0x40   :  { %252 = vmatpush.msrb.mxu0 %v1461_v39  ;;  %272 = vmatpush.msrb.mxu1 %v1499_v51 }
  0x41   :  { %351 = vmatpush.msrb.mxu2 %v1410_v23  ;;  %371 = vmatpush.msrb.mxu3 %v1414_v25 }
  0x42   :  { %253 = vmatpush.msrb.mxu0 %v1472_v43  ;;  %273 = vmatpush.msrb.mxu1 %v1505_v52 }
  0x43   :  { %352 = vmatpush.msrb.mxu2 %v1428_v28  ;;  %372 = vmatpush.msrb.mxu3 %v1430_v29 }
  0x44   :  { %254 = vmatpush.msrb.mxu0 %v1482_v46  ;;  %274 = vmatpush.msrb.mxu1 %v1510_v53 }
  0x45   :  { %353 = vmatpush.msrb.mxu2 %v1439_v32  ;;  %373 = vmatpush.msrb.mxu3 %v1441_v33 }
  0x46   :  { %382 = vmatpush.msra.mxu0 %v1375_v12  ;;  %465 = vmatpush.msra.mxu1 %v1340_v0 }
  0x47   :  { %354 = vmatpush.msrb.mxu2 %v1448_v35  ;;  %374 = vmatpush.msrb.mxu3 %v1450_v36 }
  0x48   :  { %383 = vmatpush.msra.mxu0 %v1380_v13  ;;  %466 = vmatpush.msra.mxu1 %v1344_v2 }
  0x49   :  { %355 = vmatpush.msrb.mxu2 %v1459_v38  ;;  %375 = vmatpush.msrb.mxu3 %v1461_v39 }
  0x4a   :  { %384 = vmatpush.msra.mxu0 %v1390_v16  ;;  %467 = vmatpush.msra.mxu1 %v1350_v4 }
  0x4b   :  { %356 = vmatpush.msrb.mxu2 %v1470_v42  ;;  %376 = vmatpush.msrb.mxu3 %v1472_v43 }
  0x4c   :  { %385 = vmatpush.msra.mxu0 %v1400_v20  ;;  %468 = vmatpush.msra.mxu1 %v1357_v6 }
  0x4d   :  { %357 = vmatpush.msrb.mxu2 %v1480_v45  ;;  %377 = vmatpush.msrb.mxu3 %v1482_v46 }
  0x4e   :  { %386 = vmatpush.msra.mxu0 %v1412_v24  ;;  %469 = vmatpush.msra.mxu1 %v1364_v8 }
  0x4f   :  { %485 = vmatpush.msra.mxu2 %v1342_v1  ;;  %1144 = vset.pattern.permute.xlu2 %v2075_v19 }
  0x50   :  { %387 = vmatpush.msra.mxu0 %v1425_v27  ;;  %470 = vmatpush.msra.mxu1 %v1371_v10 }
  0x51   :  { %486 = vmatpush.msra.mxu2 %v1348_v3 }
  0x52   :  { %388 = vmatpush.msra.mxu0 %v1437_v31  ;;  %471 = vmatpush.msra.mxu1 %v1382_v14 }
  0x53   :  { %487 = vmatpush.msra.mxu2 %v1352_v5 }
  0x54   :  { %389 = vmatpush.msra.mxu0 %v1446_v34  ;;  %472 = vmatpush.msra.mxu1 %v1392_v17 }
  0x55   :  { %488 = vmatpush.msra.mxu2 %v1359_v7 }
  0x56   :  { %390 = vmatpush.msra.mxu0 %v1457_v37  ;;  %473 = vmatpush.msra.mxu1 %v1402_v21 }
  0x57   :  { %489 = vmatpush.msra.mxu2 %v1366_v9 }
  0x58   :  { %391 = vmatpush.msra.mxu0 %v1467_v40  ;;  %474 = vmatpush.msra.mxu1 %v1410_v23 }
  0x59   :  { %490 = vmatpush.msra.mxu2 %v1373_v11 }
  0x5a   :  { %392 = vmatpush.msra.mxu0 %v1478_v44  ;;  %475 = vmatpush.msra.mxu1 %v1428_v28 }
  0x5b   :  { %491 = vmatpush.msra.mxu2 %v1384_v15 }
  0x5c   :  { %393 = vmatpush.msra.mxu0 %v1488_v47  ;;  %476 = vmatpush.msra.mxu1 %v1439_v32 }
  0x5d   :  { %492 = vmatpush.msra.mxu2 %v1394_v18 }
  0x5e   :  { %394 = vmatpush.msra.mxu0 %v1494_v49  ;;  %477 = vmatpush.msra.mxu1 %v1448_v35 }
  0x5f   :  { %493 = vmatpush.msra.mxu2 %v1404_v22 }
  0x60   :  { %395 = vmatpush.msra.mxu0 %v1499_v51  ;;  %478 = vmatpush.msra.mxu1 %v1459_v38 }
  0x61   :  { %494 = vmatpush.msra.mxu2 %v1414_v25 }
  0x62   :  { %396 = vmatpush.msra.mxu0 %v1505_v52  ;;  %479 = vmatpush.msra.mxu1 %v1470_v42 }
  0x63   :  { %495 = vmatpush.msra.mxu2 %v1430_v29 }
  0x64   :  { %397 = vmatpush.msra.mxu0 %v1510_v53  ;;  %480 = vmatpush.msra.mxu1 %v1480_v45 }
  0x65   :  { %496 = vmatpush.msra.mxu2 %v1441_v33 }
  0x67   :  { %497 = vmatpush.msra.mxu2 %v1450_v36 }
  0x69   :  { %498 = vmatpush.msra.mxu2 %v1461_v39 }
  0x6b   :  { %499 = vmatpush.msra.mxu2 %v1472_v43 }
  0x6d   :  { %500 = vmatpush.msra.mxu2 %v1482_v46  ;;  %v1635_v46 = vld [vmem:[%s2072_s3] ss:$0 sm:$0xff] }
  0x6e   :  { %2106 = vst [vmem:[#allocation15_spill] sm:$0xff] %v1635_v46 }
  0xa2   :  { %v112_v56 = vpop.f32.mrf.mxu0  ;;  %v132_v57 = vpop.f32.mrf.mxu1 }
  0xa3   :  { %v155_v58 = vadd.f32 %v112_v56, %v92_v54  ;;  %v175_v59 = vadd.f32 %v132_v57, %v93_v55 }
  0xa5   :  { %v1090_v60 = vmul.f32 -1.442695, %v155_v58  ;;  %v1091_v61 = vmul.f32 -1.442695, %v175_v59 }
  0xa7   :  { %1146 = vpow2.f32 %v1090_v60 }
  0xa8   :  { %1148 = vpow2.f32 %v1091_v61 }
  0xad   :  { %v1147_v62 = vpop.eup %1146 }
  0xae   :  { %v1149_v63 = vpop.eup %1148  ;;  %v159_v30 = vadd.f32 1.0, %v1147_v62 }
  0xaf   :  { %v179_v41 = vadd.f32 1.0, %v1149_v63 }
  0xb0   :  { %1150 = vrcp.f32 %v159_v30  ;;  %v152_v55 = vpop.f32.mrf.mxu2  ;;  %v171_v56 = vand.u32 2147483648, %v159_v30  ;;  %v169_v58 = vand.u32 2147483647, %v159_v30  ;;  %vm165_vm4 = vweird.f32 %v159_v30 }
  0xb1   :  { %1152 = vrcp.f32 %v179_v41  ;;  %v198_v60 = vadd.f32 %v1635_v46, %v152_v55  ;;  %vm185_vm7 = vweird.f32 %v179_v41  ;;  %v210_v46 = vpop.permute.xlu0 %209 }
  0xb2   :  { %v172_v62 = vor.u32 1.1754944e-38, %v171_v56  ;;  %vm170_vm6 = vcmp.eq.f32.partialorder %v169_v58, 8.507059e+37  ;;  %vm211_vm11 = vcmp.eq.s32.totalorder %v210_v46, 1  ;;  %v2109_v46 = vld [vmem:[#allocation14_spill] sm:$0xff] }
  0xb6   :  { %v1151_v48 = vpop.eup %1150 }
  0xb7   :  { %v1153_v50 = vpop.eup %1152  ;;  %v161_v19 = vmul.f32 %v1151_v48, %v159_v30  ;;  %vm166_vm3 = vweird.f32 %v1151_v48 }
  0xb8   :  { %v181_v54 = vmul.f32 %v1153_v50, %v179_v41  ;;  %vm167_vm5 = vmor %vm165_vm4, %vm166_vm3  ;;  %vm186_vm8 = vweird.f32 %v1153_v50 }
  0xb9   :  { %v162_v26 = vsub.f32 1.0, %v161_v19  ;;  %v94_v19 = vld [vmem:[%s2069_s0 + $0x10] sm:$0xff]  ;;  %vm187_vm9 = vmor %vm185_vm7, %vm186_vm8 }
  0xba   :  { %v182_v61 = vsub.f32 1.0, %v181_v54 }
  0xbb   :  { %v163_v57 = vmul.f32 %v1151_v48, %v162_v26  ;;  %v191_v26 = vand.u32 2147483648, %v179_v41 }
  0xbc   :  { %v183_v43 = vmul.f32 %v1153_v50, %v182_v61 }
  0xbd   :  { %v164_v59 = vadd.f32 %v1151_v48, %v163_v57  ;;  %v189_v57 = vand.u32 2147483647, %v179_v41  ;;  %v192_v54 = vor.u32 1.1754944e-38, %v191_v26  ;;  %v2111_v41 = vld [vmem:[#allocation12_spill] sm:$0xff] }
  0xbe   :  { %v184_v30 = vadd.f32 %v1153_v50, %v183_v43  ;;  %v2108_v43 = vld [vmem:[#allocation10_spill] sm:$0xff] }
  0xbf   :  { %v168_v63 = vsel %vm167_vm5, %v1151_v48, %v164_v59  ;;  %vm190_vm10 = vcmp.eq.f32.partialorder %v189_v57, 8.507059e+37 }
  0xc0   :  { %v173_v45 = vsel %vm170_vm6, %v172_v62, %v168_v63  ;;  %v188_v55 = vsel %vm187_vm9, %v1153_v50, %v184_v30  ;;  %v1093_v50 = vld [vmem:[%s2069_s0 + $0x20] sm:$0xff] }
  0xc1   :  { %v199_v53 = vmul.f32 %v198_v60, %v173_v45  ;;  %v193_v58 = vsel %vm190_vm10, %v192_v54, %v188_v55 }
  0xc3   :  { %v200_v42 = vadd.f32 %v199_v53, %v94_v19  ;;  %v2110_v53 = vld [vmem:[#allocation11_spill] sm:$0xff]  ;;  %v1092_v19 = vld [vmem:[%s2069_s0 + $0x18] sm:$0xff] }
  0xc5   :  { %1154 = vtanh.f32 %v200_v42  ;;  %v2107_v42 = vld [vmem:[#allocation9_spill] sm:$0xff] }
  0xcb   :  { %v1155_v48 = vpop.eup %1154 }
  0xcc   :  { %v202_v56 = vsub.f32 0.0, %v1155_v48 }
  0xce   :  { %v203_v59 = vmul.f32 %v202_v56, %v193_v58  ;;  %v2112_v58 = vld [vmem:[#allocation6_spill] sm:$0xff] }
  0xcf   :  { %vm451_vm12 = vcmp.gt.s32.totalorder %v2112_v58, 2  ;;  %vm574_vm13 = vcmp.gt.s32.totalorder %v2112_v58, 3  ;;  %vm1066_vm2 = vcmp.gt.s32.totalorder %v2112_v58, 7 }
  0xd0   :  { %v204_v62 = vadd.f32 %v1155_v48, %v203_v59  ;;  %v2113_v59 = vmov 0  }
  0xd2   :  { %v1641_v45 = vsel %vm211_vm11, %v204_v62, 0.0  ;;  %1134 = vmatmul.msk.f32.vlgmr.msra.gmra.mxu3 %vm211_vm11, %v204_v62  ;;  %1135 = vmatmul.msk.f32.vlgmr.msrb.gmra.mxu0 %vm211_vm11, %v204_v62 }
  0xd3   :  { %214 = vst [vmem:[%s2073_s4] sm:$0xff] %v1641_v45  ;;  %1136 = vmatmul.msk.f32.vlgmr.msrb.gmra.mxu1 %vm211_vm11, %v204_v62  ;;  %505 = vmatpush.msra.mxu3 %v1375_v12  ;;  %v452_v62 = vsel %vm451_vm12, 1, %v2113_v59 }
  0xd4   :  { %588 = vmatpush.msrb.mxu0 %v1340_v0  ;;  %608 = vmatpush.msrb.mxu1 %v1342_v1 }
  0xd5   :  { %506 = vmatpush.msra.mxu3 %v1380_v13  ;;  %454 = vperm.xlu1 %1143, %v452_v62   ;;  %v2114_v62 = vld [vmem:[#allocation15_spill] sm:$0xff] }
  0xd6   :  { %589 = vmatpush.msrb.mxu0 %v1344_v2  ;;  %609 = vmatpush.msrb.mxu1 %v1348_v3 }
  0xd7   :  { %507 = vmatpush.msra.mxu3 %v1390_v16 }
  0xd8   :  { %590 = vmatpush.msrb.mxu0 %v1350_v4  ;;  %610 = vmatpush.msrb.mxu1 %v1352_v5 }
  0xd9   :  { %508 = vmatpush.msra.mxu3 %v1400_v20 }
  0xda   :  { %591 = vmatpush.msrb.mxu0 %v1357_v6  ;;  %611 = vmatpush.msrb.mxu1 %v1359_v7 }
  0xdb   :  { %509 = vmatpush.msra.mxu3 %v1412_v24 }
  0xdc   :  { %592 = vmatpush.msrb.mxu0 %v1364_v8  ;;  %612 = vmatpush.msrb.mxu1 %v1366_v9 }
  0xdd   :  { %510 = vmatpush.msra.mxu3 %v1425_v27 }
  0xde   :  { %593 = vmatpush.msrb.mxu0 %v1371_v10  ;;  %613 = vmatpush.msrb.mxu1 %v1373_v11 }
  0xdf   :  { %511 = vmatpush.msra.mxu3 %v1437_v31 }
  0xe0   :  { %594 = vmatpush.msrb.mxu0 %v1382_v14  ;;  %614 = vmatpush.msrb.mxu1 %v1384_v15 }
  0xe1   :  { %512 = vmatpush.msra.mxu3 %v1446_v34 }
  0xe2   :  { %595 = vmatpush.msrb.mxu0 %v1392_v17  ;;  %615 = vmatpush.msrb.mxu1 %v1394_v18 }
  0xe3   :  { %513 = vmatpush.msra.mxu3 %v1457_v37 }
  0xe4   :  { %596 = vmatpush.msrb.mxu0 %v1402_v21  ;;  %616 = vmatpush.msrb.mxu1 %v1404_v22 }
  0xe5   :  { %514 = vmatpush.msra.mxu3 %v1467_v40 }
  0xe6   :  { %597 = vmatpush.msrb.mxu0 %v1410_v23  ;;  %617 = vmatpush.msrb.mxu1 %v1414_v25 }
  0xe7   :  { %515 = vmatpush.msra.mxu3 %v1478_v44 }
  0xe8   :  { %598 = vmatpush.msrb.mxu0 %v1428_v28  ;;  %618 = vmatpush.msrb.mxu1 %v1430_v29 }
  0xe9   :  { %516 = vmatpush.msra.mxu3 %v1488_v47 }
  0xea   :  { %599 = vmatpush.msrb.mxu0 %v1439_v32  ;;  %619 = vmatpush.msrb.mxu1 %v1441_v33 }
  0xeb   :  { %517 = vmatpush.msra.mxu3 %v1494_v49 }
  0xec   :  { %600 = vmatpush.msrb.mxu0 %v1448_v35  ;;  %620 = vmatpush.msrb.mxu1 %v1450_v36 }
  0xed   :  { %518 = vmatpush.msra.mxu3 %v1499_v51 }
  0xee   :  { %601 = vmatpush.msrb.mxu0 %v1459_v38  ;;  %621 = vmatpush.msrb.mxu1 %v1461_v39 }
  0xef   :  { %519 = vmatpush.msra.mxu3 %v1505_v52 }
  0xf0   :  { %602 = vmatpush.msrb.mxu0 %v2107_v42  ;;  %622 = vmatpush.msrb.mxu1 %v2108_v43 }
  0xf1   :  { %520 = vmatpush.msra.mxu3 %v2109_v46 }
  0xf2   :  { %603 = vmatpush.msrb.mxu0 %v2110_v53  ;;  %623 = vmatpush.msrb.mxu1 %v2111_v41 }
 0x14f   :  { %v256_v60 = vpop.f32.mrf.mxu0 }
 0x150   :  { %v299_v61 = vadd.f32 %v1093_v50, %v256_v60 }
 0x152   :  { %v1096_v63 = vmul.f32 -1.442695, %v299_v61 }
 0x154   :  { %1156 = vpow2.f32 %v1096_v63 }
 0x155   :  { %v236_v26 = vpop.f32.mrf.mxu3 }
 0x156   :  { %v279_v30 = vadd.f32 %v1092_v19, %v236_v26 }
 0x158   :  { %v1095_v57 = vmul.f32 -1.442695, %v279_v30 }
 0x15a   :  { %1158 = vpow2.f32 %v1095_v57  ;;  %v1157_v54 = vpop.eup %1156 }
 0x15b   :  { %v303_v48 = vadd.f32 1.0, %v1157_v54  ;;  %v575_v54 = vsel %vm574_vm13, 1, %v2113_v59 }
 0x15c   :  { %577 = vperm.xlu1 %1143, %v575_v54  }
 0x15d   :  { %vm309_vm4 = vweird.f32 %v303_v48 }
 0x160   :  { %v1159_v55 = vpop.eup %1158 }
 0x161   :  { %v283_v56 = vadd.f32 1.0, %v1159_v55  ;;  %v276_v55 = vpop.f32.mrf.mxu1 }
 0x162   :  { %v319_v43 = vadd.f32 %v2114_v62, %v276_v55 }
 0x163   :  { %1160 = vrcp.f32 %v283_v56  ;;  %v295_v26 = vand.u32 2147483648, %v283_v56  ;;  %v293_v57 = vand.u32 2147483647, %v283_v56  ;;  %vm289_vm15 = vweird.f32 %v283_v56 }
 0x164   :  { %1162 = vrcp.f32 %v303_v48 }
 0x165   :  { %v296_v46 = vor.u32 1.1754944e-38, %v295_v26  ;;  %vm294_vm1 = vcmp.eq.f32.partialorder %v293_v57, 8.507059e+37  ;;  %v315_v26 = vand.u32 2147483648, %v303_v48 }
 0x169   :  { %v1161_v50 = vpop.eup %1160 }
 0x16a   :  { %v1163_v60 = vpop.eup %1162  ;;  %v285_v61 = vmul.f32 %v1161_v50, %v283_v56  ;;  %vm290_vm14 = vweird.f32 %v1161_v50  ;;  %v1067_v56 = vsel %vm1066_vm2, 1, %v2113_v59 }
 0x16b   :  { %v305_v63 = vmul.f32 %v1163_v60, %v303_v48  ;;  %vm291_vm0 = vmor %vm289_vm15, %vm290_vm14  ;;  %vm310_vm3 = vweird.f32 %v1163_v60  ;;  %1069 = vperm.xlu1 %1143, %v1067_v56  }
 0x16c   :  { %v286_v19 = vsub.f32 1.0, %v285_v61  ;;  %v1094_v61 = vld [vmem:[%s2069_s0 + $0x28] sm:$0xff]  ;;  %vm311_vm5 = vmor %vm309_vm4, %vm310_vm3 }
 0x16d   :  { %v306_v53 = vsub.f32 1.0, %v305_v63 }
 0x16e   :  { %v287_v30 = vmul.f32 %v1161_v50, %v286_v19 }
 0x16f   :  { %v307_v39 = vmul.f32 %v1163_v60, %v306_v53 }
 0x170   :  { %v288_v41 = vadd.f32 %v1161_v50, %v287_v30 }
 0x171   :  { %v308_v63 = vadd.f32 %v1163_v60, %v307_v39 }
 0x172   :  { %v292_v42 = vsel %vm291_vm0, %v1161_v50, %v288_v41  ;;  %v313_v41 = vand.u32 2147483647, %v303_v48  ;;  %v316_v50 = vor.u32 1.1754944e-38, %v315_v26 }
 0x173   :  { %v297_v52 = vsel %vm294_vm1, %v296_v46, %v292_v42  ;;  %v312_v42 = vsel %vm311_vm5, %v1163_v60, %v308_v63 }
 0x174   :  { %v320_v19 = vmul.f32 %v319_v43, %v297_v52  ;;  %vm314_vm6 = vcmp.eq.f32.partialorder %v313_v41, 8.507059e+37  ;;  %v332_v43 = vpop.permute.xlu0 %331 }
 0x175   :  { %v317_v58 = vsel %vm314_vm6, %v316_v50, %v312_v42  ;;  %vm333_vm7 = vcmp.eq.s32.totalorder %v332_v43, 1  ;;  %v1100_v50 = vld [vmem:[%s2069_s0 + $0x40] sm:$0xff] }
 0x176   :  { %v321_v38 = vadd.f32 %v1094_v61, %v320_v19 }
 0x178   :  { %1164 = vtanh.f32 %v321_v38 }
 0x17e   :  { %v1165_v46 = vpop.eup %1164 }
 0x17f   :  { %v323_v30 = vsub.f32 %v1641_v45, %v1165_v46 }
 0x181   :  { %v324_v52 = vmul.f32 %v323_v30, %v317_v58 }
 0x183   :  { %v325_v53 = vadd.f32 %v1165_v46, %v324_v52 }
 0x185   :  { %v1713_v38 = vsel %vm333_vm7, %v325_v53, %v1641_v45  ;;  %v335_v39 = vsel %vm333_vm7, %v325_v53, 0.0 }
 0x186   :  { %1097 = vst [vmem:[%s2073_s4 + $0x8] sm:$0xff] %v335_v39  ;;  %358 = vmatmul.f32.vlgmr.msrb.gmra.mxu2 %v1713_v38  ;;  %378 = vmatmul.f32.vlgmr.msrb.gmra.mxu3 %v1713_v38 }
 0x187   :  { %398 = vmatmul.f32.vlgmr.msra.gmra.mxu0 %v1713_v38  ;;  %628 = vmatpush.msrb.mxu2 %v1375_v12 }
 0x188   :  { %711 = vmatpush.msrb.mxu3 %v1340_v0  ;;  %731 = vmatpush.msra.mxu0 %v1342_v1  ;;  %v2115_v0 = vld [vmem:[#allocation7_spill] sm:$0xff]  ;;  %v2116_v1 = vld [vmem:[#allocation8_spill] sm:$0xff] }
 0x189   :  { %629 = vmatpush.msrb.mxu2 %v1380_v13 }
 0x18a   :  { %712 = vmatpush.msrb.mxu3 %v1344_v2  ;;  %732 = vmatpush.msra.mxu0 %v1348_v3  ;;  %v2117_v2 = vld [vmem:[#allocation13_spill] sm:$0xff] }
 0x18b   :  { %630 = vmatpush.msrb.mxu2 %v1390_v16  ;;  %v2118_v3 = vld [vmem:[#allocation9_spill] sm:$0xff] }
 0x18c   :  { %713 = vmatpush.msrb.mxu3 %v1350_v4  ;;  %733 = vmatpush.msra.mxu0 %v1352_v5  ;;  %v2119_v4 = vld [vmem:[#allocation10_spill] sm:$0xff] }
 0x18d   :  { %631 = vmatpush.msrb.mxu2 %v1400_v20  ;;  %v2120_v5 = vld [vmem:[#allocation14_spill] sm:$0xff] }
 0x18e   :  { %714 = vmatpush.msrb.mxu3 %v1357_v6  ;;  %734 = vmatpush.msra.mxu0 %v1359_v7  ;;  %v2121_v6 = vld [vmem:[#allocation11_spill] sm:$0xff]  ;;  %v2122_v7 = vld [vmem:[#allocation12_spill] sm:$0xff] }
 0x18f   :  { %632 = vmatpush.msrb.mxu2 %v1412_v24 }
 0x190   :  { %715 = vmatpush.msrb.mxu3 %v1364_v8  ;;  %735 = vmatpush.msra.mxu0 %v1366_v9  ;;  %v1098_v8 = vld [vmem:[%s2069_s0 + $0x30] sm:$0xff]  ;;  %v1099_v9 = vld [vmem:[%s2069_s0 + $0x38] sm:$0xff] }
 0x191   :  { %633 = vmatpush.msrb.mxu2 %v1425_v27 }
 0x192   :  { %716 = vmatpush.msrb.mxu3 %v1371_v10  ;;  %736 = vmatpush.msra.mxu0 %v1373_v11 }
 0x193   :  { %634 = vmatpush.msrb.mxu2 %v1437_v31 }
 0x194   :  { %717 = vmatpush.msrb.mxu3 %v1382_v14  ;;  %737 = vmatpush.msra.mxu0 %v1384_v15 }
 0x195   :  { %635 = vmatpush.msrb.mxu2 %v1446_v34 }
 0x196   :  { %718 = vmatpush.msrb.mxu3 %v1392_v17  ;;  %738 = vmatpush.msra.mxu0 %v1394_v18 }
 0x197   :  { %636 = vmatpush.msrb.mxu2 %v1457_v37 }
 0x198   :  { %719 = vmatpush.msrb.mxu3 %v1402_v21  ;;  %739 = vmatpush.msra.mxu0 %v1404_v22 }
 0x199   :  { %637 = vmatpush.msrb.mxu2 %v1467_v40 }
 0x19a   :  { %720 = vmatpush.msrb.mxu3 %v1410_v23  ;;  %740 = vmatpush.msra.mxu0 %v1414_v25 }
 0x19b   :  { %638 = vmatpush.msrb.mxu2 %v1478_v44 }
 0x19c   :  { %721 = vmatpush.msrb.mxu3 %v1428_v28  ;;  %741 = vmatpush.msra.mxu0 %v1430_v29 }
 0x19d   :  { %639 = vmatpush.msrb.mxu2 %v1488_v47 }
 0x19e   :  { %722 = vmatpush.msrb.mxu3 %v1439_v32  ;;  %742 = vmatpush.msra.mxu0 %v1441_v33 }
 0x19f   :  { %640 = vmatpush.msrb.mxu2 %v1494_v49 }
 0x1a0   :  { %723 = vmatpush.msrb.mxu3 %v1448_v35  ;;  %743 = vmatpush.msra.mxu0 %v1450_v36 }
 0x1a1   :  { %641 = vmatpush.msrb.mxu2 %v1499_v51 }
 0x1a2   :  { %724 = vmatpush.msrb.mxu3 %v2115_v0  ;;  %744 = vmatpush.msra.mxu0 %v2116_v1 }
 0x1a3   :  { %642 = vmatpush.msrb.mxu2 %v2117_v2 }
 0x1a4   :  { %725 = vmatpush.msrb.mxu3 %v2118_v3  ;;  %745 = vmatpush.msra.mxu0 %v2119_v4 }
 0x1a5   :  { %643 = vmatpush.msrb.mxu2 %v2120_v5 }
 0x1a6   :  { %726 = vmatpush.msrb.mxu3 %v2121_v6  ;;  %746 = vmatpush.msra.mxu0 %v2122_v7 }
 0x204   :  { %v399_v56 = vpop.f32.mrf.mxu0 }
 0x205   :  { %v442_v42 = vadd.f32 %v2114_v62, %v399_v56  ;;  %v1849_v56 = vld [vmem:[#allocation3 + $0xb0] sm:$0xff] }
 0x209   :  { %v359_v10 = vpop.f32.mrf.mxu2  ;;  %v379_v11 = vpop.f32.mrf.mxu3 }
 0x20a   :  { %v402_v14 = vadd.f32 %v1098_v8, %v359_v10  ;;  %v422_v15 = vadd.f32 %v1099_v9, %v379_v11 }
 0x20c   :  { %v1101_v17 = vmul.f32 -1.442695, %v402_v14  ;;  %v1102_v18 = vmul.f32 -1.442695, %v422_v15 }
 0x20e   :  { %1166 = vpow2.f32 %v1101_v17  ;;  %v455_v17 = vpop.permute.xlu1 %454 }
 0x20f   :  { %1168 = vpow2.f32 %v1102_v18  ;;  %vm456_vm0 = vcmp.eq.s32.totalorder %v455_v17, 1 }
 0x214   :  { %v1167_v21 = vpop.eup %1166 }
 0x215   :  { %v1169_v22 = vpop.eup %1168  ;;  %v406_v23 = vadd.f32 1.0, %v1167_v21 }
 0x216   :  { %v426_v25 = vadd.f32 1.0, %v1169_v22 }
 0x217   :  { %1170 = vrcp.f32 %v406_v23  ;;  %v418_v54 = vand.u32 2147483648, %v406_v23  ;;  %v416_v19 = vand.u32 2147483647, %v406_v23  ;;  %vm412_vm9 = vweird.f32 %v406_v23 }
 0x218   :  { %1172 = vrcp.f32 %v426_v25  ;;  %v438_v39 = vand.u32 2147483648, %v426_v25  ;;  %vm432_vm13 = vweird.f32 %v426_v25  ;;  %v436_v8 = vand.u32 2147483647, %v426_v25 }
 0x219   :  { %v419_v26 = vor.u32 1.1754944e-38, %v418_v54  ;;  %vm417_vm11 = vcmp.eq.f32.partialorder %v416_v19, 8.507059e+37  ;;  %v1821_v54 = vld [vmem:[#allocation3 + $0x110] sm:$0xff]  ;;  %v1842_v19 = vld [vmem:[#allocation3 + $0xc8] sm:$0xff] }
 0x21a   :  { %v439_v11 = vor.u32 1.1754944e-38, %v438_v39  ;;  %vm437_vm15 = vcmp.eq.f32.partialorder %v436_v8, 8.507059e+37 }
 0x21d   :  { %v1171_v45 = vpop.eup %1170 }
 0x21e   :  { %v1173_v48 = vpop.eup %1172  ;;  %v408_v60 = vmul.f32 %v1171_v45, %v406_v23  ;;  %vm413_vm8 = vweird.f32 %v1171_v45 }
 0x21f   :  { %v428_v55 = vmul.f32 %v1173_v48, %v426_v25  ;;  %vm414_vm10 = vmor %vm412_vm9, %vm413_vm8  ;;  %vm433_vm12 = vweird.f32 %v1173_v48  ;;  %v1790_v25 = vld [vmem:[#allocation3 + $0x168] sm:$0xff] }
 0x220   :  { %v409_v57 = vsub.f32 1.0, %v408_v60  ;;  %vm434_vm14 = vmor %vm432_vm13, %vm433_vm12  ;;  %v1807_v60 = vld [vmem:[#allocation3 + $0x140] sm:$0xff] }
 0x221   :  { %v429_v41 = vsub.f32 1.0, %v428_v55  ;;  %v1828_v55 = vld [vmem:[#allocation3 + $0xf8] sm:$0xff] }
 0x222   :  { %v410_v61 = vmul.f32 %v1171_v45, %v409_v57  ;;  %v1814_v57 = vld [vmem:[#allocation3 + $0x128] sm:$0xff] }
 0x223   :  { %v430_v52 = vmul.f32 %v1173_v48, %v429_v41 }
 0x224   :  { %v411_v63 = vadd.f32 %v1171_v45, %v410_v61  ;;  %v1835_v61 = vld [vmem:[#allocation3 + $0xe0] sm:$0xff] }
 0x225   :  { %v431_v53 = vadd.f32 %v1173_v48, %v430_v52 }
 0x226   :  { %v415_v46 = vsel %vm414_vm10, %v1171_v45, %v411_v63  ;;  %v1793_v45 = vld [vmem:[#allocation3 + $0x170] sm:$0xff]  ;;  %v1856_v63 = vld [vmem:[#allocation3 + $0x98] sm:$0xff] }
 0x227   :  { %v420_v30 = vsel %vm417_vm11, %v419_v26, %v415_v46  ;;  %v435_v9 = vsel %vm434_vm14, %v1173_v48, %v431_v53  ;;  %v1800_v48 = vld [vmem:[#allocation3 + $0x158] sm:$0xff] }
 0x228   :  { %v443_v58 = vmul.f32 %v442_v42, %v420_v30  ;;  %v440_v15 = vsel %vm437_vm15, %v439_v11, %v435_v9  ;;  %v1106_v53 = vld [vmem:[%s2069_s0 + $0x58] sm:$0xff] }
 0x22a   :  { %v444_v43 = vadd.f32 %v1100_v50, %v443_v58 }
 0x22c   :  { %1174 = vtanh.f32 %v444_v43 }
 0x232   :  { %v1175_v10 = vpop.eup %1174 }
 0x233   :  { %v446_v14 = vsub.f32 %v1713_v38, %v1175_v10 }
 0x235   :  { %v447_v18 = vmul.f32 %v446_v14, %v440_v15 }
 0x237   :  { %v448_v21 = vadd.f32 %v1175_v10, %v447_v18 }
 0x239   :  { %v1781_v22 = vsel %vm456_vm0, %v448_v21, %v1713_v38  ;;  %v458_v23 = vsel %vm456_vm0, %v448_v21, 0.0  ;;  %v1797_v38 = vld [vmem:[#allocation3 + $0x150] sm:$0xff] }
 0x23a   :  { %1103 = vst [vmem:[%s2073_s4 + $0x10] sm:$0xff] %v458_v23  ;;  %481 = vmatmul.f32.vlgmr.msra.gmra.mxu1 %v1781_v22  ;;  %501 = vmatmul.f32.vlgmr.msra.gmra.mxu2 %v1781_v22 }
 0x23b   :  { %521 = vmatmul.f32.vlgmr.msra.gmra.mxu3 %v1781_v22  ;;  %751 = vmatpush.msra.mxu1 %v1375_v12  ;;  %v1804_v12 = vld [vmem:[#allocation3 + $0x138] sm:$0xff] }
 0x23c   :  { %834 = vmatpush.msra.mxu2 %v1790_v25  ;;  %854 = vmatpush.msra.mxu3 %v1793_v45 }
 0x23d   :  { %752 = vmatpush.msra.mxu1 %v1380_v13  ;;  %v1811_v13 = vld [vmem:[#allocation3 + $0x120] sm:$0xff] }
 0x23e   :  { %835 = vmatpush.msra.mxu2 %v1797_v38  ;;  %855 = vmatpush.msra.mxu3 %v1800_v48 }
 0x23f   :  { %753 = vmatpush.msra.mxu1 %v1390_v16  ;;  %v1818_v16 = vld [vmem:[#allocation3 + $0x108] sm:$0xff] }
 0x240   :  { %836 = vmatpush.msra.mxu2 %v1804_v12  ;;  %856 = vmatpush.msra.mxu3 %v1807_v60 }
 0x241   :  { %754 = vmatpush.msra.mxu1 %v1400_v20  ;;  %v1825_v20 = vld [vmem:[#allocation3 + $0xf0] sm:$0xff] }
 0x242   :  { %837 = vmatpush.msra.mxu2 %v1811_v13  ;;  %857 = vmatpush.msra.mxu3 %v1814_v57 }
 0x243   :  { %755 = vmatpush.msra.mxu1 %v1412_v24  ;;  %v1832_v24 = vld [vmem:[#allocation3 + $0xd8] sm:$0xff] }
 0x244   :  { %838 = vmatpush.msra.mxu2 %v1818_v16  ;;  %858 = vmatpush.msra.mxu3 %v1821_v54 }
 0x245   :  { %756 = vmatpush.msra.mxu1 %v1425_v27  ;;  %v1839_v27 = vld [vmem:[#allocation3 + $0xc0] sm:$0xff] }
 0x246   :  { %839 = vmatpush.msra.mxu2 %v1825_v20  ;;  %859 = vmatpush.msra.mxu3 %v1828_v55 }
 0x247   :  { %757 = vmatpush.msra.mxu1 %v1437_v31  ;;  %v1846_v31 = vld [vmem:[#allocation3 + $0xa8] sm:$0xff] }
 0x248   :  { %840 = vmatpush.msra.mxu2 %v1832_v24  ;;  %860 = vmatpush.msra.mxu3 %v1835_v61 }
 0x249   :  { %758 = vmatpush.msra.mxu1 %v1446_v34  ;;  %v1853_v34 = vld [vmem:[#allocation3 + $0x90] sm:$0xff] }
 0x24a   :  { %841 = vmatpush.msra.mxu2 %v1839_v27  ;;  %861 = vmatpush.msra.mxu3 %v1842_v19 }
 0x24b   :  { %759 = vmatpush.msra.mxu1 %v1457_v37 }
 0x24c   :  { %842 = vmatpush.msra.mxu2 %v1846_v31  ;;  %862 = vmatpush.msra.mxu3 %v1849_v56 }
 0x24d   :  { %760 = vmatpush.msra.mxu1 %v1467_v40 }
 0x24e   :  { %843 = vmatpush.msra.mxu2 %v1853_v34  ;;  %863 = vmatpush.msra.mxu3 %v1856_v63 }
 0x24f   :  { %761 = vmatpush.msra.mxu1 %v1478_v44 }
 0x250   :  { %844 = vmatpush.msra.mxu2 %v1428_v28  ;;  %864 = vmatpush.msra.mxu3 %v1430_v29  ;;  %v1104_v28 = vld [vmem:[%s2069_s0 + $0x48] sm:$0xff] }
 0x251   :  { %762 = vmatpush.msra.mxu1 %v1488_v47 }
 0x252   :  { %845 = vmatpush.msra.mxu2 %v1439_v32  ;;  %865 = vmatpush.msra.mxu3 %v1441_v33 }
 0x253   :  { %763 = vmatpush.msra.mxu1 %v1494_v49 }
 0x254   :  { %846 = vmatpush.msra.mxu2 %v1448_v35  ;;  %866 = vmatpush.msra.mxu3 %v1450_v36  ;;  %v1105_v35 = vld [vmem:[%s2069_s0 + $0x50] sm:$0xff] }
 0x255   :  { %764 = vmatpush.msra.mxu1 %v1499_v51 }
 0x256   :  { %847 = vmatpush.msra.mxu2 %v2115_v0  ;;  %867 = vmatpush.msra.mxu3 %v2116_v1  ;;  %v1246_v0 = vld [vmem:[%s2070_s1] sm:$0xff] }
 0x257   :  { %765 = vmatpush.msra.mxu1 %v2117_v2  ;;  %vm697_vm1 = vcmp.gt.s32.totalorder %v1246_v0, 4  ;;  %vm820_vm2 = vcmp.gt.s32.totalorder %v1246_v0, 5  ;;  %v1110_v0 = vld [vmem:[%s2069_s0 + $0x60] sm:$0xff] }
 0x258   :  { %848 = vmatpush.msra.mxu2 %v2118_v3  ;;  %868 = vmatpush.msra.mxu3 %v2119_v4  ;;  %v698_v1 = vsel %vm697_vm1, 1, %v2113_v59  ;;  %v821_v26 = vsel %vm820_vm2, 1, %v2113_v59 }
 0x259   :  { %766 = vmatpush.msra.mxu1 %v2120_v5  ;;  %700 = vperm.xlu2 %1144, %v698_v1   ;;  %v1111_v1 = vld [vmem:[%s2069_s0 + $0x68] sm:$0xff] }
 0x25a   :  { %849 = vmatpush.msra.mxu2 %v2121_v6  ;;  %869 = vmatpush.msra.mxu3 %v2122_v7 }
 0x261   :  { %823 = vperm.xlu2 %1144, %v821_v26  }
 0x2b7   :  { %v482_v29 = vpop.f32.mrf.mxu1 }
 0x2b8   :  { %v525_v32 = vadd.f32 %v1104_v28, %v482_v29  ;;  %v578_v29 = vpop.permute.xlu1 %577 }
 0x2b9   :  { %vm579_vm11 = vcmp.eq.s32.totalorder %v578_v29, 1 }
 0x2ba   :  { %v1107_v33 = vmul.f32 -1.442695, %v525_v32 }
 0x2bc   :  { %1176 = vpow2.f32 %v1107_v33 }
 0x2bd   :  { %v502_v36 = vpop.f32.mrf.mxu2 }
 0x2be   :  { %v545_v37 = vadd.f32 %v1105_v35, %v502_v36  ;;  %v522_v42 = vpop.f32.mrf.mxu3  ;;  %v1902_v36 = vld [vmem:[#allocation3 + $0x178] sm:$0xff] }
 0x2bf   :  { %v565_v43 = vadd.f32 %v2114_v62, %v522_v42 }
 0x2c0   :  { %v1108_v40 = vmul.f32 -1.442695, %v545_v37  ;;  %v1912_v37 = vld [vmem:[#allocation3 + $0x148] sm:$0xff] }
 0x2c2   :  { %v1177_v44 = vpop.eup %1176  ;;  %1178 = vpow2.f32 %v1108_v40  ;;  %v1917_v40 = vld [vmem:[#allocation3 + $0x130] sm:$0xff] }
 0x2c3   :  { %v529_v47 = vadd.f32 1.0, %v1177_v44  ;;  %v1271_v44 = vld [vmem:[#allocation3 + $0x20] sm:$0xff] }
 0x2c5   :  { %1180 = vrcp.f32 %v529_v47  ;;  %v541_v5 = vand.u32 2147483648, %v529_v47  ;;  %v539_v7 = vand.u32 2147483647, %v529_v47  ;;  %vm535_vm4 = vweird.f32 %v529_v47 }
 0x2c7   :  { %v542_v30 = vor.u32 1.1754944e-38, %v541_v5  ;;  %vm540_vm6 = vcmp.eq.f32.partialorder %v539_v7, 8.507059e+37 }
 0x2c8   :  { %v1179_v49 = vpop.eup %1178 }
 0x2c9   :  { %v549_v51 = vadd.f32 1.0, %v1179_v49  ;;  %v1273_v49 = vld [vmem:[#allocation3] sm:$0xff] }
 0x2cb   :  { %v1181_v2 = vpop.eup %1180  ;;  %1182 = vrcp.f32 %v549_v51  ;;  %v561_v11 = vand.u32 2147483648, %v549_v51  ;;  %vm555_vm8 = vweird.f32 %v549_v51  ;;  %v559_v14 = vand.u32 2147483647, %v549_v51 }
 0x2cc   :  { %v531_v3 = vmul.f32 %v1181_v2, %v529_v47  ;;  %vm536_vm3 = vweird.f32 %v1181_v2  ;;  %v1967_v47 = vld [vmem:[#allocation3 + $0x10] sm:$0xff] }
 0x2cd   :  { %vm537_vm5 = vmor %vm535_vm4, %vm536_vm3  ;;  %v562_v18 = vor.u32 1.1754944e-38, %v561_v11  ;;  %vm560_vm10 = vcmp.eq.f32.partialorder %v559_v14, 8.507059e+37 }
 0x2ce   :  { %v532_v4 = vsub.f32 1.0, %v531_v3 }
 0x2d0   :  { %v533_v6 = vmul.f32 %v1181_v2, %v532_v4 }
 0x2d1   :  { %v1183_v41 = vpop.eup %1182 }
 0x2d2   :  { %v551_v46 = vmul.f32 %v1183_v41, %v549_v51  ;;  %v534_v50 = vadd.f32 %v1181_v2, %v533_v6  ;;  %vm556_vm7 = vweird.f32 %v1183_v41  ;;  %v1274_v51 = vld [vmem:[#allocation3 + $0x8] sm:$0xff] }
 0x2d3   :  { %vm557_vm9 = vmor %vm555_vm8, %vm556_vm7 }
 0x2d4   :  { %v552_v58 = vsub.f32 1.0, %v551_v46  ;;  %v538_v52 = vsel %vm537_vm5, %v1181_v2, %v534_v50 }
 0x2d5   :  { %v543_v39 = vsel %vm540_vm6, %v542_v30, %v538_v52 }
 0x2d6   :  { %v566_v8 = vmul.f32 %v565_v43, %v543_v39  ;;  %v553_v59 = vmul.f32 %v1183_v41, %v552_v58 }
 0x2d8   :  { %v567_v9 = vadd.f32 %v1106_v53, %v566_v8  ;;  %v554_v10 = vadd.f32 %v1183_v41, %v553_v59 }
 0x2da   :  { %1184 = vtanh.f32 %v567_v9  ;;  %v558_v15 = vsel %vm557_vm9, %v1183_v41, %v554_v10 }
 0x2db   :  { %v563_v23 = vsel %vm560_vm10, %v562_v18, %v558_v15 }
 0x2e0   :  { %v1185_v17 = vpop.eup %1184 }
 0x2e1   :  { %v569_v21 = vsub.f32 %v1781_v22, %v1185_v17 }
 0x2e3   :  { %v570_v28 = vmul.f32 %v569_v21, %v563_v23 }
 0x2e5   :  { %v571_v32 = vadd.f32 %v1185_v17, %v570_v28  ;;  %v1112_v17 = vld [vmem:[%s2069_s0 + $0x70] sm:$0xff] }
 0x2e7   :  { %v1894_v33 = vsel %vm579_vm11, %v571_v32, %v1781_v22  ;;  %v581_v35 = vsel %vm579_vm11, %v571_v32, 0.0  ;;  %v1907_v22 = vld [vmem:[#allocation3 + $0x160] sm:$0xff] }
 0x2e8   :  { %1109 = vst [vmem:[%s2073_s4 + $0x18] sm:$0xff] %v581_v35  ;;  %604 = vmatmul.f32.vlgmr.msrb.gmra.mxu0 %v1894_v33  ;;  %624 = vmatmul.f32.vlgmr.msrb.gmra.mxu1 %v1894_v33 }
 0x2e9   :  { %644 = vmatmul.f32.vlgmr.msrb.gmra.mxu2 %v1894_v33  ;;  %874 = vmatpush.msrb.mxu0 %v1902_v36 }
 0x2ea   :  { %957 = vmatpush.msrb.mxu1 %v1790_v25  ;;  %977 = vmatpush.msrb.mxu2 %v1793_v45  ;;  %v1922_v25 = vld [vmem:[#allocation3 + $0x118] sm:$0xff]  ;;  %v1927_v45 = vld [vmem:[#allocation3 + $0x100] sm:$0xff] }
 0x2eb   :  { %875 = vmatpush.msrb.mxu0 %v1907_v22 }
 0x2ec   :  { %958 = vmatpush.msrb.mxu1 %v1797_v38  ;;  %978 = vmatpush.msrb.mxu2 %v1800_v48  ;;  %v1932_v38 = vld [vmem:[#allocation3 + $0xe8] sm:$0xff]  ;;  %v1937_v48 = vld [vmem:[#allocation3 + $0xd0] sm:$0xff] }
 0x2ed   :  { %876 = vmatpush.msrb.mxu0 %v1912_v37 }
 0x2ee   :  { %959 = vmatpush.msrb.mxu1 %v1804_v12  ;;  %979 = vmatpush.msrb.mxu2 %v1807_v60  ;;  %v1942_v12 = vld [vmem:[#allocation3 + $0xb8] sm:$0xff]  ;;  %v1947_v60 = vld [vmem:[#allocation3 + $0xa0] sm:$0xff] }
 0x2ef   :  { %877 = vmatpush.msrb.mxu0 %v1917_v40 }
 0x2f0   :  { %960 = vmatpush.msrb.mxu1 %v1811_v13  ;;  %980 = vmatpush.msrb.mxu2 %v1814_v57  ;;  %v1952_v13 = vld [vmem:[#allocation3 + $0x88] sm:$0xff]  ;;  %v1258_v57 = vld [vmem:[#allocation3 + $0x78] sm:$0xff] }
 0x2f1   :  { %878 = vmatpush.msrb.mxu0 %v1922_v25 }
 0x2f2   :  { %961 = vmatpush.msrb.mxu1 %v1818_v16  ;;  %981 = vmatpush.msrb.mxu2 %v1821_v54  ;;  %v1259_v16 = vld [vmem:[#allocation3 + $0x80] sm:$0xff]  ;;  %v1955_v54 = vld [vmem:[#allocation3 + $0x70] sm:$0xff] }
 0x2f3   :  { %879 = vmatpush.msrb.mxu0 %v1927_v45 }
 0x2f4   :  { %962 = vmatpush.msrb.mxu1 %v1825_v20  ;;  %982 = vmatpush.msrb.mxu2 %v1828_v55  ;;  %v1261_v20 = vld [vmem:[#allocation3 + $0x60] sm:$0xff]  ;;  %v1262_v55 = vld [vmem:[#allocation3 + $0x68] sm:$0xff] }
 0x2f5   :  { %880 = vmatpush.msrb.mxu0 %v1932_v38 }
 0x2f6   :  { %963 = vmatpush.msrb.mxu1 %v1832_v24  ;;  %983 = vmatpush.msrb.mxu2 %v1835_v61  ;;  %v1958_v24 = vld [vmem:[#allocation3 + $0x58] sm:$0xff]  ;;  %v1264_v61 = vld [vmem:[#allocation3 + $0x48] sm:$0xff] }
 0x2f7   :  { %881 = vmatpush.msrb.mxu0 %v1937_v48 }
 0x2f8   :  { %964 = vmatpush.msrb.mxu1 %v1839_v27  ;;  %984 = vmatpush.msrb.mxu2 %v1842_v19  ;;  %v1265_v27 = vld [vmem:[#allocation3 + $0x50] sm:$0xff]  ;;  %v1961_v19 = vld [vmem:[#allocation3 + $0x40] sm:$0xff] }
 0x2f9   :  { %882 = vmatpush.msrb.mxu0 %v1942_v12 }
 0x2fa   :  { %965 = vmatpush.msrb.mxu1 %v1846_v31  ;;  %985 = vmatpush.msrb.mxu2 %v1849_v56  ;;  %v1267_v31 = vld [vmem:[#allocation3 + $0x30] sm:$0xff]  ;;  %v1268_v56 = vld [vmem:[#allocation3 + $0x38] sm:$0xff] }
 0x2fb   :  { %883 = vmatpush.msrb.mxu0 %v1947_v60 }
 0x2fc   :  { %966 = vmatpush.msrb.mxu1 %v1853_v34  ;;  %986 = vmatpush.msrb.mxu2 %v1856_v63  ;;  %v1964_v34 = vld [vmem:[#allocation3 + $0x28] sm:$0xff]  ;;  %v1270_v63 = vld [vmem:[#allocation3 + $0x18] sm:$0xff] }
 0x2fd   :  { %884 = vmatpush.msrb.mxu0 %v1952_v13 }
 0x2fe   :  { %967 = vmatpush.msrb.mxu1 %v1258_v57  ;;  %987 = vmatpush.msrb.mxu2 %v1259_v16 }
 0x2ff   :  { %885 = vmatpush.msrb.mxu0 %v1955_v54 }
 0x300   :  { %968 = vmatpush.msrb.mxu1 %v1261_v20  ;;  %988 = vmatpush.msrb.mxu2 %v1262_v55 }
 0x301   :  { %886 = vmatpush.msrb.mxu0 %v1958_v24 }
 0x302   :  { %969 = vmatpush.msrb.mxu1 %v1264_v61  ;;  %989 = vmatpush.msrb.mxu2 %v1265_v27  ;;  %v701_v61 = vpop.permute.xlu2 %700 }
 0x303   :  { %887 = vmatpush.msrb.mxu0 %v1961_v19  ;;  %vm702_vm4 = vcmp.eq.s32.totalorder %v701_v61, 1 }
 0x304   :  { %970 = vmatpush.msrb.mxu1 %v1267_v31  ;;  %990 = vmatpush.msrb.mxu2 %v1268_v56 }
 0x305   :  { %888 = vmatpush.msrb.mxu0 %v1964_v34 }
 0x306   :  { %971 = vmatpush.msrb.mxu1 %v1270_v63  ;;  %991 = vmatpush.msrb.mxu2 %v1271_v44 }
 0x307   :  { %889 = vmatpush.msrb.mxu0 %v1967_v47 }
 0x308   :  { %972 = vmatpush.msrb.mxu1 %v1273_v49  ;;  %992 = vmatpush.msrb.mxu2 %v1274_v51 }
 0x365   :  { %v605_v2 = vpop.f32.mrf.mxu0  ;;  %v625_v3 = vpop.f32.mrf.mxu1 }
 0x366   :  { %v648_v4 = vadd.f32 %v1110_v0, %v605_v2  ;;  %v668_v5 = vadd.f32 %v1111_v1, %v625_v3 }
 0x368   :  { %v1113_v6 = vmul.f32 -1.442695, %v648_v4  ;;  %v1114_v7 = vmul.f32 -1.442695, %v668_v5  ;;  %v2015_v4 = vld [vmem:[%s2072_s3] ss:$0 sm:$0xff] }
 0x36a   :  { %1186 = vpow2.f32 %v1113_v6 }
 0x36b   :  { %1188 = vpow2.f32 %v1114_v7 }
 0x36c   :  { %v645_v59 = vpop.f32.mrf.mxu2 }
 0x36d   :  { %v688_v15 = vadd.f32 %v2114_v62, %v645_v59  ;;  %v824_v59 = vpop.permute.xlu2 %823 }
 0x370   :  { %v1187_v26 = vpop.eup %1186 }
 0x371   :  { %v1189_v41 = vpop.eup %1188  ;;  %v652_v42 = vadd.f32 1.0, %v1187_v26  ;;  %v1118_v26 = vld [vmem:[%s2069_s0 + $0x88] sm:$0xff] }
 0x372   :  { %v672_v46 = vadd.f32 1.0, %v1189_v41 }
 0x373   :  { %1190 = vrcp.f32 %v652_v42  ;;  %v664_v53 = vand.u32 2147483648, %v652_v42  ;;  %v662_v8 = vand.u32 2147483647, %v652_v42  ;;  %vm658_vm13 = vweird.f32 %v652_v42 }
 0x374   :  { %1192 = vrcp.f32 %v672_v46  ;;  %v684_v32 = vand.u32 2147483648, %v672_v46  ;;  %vm678_vm1 = vweird.f32 %v672_v46  ;;  %v682_v35 = vand.u32 2147483647, %v672_v46 }
 0x375   :  { %v665_v11 = vor.u32 1.1754944e-38, %v664_v53  ;;  %vm663_vm15 = vcmp.eq.f32.partialorder %v662_v8, 8.507059e+37 }
 0x376   :  { %v685_v20 = vor.u32 1.1754944e-38, %v684_v32  ;;  %vm683_vm3 = vcmp.eq.f32.partialorder %v682_v35, 8.507059e+37 }
 0x379   :  { %v1191_v50 = vpop.eup %1190 }
 0x37a   :  { %v1193_v30 = vpop.eup %1192  ;;  %v654_v58 = vmul.f32 %v1191_v50, %v652_v42  ;;  %vm659_vm12 = vweird.f32 %v1191_v50 }
 0x37b   :  { %v674_v43 = vmul.f32 %v1193_v30, %v672_v46  ;;  %vm660_vm14 = vmor %vm658_vm13, %vm659_vm12  ;;  %vm679_vm0 = vweird.f32 %v1193_v30  ;;  %vm825_vm13 = vcmp.eq.s32.totalorder %v824_v59, 1 }
 0x37c   :  { %v655_v52 = vsub.f32 1.0, %v654_v58  ;;  %vm680_vm2 = vmor %vm678_vm1, %vm679_vm0 }
 0x37d   :  { %v675_v10 = vsub.f32 1.0, %v674_v43 }
 0x37e   :  { %v656_v39 = vmul.f32 %v1191_v50, %v655_v52 }
 0x37f   :  { %v676_v23 = vmul.f32 %v1193_v30, %v675_v10 }
 0x380   :  { %v657_v9 = vadd.f32 %v1191_v50, %v656_v39 }
 0x381   :  { %v677_v29 = vadd.f32 %v1193_v30, %v676_v23 }
 0x382   :  { %v661_v14 = vsel %vm660_vm14, %v1191_v50, %v657_v9 }
 0x383   :  { %v666_v18 = vsel %vm663_vm15, %v665_v11, %v661_v14  ;;  %v681_v57 = vsel %vm680_vm2, %v1193_v30, %v677_v29 }
 0x384   :  { %v689_v21 = vmul.f32 %v688_v15, %v666_v18  ;;  %v686_v55 = vsel %vm683_vm3, %v685_v20, %v681_v57  ;;  %v1122_v15 = vld [vmem:[%s2069_s0 + $0x90] sm:$0xff] }
 0x386   :  { %v690_v28 = vadd.f32 %v1112_v17, %v689_v21  ;;  %v1123_v17 = vld [vmem:[%s2069_s0 + $0x98] sm:$0xff] }
 0x388   :  { %1194 = vtanh.f32 %v690_v28 }
 0x38e   :  { %v1195_v16 = vpop.eup %1194 }
 0x38f   :  { %v692_v62 = vsub.f32 %v1894_v33, %v1195_v16 }
 0x391   :  { %v693_v27 = vmul.f32 %v692_v62, %v686_v55 }
 0x393   :  { %v694_v31 = vadd.f32 %v1195_v16, %v693_v27 }
 0x395   :  { %v1982_v56 = vsel %vm702_vm4, %v694_v31, %v1894_v33  ;;  %v704_v63 = vsel %vm702_vm4, %v694_v31, 0.0  ;;  %v1117_v33 = vld [vmem:[%s2069_s0 + $0x80] sm:$0xff] }
 0x396   :  { %1115 = vst [vmem:[%s2073_s4 + $0x20] sm:$0xff] %v704_v63  ;;  %727 = vmatmul.f32.vlgmr.msrb.gmra.mxu3 %v1982_v56  ;;  %747 = vmatmul.f32.vlgmr.msra.gmra.mxu0 %v1982_v56 }
 0x397   :  { %767 = vmatmul.f32.vlgmr.msra.gmra.mxu1 %v1982_v56  ;;  %997 = vmatpush.msrb.mxu3 %v1902_v36 }
 0x399   :  { %998 = vmatpush.msrb.mxu3 %v1907_v22 }
 0x39b   :  { %999 = vmatpush.msrb.mxu3 %v1912_v37 }
 0x39d   :  { %1000 = vmatpush.msrb.mxu3 %v1917_v40  ;;  %v1116_v40 = vld [vmem:[%s2069_s0 + $0x78] sm:$0xff] }
 0x39f   :  { %1001 = vmatpush.msrb.mxu3 %v1922_v25 }
 0x3a1   :  { %1002 = vmatpush.msrb.mxu3 %v1927_v45 }
 0x3a3   :  { %1003 = vmatpush.msrb.mxu3 %v1932_v38 }
 0x3a5   :  { %1004 = vmatpush.msrb.mxu3 %v1937_v48 }
 0x3a7   :  { %1005 = vmatpush.msrb.mxu3 %v1942_v12 }
 0x3a9   :  { %1006 = vmatpush.msrb.mxu3 %v1947_v60 }
 0x3ab   :  { %1007 = vmatpush.msrb.mxu3 %v1952_v13 }
 0x3ad   :  { %1008 = vmatpush.msrb.mxu3 %v1955_v54 }
 0x3af   :  { %1009 = vmatpush.msrb.mxu3 %v1958_v24 }
 0x3b1   :  { %1010 = vmatpush.msrb.mxu3 %v1961_v19 }
 0x3b3   :  { %1011 = vmatpush.msrb.mxu3 %v1964_v34 }
 0x3b5   :  { %1012 = vmatpush.msrb.mxu3 %v1967_v47 }
 0x413   :  { %v748_v36 = vpop.f32.mrf.mxu0 }
 0x414   :  { %v791_v22 = vadd.f32 %v1117_v33, %v748_v36  ;;  %v768_v0 = vpop.f32.mrf.mxu1 }
 0x415   :  { %v811_v5 = vadd.f32 %v2015_v4, %v768_v0  ;;  %v947_v0 = vpop.permute.xlu0 %946 }
 0x416   :  { %v1120_v37 = vmul.f32 -1.442695, %v791_v22 }
 0x418   :  { %1196 = vpow2.f32 %v1120_v37 }
 0x419   :  { %v728_v25 = vpop.f32.mrf.mxu3 }
 0x41a   :  { %v771_v45 = vadd.f32 %v1116_v40, %v728_v25 }
 0x41c   :  { %v1119_v38 = vmul.f32 -1.442695, %v771_v45 }
 0x41e   :  { %1198 = vpow2.f32 %v1119_v38  ;;  %v1197_v48 = vpop.eup %1196 }
 0x41f   :  { %v795_v60 = vadd.f32 1.0, %v1197_v48  ;;  %v1124_v48 = vld [vmem:[%s2069_s0 + $0xa0] sm:$0xff] }
 0x421   :  { %v807_v30 = vand.u32 2147483648, %v795_v60  ;;  %vm801_vm10 = vweird.f32 %v795_v60  ;;  %v805_v58 = vand.u32 2147483647, %v795_v60 }
 0x423   :  { %v808_v53 = vor.u32 1.1754944e-38, %v807_v30  ;;  %vm806_vm12 = vcmp.eq.f32.partialorder %v805_v58, 8.507059e+37 }
 0x424   :  { %v1199_v12 = vpop.eup %1198 }
 0x425   :  { %v775_v13 = vadd.f32 1.0, %v1199_v12 }
 0x427   :  { %1200 = vrcp.f32 %v775_v13  ;;  %v787_v47 = vand.u32 2147483648, %v775_v13  ;;  %v785_v51 = vand.u32 2147483647, %v775_v13  ;;  %vm781_vm6 = vweird.f32 %v775_v13 }
 0x428   :  { %1202 = vrcp.f32 %v795_v60 }
 0x429   :  { %v788_v3 = vor.u32 1.1754944e-38, %v787_v47  ;;  %vm786_vm8 = vcmp.eq.f32.partialorder %v785_v51, 8.507059e+37 }
 0x42d   :  { %v1201_v54 = vpop.eup %1200 }
 0x42e   :  { %v1203_v24 = vpop.eup %1202  ;;  %v777_v19 = vmul.f32 %v1201_v54, %v775_v13  ;;  %vm782_vm5 = vweird.f32 %v1201_v54 }
 0x42f   :  { %v797_v44 = vmul.f32 %v1203_v24, %v795_v60  ;;  %vm783_vm7 = vmor %vm781_vm6, %vm782_vm5  ;;  %vm802_vm9 = vweird.f32 %v1203_v24  ;;  %vm948_vm6 = vcmp.eq.s32.totalorder %v947_v0, 1 }
 0x430   :  { %v778_v34 = vsub.f32 1.0, %v777_v19  ;;  %vm803_vm11 = vmor %vm801_vm10, %vm802_vm9 }
 0x431   :  { %v798_v2 = vsub.f32 1.0, %v797_v44 }
 0x432   :  { %v779_v49 = vmul.f32 %v1201_v54, %v778_v34 }
 0x433   :  { %v799_v42 = vmul.f32 %v1203_v24, %v798_v2 }
 0x434   :  { %v780_v1 = vadd.f32 %v1201_v54, %v779_v49 }
 0x435   :  { %v800_v50 = vadd.f32 %v1203_v24, %v799_v42  ;;  %v1129_v42 = vld [vmem:[%s2069_s0 + $0xb0] sm:$0xff] }
 0x436   :  { %v784_v6 = vsel %vm783_vm7, %v1201_v54, %v780_v1 }
 0x437   :  { %v789_v7 = vsel %vm786_vm8, %v788_v3, %v784_v6  ;;  %v804_v52 = vsel %vm803_vm11, %v1203_v24, %v800_v50  ;;  %v1128_v6 = vld [vmem:[%s2069_s0 + $0xa8] sm:$0xff] }
 0x438   :  { %v812_v41 = vmul.f32 %v811_v5, %v789_v7  ;;  %v809_v8 = vsel %vm806_vm12, %v808_v53, %v804_v52 }
 0x43a   :  { %v813_v46 = vadd.f32 %v1118_v26, %v812_v41 }
 0x43c   :  { %1204 = vtanh.f32 %v813_v46 }
 0x442   :  { %v1205_v43 = vpop.eup %1204 }
 0x443   :  { %v815_v39 = vsub.f32 %v1982_v56, %v1205_v43 }
 0x445   :  { %v816_v9 = vmul.f32 %v815_v39, %v809_v8 }
 0x447   :  { %v817_v10 = vadd.f32 %v1205_v43, %v816_v9 }
 0x449   :  { %v2023_v11 = vsel %vm825_vm13, %v817_v10, %v1982_v56  ;;  %v827_v14 = vsel %vm825_vm13, %v817_v10, 0.0 }
 0x44a   :  { %1121 = vst [vmem:[%s2073_s4 + $0x28] sm:$0xff] %v827_v14  ;;  %850 = vmatmul.f32.vlgmr.msra.gmra.mxu2 %v2023_v11  ;;  %870 = vmatmul.f32.vlgmr.msra.gmra.mxu3 %v2023_v11 }
 0x44b   :  { %890 = vmatmul.f32.vlgmr.msrb.gmra.mxu0 %v2023_v11 }
 0x4c8   :  { %v891_v36 = vpop.f32.mrf.mxu0 }
 0x4c9   :  { %v934_v25 = vadd.f32 %v2015_v4, %v891_v36 }
 0x4cd   :  { %v851_v18 = vpop.f32.mrf.mxu2  ;;  %v871_v21 = vpop.f32.mrf.mxu3 }
 0x4ce   :  { %v894_v23 = vadd.f32 %v1122_v15, %v851_v18  ;;  %v914_v28 = vadd.f32 %v1123_v17, %v871_v21 }
 0x4d0   :  { %v1125_v29 = vmul.f32 -1.442695, %v894_v23  ;;  %v1126_v32 = vmul.f32 -1.442695, %v914_v28 }
 0x4d2   :  { %1206 = vpow2.f32 %v1125_v29 }
 0x4d3   :  { %1208 = vpow2.f32 %v1126_v32  ;;  %v1130_v32 = vld [vmem:[%s2069_s0 + $0xb8] sm:$0xff] }
 0x4d8   :  { %v1207_v35 = vpop.eup %1206 }
 0x4d9   :  { %v1209_v57 = vpop.eup %1208  ;;  %v898_v16 = vadd.f32 1.0, %v1207_v35 }
 0x4da   :  { %v918_v20 = vadd.f32 1.0, %v1209_v57 }
 0x4db   :  { %1210 = vrcp.f32 %v898_v16  ;;  %v910_v31 = vand.u32 2147483648, %v898_v16  ;;  %v908_v33 = vand.u32 2147483647, %v898_v16  ;;  %vm904_vm15 = vweird.f32 %v898_v16 }
 0x4dc   :  { %1212 = vrcp.f32 %v918_v20  ;;  %v930_v24 = vand.u32 2147483648, %v918_v20  ;;  %vm924_vm3 = vweird.f32 %v918_v20  ;;  %v928_v19 = vand.u32 2147483647, %v918_v20 }
 0x4dd   :  { %v911_v37 = vor.u32 1.1754944e-38, %v910_v31  ;;  %vm909_vm1 = vcmp.eq.f32.partialorder %v908_v33, 8.507059e+37  ;;  %v1070_v33 = vpop.permute.xlu1 %1069 }
 0x4de   :  { %v931_v47 = vor.u32 1.1754944e-38, %v930_v24  ;;  %vm929_vm5 = vcmp.eq.f32.partialorder %v928_v19, 8.507059e+37 }
 0x4e1   :  { %v1211_v62 = vpop.eup %1210 }
 0x4e2   :  { %v1213_v55 = vpop.eup %1212  ;;  %v900_v61 = vmul.f32 %v1211_v62, %v898_v16  ;;  %vm905_vm14 = vweird.f32 %v1211_v62 }
 0x4e3   :  { %v920_v56 = vmul.f32 %v1213_v55, %v918_v20  ;;  %vm906_vm0 = vmor %vm904_vm15, %vm905_vm14  ;;  %vm925_vm2 = vweird.f32 %v1213_v55  ;;  %vm1071_vm15 = vcmp.eq.s32.totalorder %v1070_v33, 1 }
 0x4e4   :  { %v901_v27 = vsub.f32 1.0, %v900_v61  ;;  %vm926_vm4 = vmor %vm924_vm3, %vm925_vm2 }
 0x4e5   :  { %v921_v40 = vsub.f32 1.0, %v920_v56 }
 0x4e6   :  { %v902_v63 = vmul.f32 %v1211_v62, %v901_v27 }
 0x4e7   :  { %v922_v60 = vmul.f32 %v1213_v55, %v921_v40 }
 0x4e8   :  { %v903_v22 = vadd.f32 %v1211_v62, %v902_v63 }
 0x4e9   :  { %v923_v54 = vadd.f32 %v1213_v55, %v922_v60 }
 0x4ea   :  { %v907_v45 = vsel %vm906_vm0, %v1211_v62, %v903_v22 }
 0x4eb   :  { %v912_v38 = vsel %vm909_vm1, %v911_v37, %v907_v45  ;;  %v927_v34 = vsel %vm926_vm4, %v1213_v55, %v923_v54 }
 0x4ec   :  { %v935_v12 = vmul.f32 %v934_v25, %v912_v38  ;;  %v932_v51 = vsel %vm929_vm5, %v931_v47, %v927_v34 }
 0x4ee   :  { %v936_v13 = vadd.f32 %v1124_v48, %v935_v12 }
 0x4f0   :  { %1214 = vtanh.f32 %v936_v13 }
 0x4f6   :  { %v1215_v44 = vpop.eup %1214 }
 0x4f7   :  { %v938_v49 = vsub.f32 %v2023_v11, %v1215_v44 }
 0x4f9   :  { %v939_v1 = vmul.f32 %v938_v49, %v932_v51 }
 0x4fb   :  { %v940_v2 = vadd.f32 %v1215_v44, %v939_v1 }
 0x4fd   :  { %v2043_v3 = vsel %vm948_vm6, %v940_v2, %v2023_v11  ;;  %v950_v5 = vsel %vm948_vm6, %v940_v2, 0.0 }
 0x4fe   :  { %1127 = vst [vmem:[%s2073_s4 + $0x30] sm:$0xff] %v950_v5  ;;  %973 = vmatmul.f32.vlgmr.msrb.gmra.mxu1 %v2043_v3  ;;  %993 = vmatmul.f32.vlgmr.msrb.gmra.mxu2 %v2043_v3 }
 0x4ff   :  { %1013 = vmatmul.f32.vlgmr.msrb.gmra.mxu3 %v2043_v3 }
 0x57b   :  { %v974_v7 = vpop.f32.mrf.mxu1 }
 0x57c   :  { %v1017_v26 = vadd.f32 %v1128_v6, %v974_v7 }
 0x57e   :  { %v1131_v41 = vmul.f32 -1.442695, %v1017_v26 }
 0x580   :  { %1216 = vpow2.f32 %v1131_v41 }
 0x581   :  { %v994_v46 = vpop.f32.mrf.mxu2 }
 0x582   :  { %v1037_v50 = vadd.f32 %v1129_v42, %v994_v46  ;;  %v1014_v15 = vpop.f32.mrf.mxu3 }
 0x583   :  { %v1057_v29 = vadd.f32 %v2015_v4, %v1014_v15 }
 0x584   :  { %v1132_v30 = vmul.f32 -1.442695, %v1037_v50 }
 0x586   :  { %v1217_v58 = vpop.eup %1216  ;;  %1218 = vpow2.f32 %v1132_v30 }
 0x587   :  { %v1021_v52 = vadd.f32 1.0, %v1217_v58 }
 0x589   :  { %1220 = vrcp.f32 %v1021_v52  ;;  %v1033_v9 = vand.u32 2147483648, %v1021_v52  ;;  %v1031_v11 = vand.u32 2147483647, %v1021_v52  ;;  %vm1027_vm8 = vweird.f32 %v1021_v52 }
 0x58b   :  { %v1034_v21 = vor.u32 1.1754944e-38, %v1033_v9  ;;  %vm1032_vm10 = vcmp.eq.f32.partialorder %v1031_v11, 8.507059e+37 }
 0x58c   :  { %v1219_v43 = vpop.eup %1218 }
 0x58d   :  { %v1041_v53 = vadd.f32 1.0, %v1219_v43 }
 0x58f   :  { %v1221_v39 = vpop.eup %1220  ;;  %1222 = vrcp.f32 %v1041_v53  ;;  %v1053_v55 = vand.u32 2147483648, %v1041_v53  ;;  %vm1047_vm12 = vweird.f32 %v1041_v53  ;;  %v1051_v61 = vand.u32 2147483647, %v1041_v53 }
 0x590   :  { %v1023_v8 = vmul.f32 %v1221_v39, %v1021_v52  ;;  %vm1028_vm7 = vweird.f32 %v1221_v39 }
 0x591   :  { %vm1029_vm9 = vmor %vm1027_vm8, %vm1028_vm7  ;;  %v1054_v56 = vor.u32 1.1754944e-38, %v1053_v55  ;;  %vm1052_vm14 = vcmp.eq.f32.partialorder %v1051_v61, 8.507059e+37 }
 0x592   :  { %v1024_v59 = vsub.f32 1.0, %v1023_v8 }
 0x594   :  { %v1025_v10 = vmul.f32 %v1221_v39, %v1024_v59 }
 0x595   :  { %v1223_v14 = vpop.eup %1222 }
 0x596   :  { %v1043_v17 = vmul.f32 %v1223_v14, %v1041_v53  ;;  %v1026_v18 = vadd.f32 %v1221_v39, %v1025_v10  ;;  %vm1048_vm11 = vweird.f32 %v1223_v14 }
 0x597   :  { %vm1049_vm13 = vmor %vm1047_vm12, %vm1048_vm11 }
 0x598   :  { %v1044_v23 = vsub.f32 1.0, %v1043_v17  ;;  %v1030_v28 = vsel %vm1029_vm9, %v1221_v39, %v1026_v18 }
 0x599   :  { %v1035_v35 = vsel %vm1032_vm10, %v1034_v21, %v1030_v28 }
 0x59a   :  { %v1058_v57 = vmul.f32 %v1057_v29, %v1035_v35  ;;  %v1045_v16 = vmul.f32 %v1223_v14, %v1044_v23 }
 0x59c   :  { %v1059_v20 = vadd.f32 %v1130_v32, %v1058_v57  ;;  %v1046_v62 = vadd.f32 %v1223_v14, %v1045_v16 }
 0x59e   :  { %1224 = vtanh.f32 %v1059_v20  ;;  %v1050_v27 = vsel %vm1049_vm13, %v1223_v14, %v1046_v62 }
 0x59f   :  { %v1055_v63 = vsel %vm1052_vm14, %v1054_v56, %v1050_v27 }
 0x5a4   :  { %v1225_v31 = vpop.eup %1224 }
 0x5a5   :  { %v1061_v4 = vsub.f32 %v2043_v3, %v1225_v31 }
 0x5a7   :  { %v1062_v36 = vmul.f32 %v1061_v4, %v1055_v63 }
 0x5a9   :  { %v1063_v22 = vadd.f32 %v1225_v31, %v1062_v36 }
 0x5ab   :  { %v1072_v37 = vsel %vm1071_vm15, %v1063_v22, %v2043_v3  ;;  %v1073_v40 = vsel %vm1071_vm15, %v1063_v22, 0.0 }
 0x5ac   :  { %1133 = vst [vmem:[%s2073_s4 + $0x38] sm:$0xff] %v1073_v40 }
 0x5ad   :  { %1080 = vst [vmem:[%s2074_s5] sm:$0xff] %v1072_v37 }
 0x5ae   :  { %1089 = vsyncpa [#allocation4], 1 }

// kernel: luong_encoder_forward.3
= control target key start
LH: loop header
LB: loop body
LE: loop exit
PB: predicated region body
PF: predicated region fallthrough
CT: control target
= control target key end

     0   :  { %v2311_v19 = vmov 0   ;;  %v1257_v48 = vmov 0.0   ;;  %s2305_s2 = inlined_call_operand.vmem [shape: f32[128,384], index: 2, kind: input, shape index: {}]   ;;  %s2306_s1 = inlined_call_operand.vmem [shape: s32[8,1], index: 1, kind: input, shape index: {}]   ;;  %s2307_s3 = inlined_call_operand.vmem [shape: f32[1,128], index: 3, kind: input, shape index: {}]   ;;  %s2308_s0 = inlined_call_operand.vmem [shape: f32[8,8,384], index: 0, kind: input, shape index: {}]   ;;  %s2309_s4 = inlined_call_operand.vmem [shape: f32[8,8,128], index: 4, kind: output, shape index: {0}]   ;;  %s2310_s5 = inlined_call_operand.vmem [shape: f32[8,128], index: 5, kind: output, shape index: {1}]  }
   0x1   :  { %v1291_v0 = vld [vmem:[%s2305_s2 + $0x168] sm:$0xff]  ;;  %v1296_v1 = vld [vmem:[%s2305_s2 + $0x170] sm:$0xff]  ;;  %v1308_v3 = vld [vmem:[%s2305_s2 + $0x158] sm:$0xff]  ;;  %1122 = vset.pattern.permute.xlu0 %v2311_v19  ;;  %1123 = vset.pattern.permute.xlu1 %v2311_v19 }
   0x2   :  { %v1301_v2 = vld [vmem:[%s2305_s2 + $0x150] sm:$0xff]  ;;  %79 = vmatpush.msra.mxu0 %v1291_v0  ;;  %99 = vmatpush.msra.mxu1 %v1296_v1  ;;  %v1313_v4 = vld [vmem:[%s2305_s2 + $0x138] sm:$0xff]  ;;  %v1318_v5 = vld [vmem:[%s2305_s2 + $0x140] sm:$0xff] }
   0x3   :  { %203 = vmatpush.msra.mxu3 %v1291_v0  ;;  %v1326_v6 = vld [vmem:[%s2305_s2 + $0x120] sm:$0xff]  ;;  %v1331_v7 = vld [vmem:[%s2305_s2 + $0x128] sm:$0xff]  ;;  %v1344_v9 = vld [vmem:[%s2305_s2 + $0x110] sm:$0xff]  ;;  %1124 = vset.pattern.permute.xlu2 %v2311_v19 }
   0x4   :  { %80 = vmatpush.msra.mxu0 %v1301_v2  ;;  %100 = vmatpush.msra.mxu1 %v1308_v3  ;;  %v1339_v8 = vld [vmem:[%s2305_s2 + $0x108] sm:$0xff]  ;;  %v1352_v10 = vld [vmem:[%s2305_s2 + $0xf0] sm:$0xff]  ;;  %v1357_v11 = vld [vmem:[%s2305_s2 + $0xf8] sm:$0xff] }
   0x5   :  { %204 = vmatpush.msra.mxu3 %v1301_v2  ;;  %v1362_v12 = vld [vmem:[%s2305_s2 + $0x178] sm:$0xff]  ;;  %v1370_v13 = vld [vmem:[%s2305_s2 + $0x160] sm:$0xff]  ;;  %v1389_v16 = vld [vmem:[%s2305_s2 + $0x148] sm:$0xff] }
   0x6   :  { %81 = vmatpush.msra.mxu0 %v1313_v4  ;;  %101 = vmatpush.msra.mxu1 %v1318_v5  ;;  %v1375_v14 = vld [vmem:[%s2305_s2 + $0xd8] sm:$0xff]  ;;  %v1380_v15 = vld [vmem:[%s2305_s2 + $0xe0] sm:$0xff]  ;;  %v1399_v18 = vld [vmem:[%s2305_s2 + $0xc8] sm:$0xff] }
   0x7   :  { %205 = vmatpush.msra.mxu3 %v1313_v4  ;;  %119 = vmatpush.msra.mxu2 %v1362_v12  ;;  %v1394_v17 = vld [vmem:[%s2305_s2 + $0xc0] sm:$0xff]  ;;  %v1408_v20 = vld [vmem:[%s2305_s2 + $0x130] sm:$0xff]  ;;  %v1413_v21 = vld [vmem:[%s2305_s2 + $0xa8] sm:$0xff] }
   0x8   :  { %82 = vmatpush.msra.mxu0 %v1326_v6  ;;  %102 = vmatpush.msra.mxu1 %v1331_v7  ;;  %v1418_v22 = vld [vmem:[%s2305_s2 + $0xb0] sm:$0xff]  ;;  %v1427_v23 = vld [vmem:[%s2305_s2 + $0x118] sm:$0xff]  ;;  %v1443_v26 = vld [vmem:[%s2306_s1] sm:$0xff] }
   0x9   :  { %206 = vmatpush.msra.mxu3 %v1326_v6  ;;  %120 = vmatpush.msra.mxu2 %v1370_v13  ;;  %v1432_v24 = vld [vmem:[%s2305_s2 + $0x90] sm:$0xff]  ;;  %v1437_v25 = vld [vmem:[%s2305_s2 + $0x98] sm:$0xff]  ;;  %2333 = vst [vmem:[#allocation3_spill] sm:$0xff] %v1443_v26  ;;  %v1451_v27 = vld [vmem:[%s2305_s2 + $0x100] sm:$0xff]  ;;  %vm190_vm0 = vcmp.gt.s32.totalorder %v1443_v26, 0  ;;  %vm312_vm1 = vcmp.gt.s32.totalorder %v1443_v26, 1 }
   0xa   :  { %83 = vmatpush.msra.mxu0 %v1339_v8  ;;  %103 = vmatpush.msra.mxu1 %v1344_v9  ;;  %v1457_v28 = vld [vmem:[%s2305_s2 + $0x78] sm:$0xff]  ;;  %v1462_v29 = vld [vmem:[%s2305_s2 + $0x80] sm:$0xff]  ;;  %v191_v30 = vsel %vm190_vm0, 1, %v2311_v19  ;;  %v1472_v31 = vld [vmem:[%s2305_s2 + $0xe8] sm:$0xff]  ;;  %v313_v41 = vsel %vm312_vm1, 1, %v2311_v19  ;;  %vm927_vm2 = vcmp.gt.s32.totalorder %v1443_v26, 6 }
   0xb   :  { %207 = vmatpush.msra.mxu3 %v1339_v8  ;;  %121 = vmatpush.msra.mxu2 %v1389_v16  ;;  %v1477_v32 = vld [vmem:[%s2305_s2 + $0x60] sm:$0xff]  ;;  %v1482_v33 = vld [vmem:[%s2305_s2 + $0x68] sm:$0xff]  ;;  %v1490_v34 = vld [vmem:[%s2305_s2 + $0xd0] sm:$0xff]  ;;  %v928_v50 = vsel %vm927_vm2, 1, %v2311_v19 }
   0xc   :  { %84 = vmatpush.msra.mxu0 %v1352_v10  ;;  %104 = vmatpush.msra.mxu1 %v1357_v11  ;;  %v1495_v35 = vld [vmem:[%s2305_s2 + $0x48] sm:$0xff]  ;;  %v1500_v36 = vld [vmem:[%s2305_s2 + $0x50] sm:$0xff]  ;;  %v1510_v37 = vld [vmem:[%s2305_s2 + $0xb8] sm:$0xff] }
   0xd   :  { %208 = vmatpush.msra.mxu3 %v1352_v10  ;;  %122 = vmatpush.msra.mxu2 %v1408_v20  ;;  %v1515_v38 = vld [vmem:[%s2305_s2 + $0x30] sm:$0xff]  ;;  %v1520_v39 = vld [vmem:[%s2305_s2 + $0x38] sm:$0xff]  ;;  %v1529_v40 = vld [vmem:[%s2305_s2 + $0xa0] sm:$0xff] }
   0xe   :  { %85 = vmatpush.msra.mxu0 %v1375_v14  ;;  %105 = vmatpush.msra.mxu1 %v1380_v15  ;;  %2334 = vst [vmem:[#allocation4_spill] sm:$0xff] %v1515_v38  ;;  %v1535_v42 = vld [vmem:[%s2305_s2 + $0x18] sm:$0xff]  ;;  %v1540_v43 = vld [vmem:[%s2305_s2 + $0x20] sm:$0xff]  ;;  %v1549_v44 = vld [vmem:[%s2305_s2 + $0x88] sm:$0xff] }
   0xf   :  { %209 = vmatpush.msra.mxu3 %v1375_v14  ;;  %123 = vmatpush.msra.mxu2 %v1427_v23  ;;  %2335 = vst [vmem:[#allocation5_spill] sm:$0xff] %v1520_v39  ;;  %v1554_v45 = vld [vmem:[%s2305_s2] sm:$0xff]  ;;  %v1559_v46 = vld [vmem:[%s2305_s2 + $0x8] sm:$0xff]  ;;  %v1568_v47 = vld [vmem:[%s2305_s2 + $0x70] sm:$0xff] }
  0x10   :  { %86 = vmatpush.msra.mxu0 %v1394_v17  ;;  %106 = vmatpush.msra.mxu1 %v1399_v18  ;;  %2336 = vst [vmem:[#allocation6_spill] sm:$0xff] %v1535_v42  ;;  %v1577_v49 = vld [vmem:[%s2305_s2 + $0x58] sm:$0xff]  ;;  %v1585_v51 = vld [vmem:[%s2305_s2 + $0x40] sm:$0xff]  ;;  %v1594_v52 = vld [vmem:[%s2305_s2 + $0x28] sm:$0xff] }
  0x11   :  { %210 = vmatpush.msra.mxu3 %v1394_v17  ;;  %124 = vmatpush.msra.mxu2 %v1451_v27  ;;  %2337 = vst [vmem:[#allocation7_spill] sm:$0xff] %v1540_v43  ;;  %v1602_v53 = vld [vmem:[%s2305_s2 + $0x10] sm:$0xff]  ;;  %v76_v54 = vld [vmem:[%s2308_s0] sm:$0xff]  ;;  %v77_v55 = vld [vmem:[%s2308_s0 + $0x8] sm:$0xff] }
  0x12   :  { %87 = vmatpush.msra.mxu0 %v1413_v21  ;;  %107 = vmatpush.msra.mxu1 %v1418_v22  ;;  %2338 = vst [vmem:[#allocation8_spill] sm:$0xff] %v1554_v45 }
  0x13   :  { %193 = vperm.xlu0 %1122, %v191_v30   ;;  %125 = vmatpush.msra.mxu2 %v1472_v31  ;;  %2339 = vst [vmem:[#allocation9_spill] sm:$0xff] %v1559_v46 }
  0x14   :  { %88 = vmatpush.msra.mxu0 %v1432_v24  ;;  %108 = vmatpush.msra.mxu1 %v1437_v25  ;;  %2340 = vst [vmem:[#allocation10_spill] sm:$0xff] %v1594_v52 }
  0x15   :  { %211 = vmatpush.msra.mxu3 %v1413_v21  ;;  %126 = vmatpush.msra.mxu2 %v1490_v34  ;;  %2341 = vst [vmem:[#allocation11_spill] sm:$0xff] %v1602_v53 }
  0x16   :  { %89 = vmatpush.msra.mxu0 %v1457_v28  ;;  %109 = vmatpush.msra.mxu1 %v1462_v29 }
  0x17   :  { %212 = vmatpush.msra.mxu3 %v1432_v24  ;;  %127 = vmatpush.msra.mxu2 %v1510_v37 }
  0x18   :  { %90 = vmatpush.msra.mxu0 %v1477_v32  ;;  %110 = vmatpush.msra.mxu1 %v1482_v33 }
  0x19   :  { %213 = vmatpush.msra.mxu3 %v1457_v28  ;;  %128 = vmatpush.msra.mxu2 %v1529_v40 }
  0x1a   :  { %91 = vmatpush.msra.mxu0 %v1495_v35  ;;  %111 = vmatpush.msra.mxu1 %v1500_v36 }
  0x1b   :  { %315 = vperm.xlu0 %1122, %v313_v41   ;;  %129 = vmatpush.msra.mxu2 %v1549_v44 }
  0x1c   :  { %92 = vmatpush.msra.mxu0 %v1515_v38  ;;  %112 = vmatpush.msra.mxu1 %v1520_v39 }
  0x1d   :  { %214 = vmatpush.msra.mxu3 %v1477_v32  ;;  %130 = vmatpush.msra.mxu2 %v1568_v47 }
  0x1e   :  { %93 = vmatpush.msra.mxu0 %v1535_v42  ;;  %113 = vmatpush.msra.mxu1 %v1540_v43 }
  0x1f   :  { %215 = vmatpush.msra.mxu3 %v1495_v35  ;;  %131 = vmatpush.msra.mxu2 %v1577_v49 }
  0x20   :  { %94 = vmatpush.msra.mxu0 %v1554_v45  ;;  %114 = vmatpush.msra.mxu1 %v1559_v46 }
  0x21   :  { %95 = vmatmul.f32.vlgmr.msra.gmra.mxu0 %v1257_v48  ;;  %115 = vmatmul.f32.vlgmr.msra.gmra.mxu1 %v1257_v48 }
  0x22   :  { %223 = vmatpush.msrb.mxu0 %v1296_v1  ;;  %243 = vmatpush.msrb.mxu1 %v1362_v12 }
  0x23   :  { %930 = vperm.xlu0 %1122, %v928_v50   ;;  %132 = vmatpush.msra.mxu2 %v1585_v51 }
  0x24   :  { %224 = vmatpush.msrb.mxu0 %v1308_v3  ;;  %244 = vmatpush.msrb.mxu1 %v1370_v13 }
  0x25   :  { %216 = vmatpush.msra.mxu3 %v1515_v38  ;;  %133 = vmatpush.msra.mxu2 %v1594_v52 }
  0x26   :  { %225 = vmatpush.msrb.mxu0 %v1318_v5  ;;  %245 = vmatpush.msrb.mxu1 %v1389_v16 }
  0x27   :  { %217 = vmatpush.msra.mxu3 %v1535_v42  ;;  %134 = vmatpush.msra.mxu2 %v1602_v53 }
  0x28   :  { %226 = vmatpush.msrb.mxu0 %v1331_v7  ;;  %246 = vmatpush.msrb.mxu1 %v1408_v20 }
  0x29   :  { %135 = vmatmul.f32.vlgmr.msra.gmra.mxu2 %v1257_v48  ;;  %218 = vmatpush.msra.mxu3 %v1554_v45 }
  0x2a   :  { %227 = vmatpush.msrb.mxu0 %v1344_v9  ;;  %247 = vmatpush.msrb.mxu1 %v1427_v23 }
  0x2b   :  { %326 = vmatpush.msrb.mxu2 %v1291_v0  ;;  %346 = vmatpush.msrb.mxu3 %v1296_v1 }
  0x2c   :  { %228 = vmatpush.msrb.mxu0 %v1357_v11  ;;  %248 = vmatpush.msrb.mxu1 %v1451_v27 }
  0x2d   :  { %327 = vmatpush.msrb.mxu2 %v1301_v2  ;;  %347 = vmatpush.msrb.mxu3 %v1308_v3 }
  0x2e   :  { %229 = vmatpush.msrb.mxu0 %v1380_v15  ;;  %249 = vmatpush.msrb.mxu1 %v1472_v31 }
  0x2f   :  { %328 = vmatpush.msrb.mxu2 %v1313_v4  ;;  %348 = vmatpush.msrb.mxu3 %v1318_v5 }
  0x30   :  { %230 = vmatpush.msrb.mxu0 %v1399_v18  ;;  %250 = vmatpush.msrb.mxu1 %v1490_v34 }
  0x31   :  { %329 = vmatpush.msrb.mxu2 %v1326_v6  ;;  %349 = vmatpush.msrb.mxu3 %v1331_v7 }
  0x32   :  { %231 = vmatpush.msrb.mxu0 %v1418_v22  ;;  %251 = vmatpush.msrb.mxu1 %v1510_v37 }
  0x33   :  { %330 = vmatpush.msrb.mxu2 %v1339_v8  ;;  %350 = vmatpush.msrb.mxu3 %v1344_v9 }
  0x34   :  { %232 = vmatpush.msrb.mxu0 %v1437_v25  ;;  %252 = vmatpush.msrb.mxu1 %v1529_v40 }
  0x35   :  { %331 = vmatpush.msrb.mxu2 %v1352_v10  ;;  %351 = vmatpush.msrb.mxu3 %v1357_v11 }
  0x36   :  { %233 = vmatpush.msrb.mxu0 %v1462_v29  ;;  %253 = vmatpush.msrb.mxu1 %v1549_v44 }
  0x37   :  { %332 = vmatpush.msrb.mxu2 %v1375_v14  ;;  %352 = vmatpush.msrb.mxu3 %v1380_v15 }
  0x38   :  { %234 = vmatpush.msrb.mxu0 %v1482_v33  ;;  %254 = vmatpush.msrb.mxu1 %v1568_v47 }
  0x39   :  { %333 = vmatpush.msrb.mxu2 %v1394_v17  ;;  %353 = vmatpush.msrb.mxu3 %v1399_v18 }
  0x3a   :  { %235 = vmatpush.msrb.mxu0 %v1500_v36  ;;  %255 = vmatpush.msrb.mxu1 %v1577_v49 }
  0x3b   :  { %334 = vmatpush.msrb.mxu2 %v1413_v21  ;;  %354 = vmatpush.msrb.mxu3 %v1418_v22 }
  0x3c   :  { %236 = vmatpush.msrb.mxu0 %v1520_v39  ;;  %256 = vmatpush.msrb.mxu1 %v1585_v51 }
  0x3d   :  { %335 = vmatpush.msrb.mxu2 %v1432_v24  ;;  %355 = vmatpush.msrb.mxu3 %v1437_v25 }
  0x3e   :  { %237 = vmatpush.msrb.mxu0 %v1540_v43  ;;  %257 = vmatpush.msrb.mxu1 %v1594_v52 }
  0x3f   :  { %336 = vmatpush.msrb.mxu2 %v1457_v28  ;;  %356 = vmatpush.msrb.mxu3 %v1462_v29 }
  0x40   :  { %238 = vmatpush.msrb.mxu0 %v1559_v46  ;;  %258 = vmatpush.msrb.mxu1 %v1602_v53 }
  0x41   :  { %337 = vmatpush.msrb.mxu2 %v1477_v32  ;;  %357 = vmatpush.msrb.mxu3 %v1482_v33 }
  0x42   :  { %366 = vmatpush.msra.mxu0 %v1362_v12  ;;  %449 = vmatpush.msra.mxu1 %v1291_v0 }
  0x43   :  { %338 = vmatpush.msrb.mxu2 %v1495_v35  ;;  %358 = vmatpush.msrb.mxu3 %v1500_v36 }
  0x44   :  { %367 = vmatpush.msra.mxu0 %v1370_v13  ;;  %450 = vmatpush.msra.mxu1 %v1301_v2 }
  0x45   :  { %339 = vmatpush.msrb.mxu2 %v1515_v38  ;;  %359 = vmatpush.msrb.mxu3 %v1520_v39 }
  0x46   :  { %368 = vmatpush.msra.mxu0 %v1389_v16  ;;  %451 = vmatpush.msra.mxu1 %v1313_v4 }
  0x47   :  { %340 = vmatpush.msrb.mxu2 %v1535_v42  ;;  %360 = vmatpush.msrb.mxu3 %v1540_v43 }
  0x48   :  { %369 = vmatpush.msra.mxu0 %v1408_v20  ;;  %452 = vmatpush.msra.mxu1 %v1326_v6 }
  0x49   :  { %341 = vmatpush.msrb.mxu2 %v1554_v45  ;;  %361 = vmatpush.msrb.mxu3 %v1559_v46 }
  0x4a   :  { %370 = vmatpush.msra.mxu0 %v1427_v23  ;;  %453 = vmatpush.msra.mxu1 %v1339_v8 }
  0x4b   :  { %469 = vmatpush.msra.mxu2 %v1296_v1 }
  0x4c   :  { %371 = vmatpush.msra.mxu0 %v1451_v27  ;;  %454 = vmatpush.msra.mxu1 %v1352_v10 }
  0x4d   :  { %470 = vmatpush.msra.mxu2 %v1308_v3 }
  0x4e   :  { %372 = vmatpush.msra.mxu0 %v1472_v31  ;;  %455 = vmatpush.msra.mxu1 %v1375_v14 }
  0x4f   :  { %471 = vmatpush.msra.mxu2 %v1318_v5 }
  0x50   :  { %373 = vmatpush.msra.mxu0 %v1490_v34  ;;  %456 = vmatpush.msra.mxu1 %v1394_v17 }
  0x51   :  { %472 = vmatpush.msra.mxu2 %v1331_v7 }
  0x52   :  { %374 = vmatpush.msra.mxu0 %v1510_v37  ;;  %457 = vmatpush.msra.mxu1 %v1413_v21 }
  0x53   :  { %473 = vmatpush.msra.mxu2 %v1344_v9 }
  0x54   :  { %375 = vmatpush.msra.mxu0 %v1529_v40  ;;  %458 = vmatpush.msra.mxu1 %v1432_v24 }
  0x55   :  { %474 = vmatpush.msra.mxu2 %v1357_v11 }
  0x56   :  { %376 = vmatpush.msra.mxu0 %v1549_v44  ;;  %459 = vmatpush.msra.mxu1 %v1457_v28 }
  0x57   :  { %475 = vmatpush.msra.mxu2 %v1380_v15 }
  0x58   :  { %377 = vmatpush.msra.mxu0 %v1568_v47  ;;  %460 = vmatpush.msra.mxu1 %v1477_v32 }
  0x59   :  { %476 = vmatpush.msra.mxu2 %v1399_v18 }
  0x5a   :  { %378 = vmatpush.msra.mxu0 %v1577_v49  ;;  %461 = vmatpush.msra.mxu1 %v1495_v35 }
  0x5b   :  { %477 = vmatpush.msra.mxu2 %v1418_v22 }
  0x5c   :  { %379 = vmatpush.msra.mxu0 %v1585_v51  ;;  %462 = vmatpush.msra.mxu1 %v1515_v38 }
  0x5d   :  { %478 = vmatpush.msra.mxu2 %v1437_v25 }
  0x5e   :  { %380 = vmatpush.msra.mxu0 %v1594_v52  ;;  %463 = vmatpush.msra.mxu1 %v1535_v42 }
  0x5f   :  { %479 = vmatpush.msra.mxu2 %v1462_v29 }
  0x60   :  { %381 = vmatpush.msra.mxu0 %v1602_v53  ;;  %464 = vmatpush.msra.mxu1 %v1554_v45 }
  0x61   :  { %480 = vmatpush.msra.mxu2 %v1482_v33 }
  0x63   :  { %481 = vmatpush.msra.mxu2 %v1500_v36 }
  0x65   :  { %482 = vmatpush.msra.mxu2 %v1520_v39 }
  0x67   :  { %483 = vmatpush.msra.mxu2 %v1540_v43 }
  0x69   :  { %484 = vmatpush.msra.mxu2 %v1559_v46  ;;  %v1727_v46 = vld [vmem:[%s2307_s3] ss:$0 sm:$0xff] }
  0x6a   :  { %2342 = vst [vmem:[#allocation12_spill] sm:$0xff] %v1727_v46 }
  0x9e   :  { %v96_v56 = vpop.f32.mrf.mxu0  ;;  %v116_v57 = vpop.f32.mrf.mxu1 }
  0x9f   :  { %v139_v58 = vadd.f32 %v96_v56, %v76_v54  ;;  %v159_v59 = vadd.f32 %v116_v57, %v77_v55 }
  0xa1   :  { %v1073_v60 = vmul.f32 -1.442695, %v139_v58  ;;  %v1074_v61 = vmul.f32 -1.442695, %v159_v59 }
  0xa3   :  { %1126 = vpow2.f32 %v1073_v60 }
  0xa4   :  { %1128 = vpow2.f32 %v1074_v61 }
  0xa9   :  { %v1127_v62 = vpop.eup %1126 }
  0xaa   :  { %v1129_v63 = vpop.eup %1128  ;;  %v143_v30 = vadd.f32 1.0, %v1127_v62 }
  0xab   :  { %v163_v41 = vadd.f32 1.0, %v1129_v63 }
  0xac   :  { %1130 = vrcp.f32 %v143_v30  ;;  %v136_v55 = vpop.f32.mrf.mxu2  ;;  %v155_v56 = vand.u32 2147483648, %v143_v30  ;;  %v153_v58 = vand.u32 2147483647, %v143_v30  ;;  %vm149_vm4 = vweird.f32 %v143_v30 }
  0xad   :  { %1132 = vrcp.f32 %v163_v41  ;;  %v182_v60 = vadd.f32 %v1727_v46, %v136_v55  ;;  %vm169_vm7 = vweird.f32 %v163_v41  ;;  %v194_v46 = vpop.permute.xlu0 %193 }
  0xae   :  { %v156_v62 = vor.u32 1.1754944e-38, %v155_v56  ;;  %vm154_vm6 = vcmp.eq.f32.partialorder %v153_v58, 8.507059e+37  ;;  %vm195_vm11 = vcmp.eq.s32.totalorder %v194_v46, 1  ;;  %v2345_v46 = vld [vmem:[#allocation11_spill] sm:$0xff] }
  0xb2   :  { %v1131_v48 = vpop.eup %1130 }
  0xb3   :  { %v1133_v50 = vpop.eup %1132  ;;  %v145_v19 = vmul.f32 %v1131_v48, %v143_v30  ;;  %vm150_vm3 = vweird.f32 %v1131_v48 }
  0xb4   :  { %v165_v54 = vmul.f32 %v1133_v50, %v163_v41  ;;  %vm151_vm5 = vmor %vm149_vm4, %vm150_vm3  ;;  %vm170_vm8 = vweird.f32 %v1133_v50 }
  0xb5   :  { %v146_v26 = vsub.f32 1.0, %v145_v19  ;;  %v78_v19 = vld [vmem:[%s2308_s0 + $0x10] sm:$0xff]  ;;  %vm171_vm9 = vmor %vm169_vm7, %vm170_vm8 }
  0xb6   :  { %v166_v61 = vsub.f32 1.0, %v165_v54 }
  0xb7   :  { %v147_v57 = vmul.f32 %v1131_v48, %v146_v26  ;;  %v175_v26 = vand.u32 2147483648, %v163_v41 }
  0xb8   :  { %v167_v43 = vmul.f32 %v1133_v50, %v166_v61 }
  0xb9   :  { %v148_v59 = vadd.f32 %v1131_v48, %v147_v57  ;;  %v173_v57 = vand.u32 2147483647, %v163_v41  ;;  %v176_v54 = vor.u32 1.1754944e-38, %v175_v26  ;;  %v2347_v41 = vld [vmem:[#allocation9_spill] sm:$0xff] }
  0xba   :  { %v168_v30 = vadd.f32 %v1133_v50, %v167_v43  ;;  %v2344_v43 = vld [vmem:[#allocation7_spill] sm:$0xff] }
  0xbb   :  { %v152_v63 = vsel %vm151_vm5, %v1131_v48, %v148_v59  ;;  %vm174_vm10 = vcmp.eq.f32.partialorder %v173_v57, 8.507059e+37 }
  0xbc   :  { %v157_v45 = vsel %vm154_vm6, %v156_v62, %v152_v63  ;;  %v172_v55 = vsel %vm171_vm9, %v1133_v50, %v168_v30  ;;  %v1076_v50 = vld [vmem:[%s2308_s0 + $0x20] sm:$0xff] }
  0xbd   :  { %v183_v53 = vmul.f32 %v182_v60, %v157_v45  ;;  %v177_v58 = vsel %vm174_vm10, %v176_v54, %v172_v55 }
  0xbf   :  { %v184_v42 = vadd.f32 %v183_v53, %v78_v19  ;;  %v2346_v53 = vld [vmem:[#allocation8_spill] sm:$0xff]  ;;  %v1075_v19 = vld [vmem:[%s2308_s0 + $0x18] sm:$0xff] }
  0xc1   :  { %1134 = vtanh.f32 %v184_v42  ;;  %v2343_v42 = vld [vmem:[#allocation6_spill] sm:$0xff] }
  0xc7   :  { %v1135_v48 = vpop.eup %1134 }
  0xc8   :  { %v186_v56 = vsub.f32 0.0, %v1135_v48 }
  0xca   :  { %v187_v59 = vmul.f32 %v186_v56, %v177_v58  ;;  %v2348_v58 = vld [vmem:[#allocation3_spill] sm:$0xff] }
  0xcb   :  { %vm435_vm12 = vcmp.gt.s32.totalorder %v2348_v58, 2  ;;  %vm558_vm13 = vcmp.gt.s32.totalorder %v2348_v58, 3  ;;  %vm1050_vm2 = vcmp.gt.s32.totalorder %v2348_v58, 7 }
  0xcc   :  { %v188_v62 = vadd.f32 %v1135_v48, %v187_v59  ;;  %v2349_v59 = vmov 0  }
  0xce   :  { %v1733_v45 = vsel %vm195_vm11, %v188_v62, 0.0  ;;  %1117 = vmatmul.msk.f32.vlgmr.msra.gmra.mxu3 %vm195_vm11, %v188_v62  ;;  %1118 = vmatmul.msk.f32.vlgmr.msrb.gmra.mxu0 %vm195_vm11, %v188_v62 }
  0xcf   :  { %198 = vst [vmem:[%s2309_s4] sm:$0xff] %v1733_v45  ;;  %1119 = vmatmul.msk.f32.vlgmr.msrb.gmra.mxu1 %vm195_vm11, %v188_v62  ;;  %489 = vmatpush.msra.mxu3 %v1362_v12  ;;  %v436_v62 = vsel %vm435_vm12, 1, %v2349_v59 }
  0xd0   :  { %572 = vmatpush.msrb.mxu0 %v1291_v0  ;;  %592 = vmatpush.msrb.mxu1 %v1296_v1 }
  0xd1   :  { %490 = vmatpush.msra.mxu3 %v1370_v13  ;;  %438 = vperm.xlu1 %1123, %v436_v62   ;;  %v2350_v62 = vld [vmem:[#allocation12_spill] sm:$0xff] }
  0xd2   :  { %573 = vmatpush.msrb.mxu0 %v1301_v2  ;;  %593 = vmatpush.msrb.mxu1 %v1308_v3 }
  0xd3   :  { %491 = vmatpush.msra.mxu3 %v1389_v16 }
  0xd4   :  { %574 = vmatpush.msrb.mxu0 %v1313_v4  ;;  %594 = vmatpush.msrb.mxu1 %v1318_v5 }
  0xd5   :  { %492 = vmatpush.msra.mxu3 %v1408_v20 }
  0xd6   :  { %575 = vmatpush.msrb.mxu0 %v1326_v6  ;;  %595 = vmatpush.msrb.mxu1 %v1331_v7 }
  0xd7   :  { %493 = vmatpush.msra.mxu3 %v1427_v23 }
  0xd8   :  { %576 = vmatpush.msrb.mxu0 %v1339_v8  ;;  %596 = vmatpush.msrb.mxu1 %v1344_v9 }
  0xd9   :  { %494 = vmatpush.msra.mxu3 %v1451_v27 }
  0xda   :  { %577 = vmatpush.msrb.mxu0 %v1352_v10  ;;  %597 = vmatpush.msrb.mxu1 %v1357_v11 }
  0xdb   :  { %495 = vmatpush.msra.mxu3 %v1472_v31 }
  0xdc   :  { %578 = vmatpush.msrb.mxu0 %v1375_v14  ;;  %598 = vmatpush.msrb.mxu1 %v1380_v15 }
  0xdd   :  { %496 = vmatpush.msra.mxu3 %v1490_v34 }
  0xde   :  { %579 = vmatpush.msrb.mxu0 %v1394_v17  ;;  %599 = vmatpush.msrb.mxu1 %v1399_v18 }
  0xdf   :  { %497 = vmatpush.msra.mxu3 %v1510_v37 }
  0xe0   :  { %580 = vmatpush.msrb.mxu0 %v1413_v21  ;;  %600 = vmatpush.msrb.mxu1 %v1418_v22 }
  0xe1   :  { %498 = vmatpush.msra.mxu3 %v1529_v40 }
  0xe2   :  { %581 = vmatpush.msrb.mxu0 %v1432_v24  ;;  %601 = vmatpush.msrb.mxu1 %v1437_v25 }
  0xe3   :  { %499 = vmatpush.msra.mxu3 %v1549_v44 }
  0xe4   :  { %582 = vmatpush.msrb.mxu0 %v1457_v28  ;;  %602 = vmatpush.msrb.mxu1 %v1462_v29 }
  0xe5   :  { %500 = vmatpush.msra.mxu3 %v1568_v47 }
  0xe6   :  { %583 = vmatpush.msrb.mxu0 %v1477_v32  ;;  %603 = vmatpush.msrb.mxu1 %v1482_v33 }
  0xe7   :  { %501 = vmatpush.msra.mxu3 %v1577_v49 }
  0xe8   :  { %584 = vmatpush.msrb.mxu0 %v1495_v35  ;;  %604 = vmatpush.msrb.mxu1 %v1500_v36 }
  0xe9   :  { %502 = vmatpush.msra.mxu3 %v1585_v51 }
  0xea   :  { %585 = vmatpush.msrb.mxu0 %v1515_v38  ;;  %605 = vmatpush.msrb.mxu1 %v1520_v39 }
  0xeb   :  { %503 = vmatpush.msra.mxu3 %v1594_v52 }
  0xec   :  { %586 = vmatpush.msrb.mxu0 %v2343_v42  ;;  %606 = vmatpush.msrb.mxu1 %v2344_v43 }
  0xed   :  { %504 = vmatpush.msra.mxu3 %v2345_v46 }
  0xee   :  { %587 = vmatpush.msrb.mxu0 %v2346_v53  ;;  %607 = vmatpush.msrb.mxu1 %v2347_v41 }
 0x14b   :  { %v240_v60 = vpop.f32.mrf.mxu0 }
 0x14c   :  { %v283_v61 = vadd.f32 %v1076_v50, %v240_v60 }
 0x14e   :  { %v1079_v63 = vmul.f32 -1.442695, %v283_v61 }
 0x150   :  { %1136 = vpow2.f32 %v1079_v63 }
 0x151   :  { %v220_v26 = vpop.f32.mrf.mxu3 }
 0x152   :  { %v263_v30 = vadd.f32 %v1075_v19, %v220_v26 }
 0x154   :  { %v1078_v57 = vmul.f32 -1.442695, %v263_v30 }
 0x156   :  { %1138 = vpow2.f32 %v1078_v57  ;;  %v1137_v54 = vpop.eup %1136 }
 0x157   :  { %v287_v48 = vadd.f32 1.0, %v1137_v54  ;;  %v559_v54 = vsel %vm558_vm13, 1, %v2349_v59 }
 0x158   :  { %561 = vperm.xlu1 %1123, %v559_v54  }
 0x159   :  { %vm293_vm4 = vweird.f32 %v287_v48 }
 0x15c   :  { %v1139_v55 = vpop.eup %1138 }
 0x15d   :  { %v267_v56 = vadd.f32 1.0, %v1139_v55  ;;  %v260_v55 = vpop.f32.mrf.mxu1 }
 0x15e   :  { %v303_v43 = vadd.f32 %v2350_v62, %v260_v55 }
 0x15f   :  { %1140 = vrcp.f32 %v267_v56  ;;  %v279_v26 = vand.u32 2147483648, %v267_v56  ;;  %v277_v57 = vand.u32 2147483647, %v267_v56  ;;  %vm273_vm15 = vweird.f32 %v267_v56 }
 0x160   :  { %1142 = vrcp.f32 %v287_v48 }
 0x161   :  { %v280_v46 = vor.u32 1.1754944e-38, %v279_v26  ;;  %vm278_vm1 = vcmp.eq.f32.partialorder %v277_v57, 8.507059e+37  ;;  %v299_v26 = vand.u32 2147483648, %v287_v48 }
 0x165   :  { %v1141_v50 = vpop.eup %1140 }
 0x166   :  { %v1143_v60 = vpop.eup %1142  ;;  %v269_v61 = vmul.f32 %v1141_v50, %v267_v56  ;;  %vm274_vm14 = vweird.f32 %v1141_v50  ;;  %v1051_v56 = vsel %vm1050_vm2, 1, %v2349_v59 }
 0x167   :  { %v289_v63 = vmul.f32 %v1143_v60, %v287_v48  ;;  %vm275_vm0 = vmor %vm273_vm15, %vm274_vm14  ;;  %vm294_vm3 = vweird.f32 %v1143_v60  ;;  %1053 = vperm.xlu1 %1123, %v1051_v56  }
 0x168   :  { %v270_v19 = vsub.f32 1.0, %v269_v61  ;;  %v1077_v61 = vld [vmem:[%s2308_s0 + $0x28] sm:$0xff]  ;;  %vm295_vm5 = vmor %vm293_vm4, %vm294_vm3 }
 0x169   :  { %v290_v53 = vsub.f32 1.0, %v289_v63 }
 0x16a   :  { %v271_v30 = vmul.f32 %v1141_v50, %v270_v19 }
 0x16b   :  { %v291_v39 = vmul.f32 %v1143_v60, %v290_v53 }
 0x16c   :  { %v272_v41 = vadd.f32 %v1141_v50, %v271_v30 }
 0x16d   :  { %v292_v63 = vadd.f32 %v1143_v60, %v291_v39 }
 0x16e   :  { %v276_v42 = vsel %vm275_vm0, %v1141_v50, %v272_v41  ;;  %v297_v41 = vand.u32 2147483647, %v287_v48  ;;  %v300_v50 = vor.u32 1.1754944e-38, %v299_v26 }
 0x16f   :  { %v281_v52 = vsel %vm278_vm1, %v280_v46, %v276_v42  ;;  %v296_v42 = vsel %vm295_vm5, %v1143_v60, %v292_v63 }
 0x170   :  { %v304_v19 = vmul.f32 %v303_v43, %v281_v52  ;;  %vm298_vm6 = vcmp.eq.f32.partialorder %v297_v41, 8.507059e+37  ;;  %v316_v43 = vpop.permute.xlu0 %315 }
 0x171   :  { %v301_v58 = vsel %vm298_vm6, %v300_v50, %v296_v42  ;;  %vm317_vm7 = vcmp.eq.s32.totalorder %v316_v43, 1  ;;  %v1083_v42 = vld [vmem:[%s2308_s0 + $0x40] sm:$0xff] }
 0x172   :  { %v305_v38 = vadd.f32 %v1077_v61, %v304_v19 }
 0x174   :  { %1144 = vtanh.f32 %v305_v38 }
 0x17a   :  { %v1145_v46 = vpop.eup %1144 }
 0x17b   :  { %v307_v30 = vsub.f32 %v1733_v45, %v1145_v46 }
 0x17d   :  { %v308_v52 = vmul.f32 %v307_v30, %v301_v58 }
 0x17f   :  { %v309_v53 = vadd.f32 %v1145_v46, %v308_v52 }
 0x181   :  { %v1805_v38 = vsel %vm317_vm7, %v309_v53, %v1733_v45  ;;  %v319_v39 = vsel %vm317_vm7, %v309_v53, 0.0 }
 0x182   :  { %1080 = vst [vmem:[%s2309_s4 + $0x8] sm:$0xff] %v319_v39  ;;  %342 = vmatmul.f32.vlgmr.msrb.gmra.mxu2 %v1805_v38  ;;  %362 = vmatmul.f32.vlgmr.msrb.gmra.mxu3 %v1805_v38 }
 0x183   :  { %382 = vmatmul.f32.vlgmr.msra.gmra.mxu0 %v1805_v38  ;;  %612 = vmatpush.msrb.mxu2 %v1362_v12 }
 0x184   :  { %695 = vmatpush.msrb.mxu3 %v1291_v0  ;;  %715 = vmatpush.msra.mxu0 %v1296_v1  ;;  %v2351_v0 = vld [vmem:[#allocation4_spill] sm:$0xff]  ;;  %v2352_v1 = vld [vmem:[#allocation5_spill] sm:$0xff] }
 0x185   :  { %613 = vmatpush.msrb.mxu2 %v1370_v13 }
 0x186   :  { %696 = vmatpush.msrb.mxu3 %v1301_v2  ;;  %716 = vmatpush.msra.mxu0 %v1308_v3  ;;  %v2353_v2 = vld [vmem:[#allocation10_spill] sm:$0xff] }
 0x187   :  { %614 = vmatpush.msrb.mxu2 %v1389_v16  ;;  %v2354_v3 = vld [vmem:[#allocation6_spill] sm:$0xff] }
 0x188   :  { %697 = vmatpush.msrb.mxu3 %v1313_v4  ;;  %717 = vmatpush.msra.mxu0 %v1318_v5  ;;  %v2355_v4 = vld [vmem:[#allocation7_spill] sm:$0xff] }
 0x189   :  { %615 = vmatpush.msrb.mxu2 %v1408_v20  ;;  %v2356_v5 = vld [vmem:[#allocation11_spill] sm:$0xff] }
 0x18a   :  { %698 = vmatpush.msrb.mxu3 %v1326_v6  ;;  %718 = vmatpush.msra.mxu0 %v1331_v7  ;;  %v2357_v6 = vld [vmem:[#allocation8_spill] sm:$0xff]  ;;  %v2358_v7 = vld [vmem:[#allocation9_spill] sm:$0xff] }
 0x18b   :  { %616 = vmatpush.msrb.mxu2 %v1427_v23 }
 0x18c   :  { %699 = vmatpush.msrb.mxu3 %v1339_v8  ;;  %719 = vmatpush.msra.mxu0 %v1344_v9  ;;  %v1081_v8 = vld [vmem:[%s2308_s0 + $0x30] sm:$0xff]  ;;  %v1082_v9 = vld [vmem:[%s2308_s0 + $0x38] sm:$0xff] }
 0x18d   :  { %617 = vmatpush.msrb.mxu2 %v1451_v27 }
 0x18e   :  { %700 = vmatpush.msrb.mxu3 %v1352_v10  ;;  %720 = vmatpush.msra.mxu0 %v1357_v11 }
 0x18f   :  { %618 = vmatpush.msrb.mxu2 %v1472_v31 }
 0x190   :  { %701 = vmatpush.msrb.mxu3 %v1375_v14  ;;  %721 = vmatpush.msra.mxu0 %v1380_v15 }
 0x191   :  { %619 = vmatpush.msrb.mxu2 %v1490_v34 }
 0x192   :  { %702 = vmatpush.msrb.mxu3 %v1394_v17  ;;  %722 = vmatpush.msra.mxu0 %v1399_v18 }
 0x193   :  { %620 = vmatpush.msrb.mxu2 %v1510_v37 }
 0x194   :  { %703 = vmatpush.msrb.mxu3 %v1413_v21  ;;  %723 = vmatpush.msra.mxu0 %v1418_v22 }
 0x195   :  { %621 = vmatpush.msrb.mxu2 %v1529_v40 }
 0x196   :  { %704 = vmatpush.msrb.mxu3 %v1432_v24  ;;  %724 = vmatpush.msra.mxu0 %v1437_v25 }
 0x197   :  { %622 = vmatpush.msrb.mxu2 %v1549_v44 }
 0x198   :  { %705 = vmatpush.msrb.mxu3 %v1457_v28  ;;  %725 = vmatpush.msra.mxu0 %v1462_v29 }
 0x199   :  { %623 = vmatpush.msrb.mxu2 %v1568_v47 }
 0x19a   :  { %706 = vmatpush.msrb.mxu3 %v1477_v32  ;;  %726 = vmatpush.msra.mxu0 %v1482_v33 }
 0x19b   :  { %624 = vmatpush.msrb.mxu2 %v1577_v49 }
 0x19c   :  { %707 = vmatpush.msrb.mxu3 %v1495_v35  ;;  %727 = vmatpush.msra.mxu0 %v1500_v36 }
 0x19d   :  { %625 = vmatpush.msrb.mxu2 %v1585_v51 }
 0x19e   :  { %708 = vmatpush.msrb.mxu3 %v2351_v0  ;;  %728 = vmatpush.msra.mxu0 %v2352_v1 }
 0x19f   :  { %626 = vmatpush.msrb.mxu2 %v2353_v2 }
 0x1a0   :  { %709 = vmatpush.msrb.mxu3 %v2354_v3  ;;  %729 = vmatpush.msra.mxu0 %v2355_v4 }
 0x1a1   :  { %627 = vmatpush.msrb.mxu2 %v2356_v5 }
 0x1a2   :  { %710 = vmatpush.msrb.mxu3 %v2357_v6  ;;  %730 = vmatpush.msra.mxu0 %v2358_v7 }
 0x200   :  { %v383_v61 = vpop.f32.mrf.mxu0 }
 0x201   :  { %v426_v26 = vadd.f32 %v2350_v62, %v383_v61  ;;  %v1992_v61 = vld [vmem:[%s2305_s2 + $0xc8] sm:$0xff] }
 0x205   :  { %v343_v10 = vpop.f32.mrf.mxu2  ;;  %v363_v11 = vpop.f32.mrf.mxu3 }
 0x206   :  { %v386_v12 = vadd.f32 %v1081_v8, %v343_v10  ;;  %v406_v13 = vadd.f32 %v1082_v9, %v363_v11 }
 0x208   :  { %v1084_v14 = vmul.f32 -1.442695, %v386_v12  ;;  %v1085_v15 = vmul.f32 -1.442695, %v406_v13  ;;  %v439_v12 = vpop.permute.xlu1 %438 }
 0x209   :  { %vm440_vm0 = vcmp.eq.s32.totalorder %v439_v12, 1 }
 0x20a   :  { %1146 = vpow2.f32 %v1084_v14 }
 0x20b   :  { %1148 = vpow2.f32 %v1085_v15 }
 0x210   :  { %v1147_v17 = vpop.eup %1146 }
 0x211   :  { %v1149_v18 = vpop.eup %1148  ;;  %v390_v21 = vadd.f32 1.0, %v1147_v17 }
 0x212   :  { %v410_v22 = vadd.f32 1.0, %v1149_v18  ;;  %v1884_v18 = vld [vmem:[%s2305_s2 + $0x178] sm:$0xff] }
 0x213   :  { %1150 = vrcp.f32 %v390_v21  ;;  %v402_v60 = vand.u32 2147483648, %v390_v21  ;;  %v400_v55 = vand.u32 2147483647, %v390_v21  ;;  %vm396_vm9 = vweird.f32 %v390_v21 }
 0x214   :  { %1152 = vrcp.f32 %v410_v22  ;;  %v422_v43 = vand.u32 2147483648, %v410_v22  ;;  %vm416_vm13 = vweird.f32 %v410_v22  ;;  %v420_v53 = vand.u32 2147483647, %v410_v22 }
 0x215   :  { %v403_v56 = vor.u32 1.1754944e-38, %v402_v60  ;;  %vm401_vm11 = vcmp.eq.f32.partialorder %v400_v55, 8.507059e+37  ;;  %v1940_v60 = vld [vmem:[%s2305_s2 + $0x128] sm:$0xff]  ;;  %v1979_v55 = vld [vmem:[%s2305_s2 + $0xe0] sm:$0xff] }
 0x216   :  { %v423_v9 = vor.u32 1.1754944e-38, %v422_v43  ;;  %vm421_vm15 = vcmp.eq.f32.partialorder %v420_v53, 8.507059e+37  ;;  %v1089_v53 = vld [vmem:[%s2308_s0 + $0x58] sm:$0xff] }
 0x219   :  { %v1151_v24 = vpop.eup %1150 }
 0x21a   :  { %v1153_v25 = vpop.eup %1152  ;;  %v392_v45 = vmul.f32 %v1151_v24, %v390_v21  ;;  %vm397_vm8 = vweird.f32 %v1151_v24  ;;  %v1896_v21 = vld [vmem:[%s2305_s2 + $0x170] sm:$0xff] }
 0x21b   :  { %v412_v57 = vmul.f32 %v1153_v25, %v410_v22  ;;  %vm398_vm10 = vmor %vm396_vm9, %vm397_vm8  ;;  %vm417_vm12 = vweird.f32 %v1153_v25  ;;  %v1902_v22 = vld [vmem:[%s2305_s2 + $0x160] sm:$0xff] }
 0x21c   :  { %v393_v48 = vsub.f32 1.0, %v392_v45  ;;  %vm418_vm14 = vmor %vm416_vm13, %vm417_vm12  ;;  %v1921_v45 = vld [vmem:[%s2305_s2 + $0x138] sm:$0xff] }
 0x21d   :  { %v413_v63 = vsub.f32 1.0, %v412_v57  ;;  %v1953_v57 = vld [vmem:[%s2305_s2 + $0x110] sm:$0xff] }
 0x21e   :  { %v394_v54 = vmul.f32 %v1151_v24, %v393_v48  ;;  %v1927_v48 = vld [vmem:[%s2305_s2 + $0x140] sm:$0xff] }
 0x21f   :  { %v414_v30 = vmul.f32 %v1153_v25, %v413_v63 }
 0x220   :  { %v395_v19 = vadd.f32 %v1151_v24, %v394_v54  ;;  %v1966_v54 = vld [vmem:[%s2305_s2 + $0xf8] sm:$0xff] }
 0x221   :  { %v415_v52 = vadd.f32 %v1153_v25, %v414_v30 }
 0x222   :  { %v399_v41 = vsel %vm398_vm10, %v1151_v24, %v395_v19  ;;  %v1908_v24 = vld [vmem:[%s2305_s2 + $0x150] sm:$0xff] }
 0x223   :  { %v404_v46 = vsel %vm401_vm11, %v403_v56, %v399_v41  ;;  %v419_v39 = vsel %vm418_vm14, %v1153_v25, %v415_v52  ;;  %v1914_v25 = vld [vmem:[%s2305_s2 + $0x158] sm:$0xff]  ;;  %v2005_v19 = vld [vmem:[%s2305_s2 + $0xb0] sm:$0xff] }
 0x224   :  { %v427_v50 = vmul.f32 %v426_v26, %v404_v46  ;;  %v424_v11 = vsel %vm421_vm15, %v423_v9, %v419_v39  ;;  %v2018_v56 = vld [vmem:[%s2305_s2 + $0x98] sm:$0xff] }
 0x226   :  { %v428_v58 = vadd.f32 %v1083_v42, %v427_v50 }
 0x228   :  { %1154 = vtanh.f32 %v428_v58 }
 0x22e   :  { %v1155_v8 = vpop.eup %1154 }
 0x22f   :  { %v430_v10 = vsub.f32 %v1805_v38, %v1155_v8 }
 0x231   :  { %v431_v13 = vmul.f32 %v430_v10, %v424_v11 }
 0x233   :  { %v432_v14 = vadd.f32 %v1155_v8, %v431_v13 }
 0x235   :  { %v1873_v15 = vsel %vm440_vm0, %v432_v14, %v1805_v38  ;;  %v442_v17 = vsel %vm440_vm0, %v432_v14, 0.0  ;;  %v1890_v38 = vld [vmem:[%s2305_s2 + $0x168] sm:$0xff] }
 0x236   :  { %1086 = vst [vmem:[%s2309_s4 + $0x10] sm:$0xff] %v442_v17  ;;  %465 = vmatmul.f32.vlgmr.msra.gmra.mxu1 %v1873_v15  ;;  %485 = vmatmul.f32.vlgmr.msra.gmra.mxu2 %v1873_v15 }
 0x237   :  { %505 = vmatmul.f32.vlgmr.msra.gmra.mxu3 %v1873_v15  ;;  %735 = vmatpush.msra.mxu1 %v1884_v18 }
 0x238   :  { %818 = vmatpush.msra.mxu2 %v1890_v38  ;;  %838 = vmatpush.msra.mxu3 %v1896_v21 }
 0x239   :  { %736 = vmatpush.msra.mxu1 %v1902_v22 }
 0x23a   :  { %819 = vmatpush.msra.mxu2 %v1908_v24  ;;  %839 = vmatpush.msra.mxu3 %v1914_v25 }
 0x23b   :  { %737 = vmatpush.msra.mxu1 %v1389_v16  ;;  %v1934_v16 = vld [vmem:[%s2305_s2 + $0x120] sm:$0xff] }
 0x23c   :  { %820 = vmatpush.msra.mxu2 %v1921_v45  ;;  %840 = vmatpush.msra.mxu3 %v1927_v48 }
 0x23d   :  { %738 = vmatpush.msra.mxu1 %v1408_v20  ;;  %v1947_v20 = vld [vmem:[%s2305_s2 + $0x108] sm:$0xff] }
 0x23e   :  { %821 = vmatpush.msra.mxu2 %v1934_v16  ;;  %841 = vmatpush.msra.mxu3 %v1940_v60 }
 0x23f   :  { %739 = vmatpush.msra.mxu1 %v1427_v23  ;;  %v1960_v23 = vld [vmem:[%s2305_s2 + $0xf0] sm:$0xff] }
 0x240   :  { %822 = vmatpush.msra.mxu2 %v1947_v20  ;;  %842 = vmatpush.msra.mxu3 %v1953_v57 }
 0x241   :  { %740 = vmatpush.msra.mxu1 %v1451_v27  ;;  %v1973_v27 = vld [vmem:[%s2305_s2 + $0xd8] sm:$0xff] }
 0x242   :  { %823 = vmatpush.msra.mxu2 %v1960_v23  ;;  %843 = vmatpush.msra.mxu3 %v1966_v54 }
 0x243   :  { %741 = vmatpush.msra.mxu1 %v1472_v31  ;;  %v1986_v31 = vld [vmem:[%s2305_s2 + $0xc0] sm:$0xff] }
 0x244   :  { %824 = vmatpush.msra.mxu2 %v1973_v27  ;;  %844 = vmatpush.msra.mxu3 %v1979_v55 }
 0x245   :  { %742 = vmatpush.msra.mxu1 %v1490_v34  ;;  %v1999_v34 = vld [vmem:[%s2305_s2 + $0xa8] sm:$0xff] }
 0x246   :  { %825 = vmatpush.msra.mxu2 %v1986_v31  ;;  %845 = vmatpush.msra.mxu3 %v1992_v61 }
 0x247   :  { %743 = vmatpush.msra.mxu1 %v1510_v37  ;;  %v2012_v37 = vld [vmem:[%s2305_s2 + $0x90] sm:$0xff] }
 0x248   :  { %826 = vmatpush.msra.mxu2 %v1999_v34  ;;  %846 = vmatpush.msra.mxu3 %v2005_v19 }
 0x249   :  { %744 = vmatpush.msra.mxu1 %v1529_v40 }
 0x24a   :  { %827 = vmatpush.msra.mxu2 %v2012_v37  ;;  %847 = vmatpush.msra.mxu3 %v2018_v56 }
 0x24b   :  { %745 = vmatpush.msra.mxu1 %v1549_v44 }
 0x24c   :  { %828 = vmatpush.msra.mxu2 %v1457_v28  ;;  %848 = vmatpush.msra.mxu3 %v1462_v29  ;;  %v1087_v28 = vld [vmem:[%s2308_s0 + $0x48] sm:$0xff] }
 0x24d   :  { %746 = vmatpush.msra.mxu1 %v1568_v47 }
 0x24e   :  { %829 = vmatpush.msra.mxu2 %v1477_v32  ;;  %849 = vmatpush.msra.mxu3 %v1482_v33 }
 0x24f   :  { %747 = vmatpush.msra.mxu1 %v1577_v49 }
 0x250   :  { %830 = vmatpush.msra.mxu2 %v1495_v35  ;;  %850 = vmatpush.msra.mxu3 %v1500_v36  ;;  %v1088_v35 = vld [vmem:[%s2308_s0 + $0x50] sm:$0xff] }
 0x251   :  { %748 = vmatpush.msra.mxu1 %v1585_v51 }
 0x252   :  { %831 = vmatpush.msra.mxu2 %v2351_v0  ;;  %851 = vmatpush.msra.mxu3 %v2352_v1  ;;  %v1228_v1 = vld [vmem:[%s2306_s1] sm:$0xff] }
 0x253   :  { %749 = vmatpush.msra.mxu1 %v2353_v2  ;;  %vm681_vm1 = vcmp.gt.s32.totalorder %v1228_v1, 4  ;;  %vm804_vm2 = vcmp.gt.s32.totalorder %v1228_v1, 5  ;;  %v1093_v1 = vld [vmem:[%s2308_s0 + $0x60] sm:$0xff] }
 0x254   :  { %832 = vmatpush.msra.mxu2 %v2354_v3  ;;  %852 = vmatpush.msra.mxu3 %v2355_v4  ;;  %v682_v2 = vsel %vm681_vm1, 1, %v2349_v59  ;;  %v805_v26 = vsel %vm804_vm2, 1, %v2349_v59 }
 0x255   :  { %750 = vmatpush.msra.mxu1 %v2356_v5  ;;  %684 = vperm.xlu2 %1124, %v682_v2   ;;  %v1094_v2 = vld [vmem:[%s2308_s0 + $0x68] sm:$0xff] }
 0x256   :  { %833 = vmatpush.msra.mxu2 %v2357_v6  ;;  %853 = vmatpush.msra.mxu3 %v2358_v7 }
 0x25d   :  { %807 = vperm.xlu2 %1124, %v805_v26  }
 0x2b3   :  { %v466_v29 = vpop.f32.mrf.mxu1 }
 0x2b4   :  { %v509_v32 = vadd.f32 %v1087_v28, %v466_v29 }
 0x2b6   :  { %v1090_v33 = vmul.f32 -1.442695, %v509_v32 }
 0x2b8   :  { %1156 = vpow2.f32 %v1090_v33  ;;  %v562_v33 = vpop.permute.xlu1 %561 }
 0x2b9   :  { %v486_v36 = vpop.f32.mrf.mxu2  ;;  %vm563_vm11 = vcmp.eq.s32.totalorder %v562_v33, 1 }
 0x2ba   :  { %v529_v40 = vadd.f32 %v1088_v35, %v486_v36  ;;  %v506_v42 = vpop.f32.mrf.mxu3 }
 0x2bb   :  { %v549_v43 = vadd.f32 %v2350_v62, %v506_v42 }
 0x2bc   :  { %v1091_v44 = vmul.f32 -1.442695, %v529_v40 }
 0x2be   :  { %v1157_v47 = vpop.eup %1156  ;;  %1158 = vpow2.f32 %v1091_v44  ;;  %v1250_v44 = vld [vmem:[%s2305_s2 + $0x18] sm:$0xff] }
 0x2bf   :  { %v513_v49 = vadd.f32 1.0, %v1157_v47  ;;  %v1251_v47 = vld [vmem:[%s2305_s2 + $0x20] sm:$0xff] }
 0x2c1   :  { %1160 = vrcp.f32 %v513_v49  ;;  %v525_v6 = vand.u32 2147483648, %v513_v49  ;;  %v523_v63 = vand.u32 2147483647, %v513_v49  ;;  %vm519_vm4 = vweird.f32 %v513_v49 }
 0x2c3   :  { %v526_v30 = vor.u32 1.1754944e-38, %v525_v6  ;;  %vm524_vm6 = vcmp.eq.f32.partialorder %v523_v63, 8.507059e+37 }
 0x2c4   :  { %v1159_v51 = vpop.eup %1158 }
 0x2c5   :  { %v533_v0 = vadd.f32 1.0, %v1159_v51  ;;  %v1253_v51 = vld [vmem:[%s2305_s2] sm:$0xff] }
 0x2c7   :  { %v1161_v3 = vpop.eup %1160  ;;  %1162 = vrcp.f32 %v533_v0  ;;  %v545_v11 = vand.u32 2147483648, %v533_v0  ;;  %vm539_vm8 = vweird.f32 %v533_v0  ;;  %v543_v12 = vand.u32 2147483647, %v533_v0 }
 0x2c8   :  { %v515_v4 = vmul.f32 %v1161_v3, %v513_v49  ;;  %vm520_vm3 = vweird.f32 %v1161_v3  ;;  %v2197_v49 = vld [vmem:[%s2305_s2 + $0x10] sm:$0xff] }
 0x2c9   :  { %vm521_vm5 = vmor %vm519_vm4, %vm520_vm3  ;;  %v546_v17 = vor.u32 1.1754944e-38, %v545_v11  ;;  %vm544_vm10 = vcmp.eq.f32.partialorder %v543_v12, 8.507059e+37 }
 0x2ca   :  { %v516_v5 = vsub.f32 1.0, %v515_v4 }
 0x2cc   :  { %v517_v7 = vmul.f32 %v1161_v3, %v516_v5 }
 0x2cd   :  { %v1163_v41 = vpop.eup %1162 }
 0x2ce   :  { %v535_v46 = vmul.f32 %v1163_v41, %v533_v0  ;;  %v518_v50 = vadd.f32 %v1161_v3, %v517_v7  ;;  %vm540_vm7 = vweird.f32 %v1163_v41  ;;  %v1254_v0 = vld [vmem:[%s2305_s2 + $0x8] sm:$0xff] }
 0x2cf   :  { %vm541_vm9 = vmor %vm539_vm8, %vm540_vm7 }
 0x2d0   :  { %v536_v58 = vsub.f32 1.0, %v535_v46  ;;  %v522_v52 = vsel %vm521_vm5, %v1161_v3, %v518_v50 }
 0x2d1   :  { %v527_v39 = vsel %vm524_vm6, %v526_v30, %v522_v52 }
 0x2d2   :  { %v550_v8 = vmul.f32 %v549_v43, %v527_v39  ;;  %v537_v59 = vmul.f32 %v1163_v41, %v536_v58 }
 0x2d4   :  { %v551_v9 = vadd.f32 %v1089_v53, %v550_v8  ;;  %v538_v10 = vadd.f32 %v1163_v41, %v537_v59 }
 0x2d6   :  { %1164 = vtanh.f32 %v551_v9  ;;  %v542_v13 = vsel %vm541_vm9, %v1163_v41, %v538_v10 }
 0x2d7   :  { %v547_v29 = vsel %vm544_vm10, %v546_v17, %v542_v13 }
 0x2dc   :  { %v1165_v14 = vpop.eup %1164 }
 0x2dd   :  { %v553_v28 = vsub.f32 %v1873_v15, %v1165_v14 }
 0x2df   :  { %v554_v32 = vmul.f32 %v553_v28, %v547_v29 }
 0x2e1   :  { %v555_v35 = vadd.f32 %v1165_v14, %v554_v32  ;;  %v1095_v14 = vld [vmem:[%s2308_s0 + $0x70] sm:$0xff] }
 0x2e3   :  { %v2056_v36 = vsel %vm563_vm11, %v555_v35, %v1873_v15  ;;  %v565_v40 = vsel %vm563_vm11, %v555_v35, 0.0  ;;  %v2073_v15 = vld [vmem:[%s2305_s2 + $0x148] sm:$0xff] }
 0x2e4   :  { %1092 = vst [vmem:[%s2309_s4 + $0x18] sm:$0xff] %v565_v40  ;;  %588 = vmatmul.f32.vlgmr.msrb.gmra.mxu0 %v2056_v36  ;;  %608 = vmatmul.f32.vlgmr.msrb.gmra.mxu1 %v2056_v36 }
 0x2e5   :  { %628 = vmatmul.f32.vlgmr.msrb.gmra.mxu2 %v2056_v36  ;;  %858 = vmatpush.msrb.mxu0 %v1884_v18 }
 0x2e6   :  { %941 = vmatpush.msrb.mxu1 %v1890_v38  ;;  %961 = vmatpush.msrb.mxu2 %v1896_v21  ;;  %v2081_v38 = vld [vmem:[%s2305_s2 + $0x130] sm:$0xff]  ;;  %v2089_v21 = vld [vmem:[%s2305_s2 + $0x118] sm:$0xff] }
 0x2e7   :  { %859 = vmatpush.msrb.mxu0 %v1902_v22 }
 0x2e8   :  { %942 = vmatpush.msrb.mxu1 %v1908_v24  ;;  %962 = vmatpush.msrb.mxu2 %v1914_v25  ;;  %v2097_v24 = vld [vmem:[%s2305_s2 + $0x100] sm:$0xff]  ;;  %v2105_v25 = vld [vmem:[%s2305_s2 + $0xe8] sm:$0xff] }
 0x2e9   :  { %860 = vmatpush.msrb.mxu0 %v2073_v15 }
 0x2ea   :  { %943 = vmatpush.msrb.mxu1 %v1921_v45  ;;  %963 = vmatpush.msrb.mxu2 %v1927_v48  ;;  %v2113_v45 = vld [vmem:[%s2305_s2 + $0xd0] sm:$0xff]  ;;  %v2121_v48 = vld [vmem:[%s2305_s2 + $0xb8] sm:$0xff] }
 0x2eb   :  { %861 = vmatpush.msrb.mxu0 %v2081_v38 }
 0x2ec   :  { %944 = vmatpush.msrb.mxu1 %v1934_v16  ;;  %964 = vmatpush.msrb.mxu2 %v1940_v60  ;;  %v2129_v16 = vld [vmem:[%s2305_s2 + $0xa0] sm:$0xff]  ;;  %v2137_v60 = vld [vmem:[%s2305_s2 + $0x88] sm:$0xff] }
 0x2ed   :  { %862 = vmatpush.msrb.mxu0 %v2089_v21 }
 0x2ee   :  { %945 = vmatpush.msrb.mxu1 %v1947_v20  ;;  %965 = vmatpush.msrb.mxu2 %v1953_v57  ;;  %v1238_v20 = vld [vmem:[%s2305_s2 + $0x78] sm:$0xff]  ;;  %v1239_v57 = vld [vmem:[%s2305_s2 + $0x80] sm:$0xff] }
 0x2ef   :  { %863 = vmatpush.msrb.mxu0 %v2097_v24 }
 0x2f0   :  { %946 = vmatpush.msrb.mxu1 %v1960_v23  ;;  %966 = vmatpush.msrb.mxu2 %v1966_v54  ;;  %v2149_v23 = vld [vmem:[%s2305_s2 + $0x70] sm:$0xff]  ;;  %v1241_v54 = vld [vmem:[%s2305_s2 + $0x60] sm:$0xff] }
 0x2f1   :  { %864 = vmatpush.msrb.mxu0 %v2105_v25 }
 0x2f2   :  { %947 = vmatpush.msrb.mxu1 %v1973_v27  ;;  %967 = vmatpush.msrb.mxu2 %v1979_v55  ;;  %v1242_v27 = vld [vmem:[%s2305_s2 + $0x68] sm:$0xff]  ;;  %v2161_v55 = vld [vmem:[%s2305_s2 + $0x58] sm:$0xff] }
 0x2f3   :  { %865 = vmatpush.msrb.mxu0 %v2113_v45 }
 0x2f4   :  { %948 = vmatpush.msrb.mxu1 %v1986_v31  ;;  %968 = vmatpush.msrb.mxu2 %v1992_v61  ;;  %v1244_v31 = vld [vmem:[%s2305_s2 + $0x48] sm:$0xff]  ;;  %v1245_v61 = vld [vmem:[%s2305_s2 + $0x50] sm:$0xff] }
 0x2f5   :  { %866 = vmatpush.msrb.mxu0 %v2121_v48 }
 0x2f6   :  { %949 = vmatpush.msrb.mxu1 %v1999_v34  ;;  %969 = vmatpush.msrb.mxu2 %v2005_v19  ;;  %v2173_v34 = vld [vmem:[%s2305_s2 + $0x40] sm:$0xff]  ;;  %v1247_v19 = vld [vmem:[%s2305_s2 + $0x30] sm:$0xff] }
 0x2f7   :  { %867 = vmatpush.msrb.mxu0 %v2129_v16 }
 0x2f8   :  { %950 = vmatpush.msrb.mxu1 %v2012_v37  ;;  %970 = vmatpush.msrb.mxu2 %v2018_v56  ;;  %v1248_v37 = vld [vmem:[%s2305_s2 + $0x38] sm:$0xff]  ;;  %v2185_v56 = vld [vmem:[%s2305_s2 + $0x28] sm:$0xff] }
 0x2f9   :  { %868 = vmatpush.msrb.mxu0 %v2137_v60 }
 0x2fa   :  { %951 = vmatpush.msrb.mxu1 %v1238_v20  ;;  %971 = vmatpush.msrb.mxu2 %v1239_v57 }
 0x2fb   :  { %869 = vmatpush.msrb.mxu0 %v2149_v23 }
 0x2fc   :  { %952 = vmatpush.msrb.mxu1 %v1241_v54  ;;  %972 = vmatpush.msrb.mxu2 %v1242_v27 }
 0x2fd   :  { %870 = vmatpush.msrb.mxu0 %v2161_v55 }
 0x2fe   :  { %953 = vmatpush.msrb.mxu1 %v1244_v31  ;;  %973 = vmatpush.msrb.mxu2 %v1245_v61  ;;  %v685_v31 = vpop.permute.xlu2 %684 }
 0x2ff   :  { %871 = vmatpush.msrb.mxu0 %v2173_v34  ;;  %vm686_vm4 = vcmp.eq.s32.totalorder %v685_v31, 1 }
 0x300   :  { %954 = vmatpush.msrb.mxu1 %v1247_v19  ;;  %974 = vmatpush.msrb.mxu2 %v1248_v37 }
 0x301   :  { %872 = vmatpush.msrb.mxu0 %v2185_v56 }
 0x302   :  { %955 = vmatpush.msrb.mxu1 %v1250_v44  ;;  %975 = vmatpush.msrb.mxu2 %v1251_v47 }
 0x303   :  { %873 = vmatpush.msrb.mxu0 %v2197_v49 }
 0x304   :  { %956 = vmatpush.msrb.mxu1 %v1253_v51  ;;  %976 = vmatpush.msrb.mxu2 %v1254_v0 }
 0x361   :  { %v589_v3 = vpop.f32.mrf.mxu0  ;;  %v609_v4 = vpop.f32.mrf.mxu1 }
 0x362   :  { %v632_v5 = vadd.f32 %v1093_v1, %v589_v3  ;;  %v652_v6 = vadd.f32 %v1094_v2, %v609_v4 }
 0x364   :  { %v1096_v7 = vmul.f32 -1.442695, %v632_v5  ;;  %v1097_v63 = vmul.f32 -1.442695, %v652_v6  ;;  %v2251_v5 = vld [vmem:[%s2307_s3] ss:$0 sm:$0xff] }
 0x366   :  { %1166 = vpow2.f32 %v1096_v7 }
 0x367   :  { %1168 = vpow2.f32 %v1097_v63 }
 0x368   :  { %v629_v59 = vpop.f32.mrf.mxu2 }
 0x369   :  { %v672_v13 = vadd.f32 %v2350_v62, %v629_v59  ;;  %v808_v59 = vpop.permute.xlu2 %807 }
 0x36c   :  { %v1167_v26 = vpop.eup %1166 }
 0x36d   :  { %v1169_v41 = vpop.eup %1168  ;;  %v636_v42 = vadd.f32 1.0, %v1167_v26  ;;  %v1101_v26 = vld [vmem:[%s2308_s0 + $0x88] sm:$0xff] }
 0x36e   :  { %v656_v46 = vadd.f32 1.0, %v1169_v41 }
 0x36f   :  { %1170 = vrcp.f32 %v636_v42  ;;  %v648_v53 = vand.u32 2147483648, %v636_v42  ;;  %v646_v8 = vand.u32 2147483647, %v636_v42  ;;  %vm642_vm13 = vweird.f32 %v636_v42 }
 0x370   :  { %1172 = vrcp.f32 %v656_v46  ;;  %v668_v35 = vand.u32 2147483648, %v656_v46  ;;  %vm662_vm1 = vweird.f32 %v656_v46  ;;  %v666_v40 = vand.u32 2147483647, %v656_v46 }
 0x371   :  { %v649_v11 = vor.u32 1.1754944e-38, %v648_v53  ;;  %vm647_vm15 = vcmp.eq.f32.partialorder %v646_v8, 8.507059e+37 }
 0x372   :  { %v669_v54 = vor.u32 1.1754944e-38, %v668_v35  ;;  %vm667_vm3 = vcmp.eq.f32.partialorder %v666_v40, 8.507059e+37 }
 0x375   :  { %v1171_v50 = vpop.eup %1170 }
 0x376   :  { %v1173_v30 = vpop.eup %1172  ;;  %v638_v58 = vmul.f32 %v1171_v50, %v636_v42  ;;  %vm643_vm12 = vweird.f32 %v1171_v50 }
 0x377   :  { %v658_v43 = vmul.f32 %v1173_v30, %v656_v46  ;;  %vm644_vm14 = vmor %vm642_vm13, %vm643_vm12  ;;  %vm663_vm0 = vweird.f32 %v1173_v30  ;;  %vm809_vm13 = vcmp.eq.s32.totalorder %v808_v59, 1 }
 0x378   :  { %v639_v52 = vsub.f32 1.0, %v638_v58  ;;  %vm664_vm2 = vmor %vm662_vm1, %vm663_vm0 }
 0x379   :  { %v659_v10 = vsub.f32 1.0, %v658_v43 }
 0x37a   :  { %v640_v39 = vmul.f32 %v1171_v50, %v639_v52 }
 0x37b   :  { %v660_v29 = vmul.f32 %v1173_v30, %v659_v10 }
 0x37c   :  { %v641_v9 = vadd.f32 %v1171_v50, %v640_v39 }
 0x37d   :  { %v661_v33 = vadd.f32 %v1173_v30, %v660_v29 }
 0x37e   :  { %v645_v12 = vsel %vm644_vm14, %v1171_v50, %v641_v9 }
 0x37f   :  { %v650_v17 = vsel %vm647_vm15, %v649_v11, %v645_v12  ;;  %v665_v20 = vsel %vm664_vm2, %v1173_v30, %v661_v33 }
 0x380   :  { %v673_v28 = vmul.f32 %v672_v13, %v650_v17  ;;  %v670_v27 = vsel %vm667_vm3, %v669_v54, %v665_v20  ;;  %v1105_v13 = vld [vmem:[%s2308_s0 + $0x90] sm:$0xff] }
 0x382   :  { %v674_v32 = vadd.f32 %v1095_v14, %v673_v28  ;;  %v1106_v14 = vld [vmem:[%s2308_s0 + $0x98] sm:$0xff] }
 0x384   :  { %1174 = vtanh.f32 %v674_v32 }
 0x38a   :  { %v1175_v57 = vpop.eup %1174 }
 0x38b   :  { %v676_v62 = vsub.f32 %v2056_v36, %v1175_v57 }
 0x38d   :  { %v677_v61 = vmul.f32 %v676_v62, %v670_v27 }
 0x38f   :  { %v678_v19 = vadd.f32 %v1175_v57, %v677_v61 }
 0x391   :  { %v2218_v37 = vsel %vm686_vm4, %v678_v19, %v2056_v36  ;;  %v688_v44 = vsel %vm686_vm4, %v678_v19, 0.0 }
 0x392   :  { %1098 = vst [vmem:[%s2309_s4 + $0x20] sm:$0xff] %v688_v44  ;;  %711 = vmatmul.f32.vlgmr.msrb.gmra.mxu3 %v2218_v37  ;;  %731 = vmatmul.f32.vlgmr.msra.gmra.mxu0 %v2218_v37 }
 0x393   :  { %751 = vmatmul.f32.vlgmr.msra.gmra.mxu1 %v2218_v37  ;;  %981 = vmatpush.msrb.mxu3 %v1884_v18  ;;  %v1100_v18 = vld [vmem:[%s2308_s0 + $0x80] sm:$0xff] }
 0x395   :  { %982 = vmatpush.msrb.mxu3 %v1902_v22 }
 0x397   :  { %983 = vmatpush.msrb.mxu3 %v2073_v15 }
 0x399   :  { %984 = vmatpush.msrb.mxu3 %v2081_v38  ;;  %v1099_v38 = vld [vmem:[%s2308_s0 + $0x78] sm:$0xff] }
 0x39b   :  { %985 = vmatpush.msrb.mxu3 %v2089_v21 }
 0x39d   :  { %986 = vmatpush.msrb.mxu3 %v2097_v24 }
 0x39f   :  { %987 = vmatpush.msrb.mxu3 %v2105_v25 }
 0x3a1   :  { %988 = vmatpush.msrb.mxu3 %v2113_v45 }
 0x3a3   :  { %989 = vmatpush.msrb.mxu3 %v2121_v48 }
 0x3a5   :  { %990 = vmatpush.msrb.mxu3 %v2129_v16 }
 0x3a7   :  { %991 = vmatpush.msrb.mxu3 %v2137_v60 }
 0x3a9   :  { %992 = vmatpush.msrb.mxu3 %v2149_v23 }
 0x3ab   :  { %993 = vmatpush.msrb.mxu3 %v2161_v55 }
 0x3ad   :  { %994 = vmatpush.msrb.mxu3 %v2173_v34 }
 0x3af   :  { %995 = vmatpush.msrb.mxu3 %v2185_v56 }
 0x3b1   :  { %996 = vmatpush.msrb.mxu3 %v2197_v49 }
 0x40f   :  { %v732_v22 = vpop.f32.mrf.mxu0 }
 0x410   :  { %v775_v36 = vadd.f32 %v1100_v18, %v732_v22  ;;  %v752_v1 = vpop.f32.mrf.mxu1 }
 0x411   :  { %v795_v6 = vadd.f32 %v2251_v5, %v752_v1  ;;  %v931_v1 = vpop.permute.xlu0 %930 }
 0x412   :  { %v1103_v15 = vmul.f32 -1.442695, %v775_v36 }
 0x414   :  { %1176 = vpow2.f32 %v1103_v15 }
 0x415   :  { %v712_v21 = vpop.f32.mrf.mxu3 }
 0x416   :  { %v755_v24 = vadd.f32 %v1099_v38, %v712_v21 }
 0x418   :  { %v1102_v25 = vmul.f32 -1.442695, %v755_v24 }
 0x41a   :  { %1178 = vpow2.f32 %v1102_v25  ;;  %v1177_v45 = vpop.eup %1176 }
 0x41b   :  { %v779_v16 = vadd.f32 1.0, %v1177_v45  ;;  %v1107_v45 = vld [vmem:[%s2308_s0 + $0xa0] sm:$0xff] }
 0x41d   :  { %v791_v30 = vand.u32 2147483648, %v779_v16  ;;  %vm785_vm10 = vweird.f32 %v779_v16  ;;  %v789_v58 = vand.u32 2147483647, %v779_v16 }
 0x41f   :  { %v792_v53 = vor.u32 1.1754944e-38, %v791_v30  ;;  %vm790_vm12 = vcmp.eq.f32.partialorder %v789_v58, 8.507059e+37 }
 0x420   :  { %v1179_v48 = vpop.eup %1178 }
 0x421   :  { %v759_v60 = vadd.f32 1.0, %v1179_v48 }
 0x423   :  { %1180 = vrcp.f32 %v759_v60  ;;  %v771_v49 = vand.u32 2147483648, %v759_v60  ;;  %v769_v0 = vand.u32 2147483647, %v759_v60  ;;  %vm765_vm6 = vweird.f32 %v759_v60 }
 0x424   :  { %1182 = vrcp.f32 %v779_v16 }
 0x425   :  { %v772_v4 = vor.u32 1.1754944e-38, %v771_v49  ;;  %vm770_vm8 = vcmp.eq.f32.partialorder %v769_v0, 8.507059e+37 }
 0x429   :  { %v1181_v23 = vpop.eup %1180 }
 0x42a   :  { %v1183_v55 = vpop.eup %1182  ;;  %v761_v34 = vmul.f32 %v1181_v23, %v759_v60  ;;  %vm766_vm5 = vweird.f32 %v1181_v23 }
 0x42b   :  { %v781_v47 = vmul.f32 %v1183_v55, %v779_v16  ;;  %vm767_vm7 = vmor %vm765_vm6, %vm766_vm5  ;;  %vm786_vm9 = vweird.f32 %v1183_v55  ;;  %vm932_vm6 = vcmp.eq.s32.totalorder %v931_v1, 1 }
 0x42c   :  { %v762_v56 = vsub.f32 1.0, %v761_v34  ;;  %vm787_vm11 = vmor %vm785_vm10, %vm786_vm9 }
 0x42d   :  { %v782_v3 = vsub.f32 1.0, %v781_v47 }
 0x42e   :  { %v763_v51 = vmul.f32 %v1181_v23, %v762_v56 }
 0x42f   :  { %v783_v42 = vmul.f32 %v1183_v55, %v782_v3 }
 0x430   :  { %v764_v2 = vadd.f32 %v1181_v23, %v763_v51 }
 0x431   :  { %v784_v50 = vadd.f32 %v1183_v55, %v783_v42  ;;  %v1112_v42 = vld [vmem:[%s2308_s0 + $0xb0] sm:$0xff] }
 0x432   :  { %v768_v7 = vsel %vm767_vm7, %v1181_v23, %v764_v2 }
 0x433   :  { %v773_v63 = vsel %vm770_vm8, %v772_v4, %v768_v7  ;;  %v788_v52 = vsel %vm787_vm11, %v1183_v55, %v784_v50  ;;  %v1111_v7 = vld [vmem:[%s2308_s0 + $0xa8] sm:$0xff] }
 0x434   :  { %v796_v41 = vmul.f32 %v795_v6, %v773_v63  ;;  %v793_v8 = vsel %vm790_vm12, %v792_v53, %v788_v52 }
 0x436   :  { %v797_v46 = vadd.f32 %v1101_v26, %v796_v41 }
 0x438   :  { %1184 = vtanh.f32 %v797_v46 }
 0x43e   :  { %v1185_v43 = vpop.eup %1184 }
 0x43f   :  { %v799_v39 = vsub.f32 %v2218_v37, %v1185_v43 }
 0x441   :  { %v800_v9 = vmul.f32 %v799_v39, %v793_v8 }
 0x443   :  { %v801_v10 = vadd.f32 %v1185_v43, %v800_v9 }
 0x445   :  { %v2259_v11 = vsel %vm809_vm13, %v801_v10, %v2218_v37  ;;  %v811_v12 = vsel %vm809_vm13, %v801_v10, 0.0 }
 0x446   :  { %1104 = vst [vmem:[%s2309_s4 + $0x28] sm:$0xff] %v811_v12  ;;  %834 = vmatmul.f32.vlgmr.msra.gmra.mxu2 %v2259_v11  ;;  %854 = vmatmul.f32.vlgmr.msra.gmra.mxu3 %v2259_v11 }
 0x447   :  { %874 = vmatmul.f32.vlgmr.msrb.gmra.mxu0 %v2259_v11 }
 0x4c4   :  { %v875_v22 = vpop.f32.mrf.mxu0 }
 0x4c5   :  { %v918_v21 = vadd.f32 %v2251_v5, %v875_v22 }
 0x4c9   :  { %v835_v17 = vpop.f32.mrf.mxu2  ;;  %v855_v28 = vpop.f32.mrf.mxu3 }
 0x4ca   :  { %v878_v29 = vadd.f32 %v1105_v13, %v835_v17  ;;  %v898_v32 = vadd.f32 %v1106_v14, %v855_v28 }
 0x4cc   :  { %v1108_v33 = vmul.f32 -1.442695, %v878_v29  ;;  %v1109_v35 = vmul.f32 -1.442695, %v898_v32 }
 0x4ce   :  { %1186 = vpow2.f32 %v1108_v33 }
 0x4cf   :  { %1188 = vpow2.f32 %v1109_v35  ;;  %v1113_v35 = vld [vmem:[%s2308_s0 + $0xb8] sm:$0xff] }
 0x4d4   :  { %v1187_v40 = vpop.eup %1186 }
 0x4d5   :  { %v1189_v20 = vpop.eup %1188  ;;  %v882_v57 = vadd.f32 1.0, %v1187_v40 }
 0x4d6   :  { %v902_v54 = vadd.f32 1.0, %v1189_v20 }
 0x4d7   :  { %1190 = vrcp.f32 %v882_v57  ;;  %v894_v19 = vand.u32 2147483648, %v882_v57  ;;  %v892_v18 = vand.u32 2147483647, %v882_v57  ;;  %vm888_vm15 = vweird.f32 %v882_v57 }
 0x4d8   :  { %1192 = vrcp.f32 %v902_v54  ;;  %v914_v55 = vand.u32 2147483648, %v902_v54  ;;  %vm908_vm3 = vweird.f32 %v902_v54  ;;  %v912_v34 = vand.u32 2147483647, %v902_v54 }
 0x4d9   :  { %v895_v15 = vor.u32 1.1754944e-38, %v894_v19  ;;  %vm893_vm1 = vcmp.eq.f32.partialorder %v892_v18, 8.507059e+37  ;;  %v1054_v18 = vpop.permute.xlu1 %1053 }
 0x4da   :  { %v915_v49 = vor.u32 1.1754944e-38, %v914_v55  ;;  %vm913_vm5 = vcmp.eq.f32.partialorder %v912_v34, 8.507059e+37 }
 0x4dd   :  { %v1191_v62 = vpop.eup %1190 }
 0x4de   :  { %v1193_v27 = vpop.eup %1192  ;;  %v884_v31 = vmul.f32 %v1191_v62, %v882_v57  ;;  %vm889_vm14 = vweird.f32 %v1191_v62 }
 0x4df   :  { %v904_v37 = vmul.f32 %v1193_v27, %v902_v54  ;;  %vm890_vm0 = vmor %vm888_vm15, %vm889_vm14  ;;  %vm909_vm2 = vweird.f32 %v1193_v27  ;;  %vm1055_vm15 = vcmp.eq.s32.totalorder %v1054_v18, 1 }
 0x4e0   :  { %v885_v61 = vsub.f32 1.0, %v884_v31  ;;  %vm910_vm4 = vmor %vm908_vm3, %vm909_vm2 }
 0x4e1   :  { %v905_v38 = vsub.f32 1.0, %v904_v37 }
 0x4e2   :  { %v886_v44 = vmul.f32 %v1191_v62, %v885_v61 }
 0x4e3   :  { %v906_v16 = vmul.f32 %v1193_v27, %v905_v38 }
 0x4e4   :  { %v887_v36 = vadd.f32 %v1191_v62, %v886_v44 }
 0x4e5   :  { %v907_v23 = vadd.f32 %v1193_v27, %v906_v16 }
 0x4e6   :  { %v891_v24 = vsel %vm890_vm0, %v1191_v62, %v887_v36 }
 0x4e7   :  { %v896_v25 = vsel %vm893_vm1, %v895_v15, %v891_v24  ;;  %v911_v56 = vsel %vm910_vm4, %v1193_v27, %v907_v23 }
 0x4e8   :  { %v919_v48 = vmul.f32 %v918_v21, %v896_v25  ;;  %v916_v0 = vsel %vm913_vm5, %v915_v49, %v911_v56 }
 0x4ea   :  { %v920_v60 = vadd.f32 %v1107_v45, %v919_v48 }
 0x4ec   :  { %1194 = vtanh.f32 %v920_v60 }
 0x4f2   :  { %v1195_v47 = vpop.eup %1194 }
 0x4f3   :  { %v922_v51 = vsub.f32 %v2259_v11, %v1195_v47 }
 0x4f5   :  { %v923_v2 = vmul.f32 %v922_v51, %v916_v0 }
 0x4f7   :  { %v924_v3 = vadd.f32 %v1195_v47, %v923_v2 }
 0x4f9   :  { %v2279_v4 = vsel %vm932_vm6, %v924_v3, %v2259_v11  ;;  %v934_v6 = vsel %vm932_vm6, %v924_v3, 0.0 }
 0x4fa   :  { %1110 = vst [vmem:[%s2309_s4 + $0x30] sm:$0xff] %v934_v6  ;;  %957 = vmatmul.f32.vlgmr.msrb.gmra.mxu1 %v2279_v4  ;;  %977 = vmatmul.f32.vlgmr.msrb.gmra.mxu2 %v2279_v4 }
 0x4fb   :  { %997 = vmatmul.f32.vlgmr.msrb.gmra.mxu3 %v2279_v4 }
 0x577   :  { %v958_v63 = vpop.f32.mrf.mxu1 }
 0x578   :  { %v1001_v26 = vadd.f32 %v1111_v7, %v958_v63 }
 0x57a   :  { %v1114_v41 = vmul.f32 -1.442695, %v1001_v26 }
 0x57c   :  { %1196 = vpow2.f32 %v1114_v41 }
 0x57d   :  { %v978_v46 = vpop.f32.mrf.mxu2 }
 0x57e   :  { %v1021_v50 = vadd.f32 %v1112_v42, %v978_v46  ;;  %v998_v13 = vpop.f32.mrf.mxu3 }
 0x57f   :  { %v1041_v33 = vadd.f32 %v2251_v5, %v998_v13 }
 0x580   :  { %v1115_v30 = vmul.f32 -1.442695, %v1021_v50 }
 0x582   :  { %v1197_v58 = vpop.eup %1196  ;;  %1198 = vpow2.f32 %v1115_v30 }
 0x583   :  { %v1005_v52 = vadd.f32 1.0, %v1197_v58 }
 0x585   :  { %1200 = vrcp.f32 %v1005_v52  ;;  %v1017_v9 = vand.u32 2147483648, %v1005_v52  ;;  %v1015_v11 = vand.u32 2147483647, %v1005_v52  ;;  %vm1011_vm8 = vweird.f32 %v1005_v52 }
 0x587   :  { %v1018_v28 = vor.u32 1.1754944e-38, %v1017_v9  ;;  %vm1016_vm10 = vcmp.eq.f32.partialorder %v1015_v11, 8.507059e+37 }
 0x588   :  { %v1199_v43 = vpop.eup %1198 }
 0x589   :  { %v1025_v53 = vadd.f32 1.0, %v1199_v43 }
 0x58b   :  { %v1201_v39 = vpop.eup %1200  ;;  %1202 = vrcp.f32 %v1025_v53  ;;  %v1037_v27 = vand.u32 2147483648, %v1025_v53  ;;  %vm1031_vm12 = vweird.f32 %v1025_v53  ;;  %v1035_v31 = vand.u32 2147483647, %v1025_v53 }
 0x58c   :  { %v1007_v8 = vmul.f32 %v1201_v39, %v1005_v52  ;;  %vm1012_vm7 = vweird.f32 %v1201_v39 }
 0x58d   :  { %vm1013_vm9 = vmor %vm1011_vm8, %vm1012_vm7  ;;  %v1038_v37 = vor.u32 1.1754944e-38, %v1037_v27  ;;  %vm1036_vm14 = vcmp.eq.f32.partialorder %v1035_v31, 8.507059e+37 }
 0x58e   :  { %v1008_v59 = vsub.f32 1.0, %v1007_v8 }
 0x590   :  { %v1009_v10 = vmul.f32 %v1201_v39, %v1008_v59 }
 0x591   :  { %v1203_v12 = vpop.eup %1202 }
 0x592   :  { %v1027_v14 = vmul.f32 %v1203_v12, %v1025_v53  ;;  %v1010_v17 = vadd.f32 %v1201_v39, %v1009_v10  ;;  %vm1032_vm11 = vweird.f32 %v1203_v12 }
 0x593   :  { %vm1033_vm13 = vmor %vm1031_vm12, %vm1032_vm11 }
 0x594   :  { %v1028_v29 = vsub.f32 1.0, %v1027_v14  ;;  %v1014_v32 = vsel %vm1013_vm9, %v1201_v39, %v1010_v17 }
 0x595   :  { %v1019_v40 = vsel %vm1016_vm10, %v1018_v28, %v1014_v32 }
 0x596   :  { %v1042_v20 = vmul.f32 %v1041_v33, %v1019_v40  ;;  %v1029_v57 = vmul.f32 %v1203_v12, %v1028_v29 }
 0x598   :  { %v1043_v54 = vadd.f32 %v1113_v35, %v1042_v20  ;;  %v1030_v62 = vadd.f32 %v1203_v12, %v1029_v57 }
 0x59a   :  { %1204 = vtanh.f32 %v1043_v54  ;;  %v1034_v61 = vsel %vm1033_vm13, %v1203_v12, %v1030_v62 }
 0x59b   :  { %v1039_v44 = vsel %vm1036_vm14, %v1038_v37, %v1034_v61 }
 0x5a0   :  { %v1205_v19 = vpop.eup %1204 }
 0x5a1   :  { %v1045_v5 = vsub.f32 %v2279_v4, %v1205_v19 }
 0x5a3   :  { %v1046_v22 = vmul.f32 %v1045_v5, %v1039_v44 }
 0x5a5   :  { %v1047_v36 = vadd.f32 %v1205_v19, %v1046_v22 }
 0x5a7   :  { %v1056_v15 = vsel %vm1055_vm15, %v1047_v36, %v2279_v4  ;;  %v1057_v38 = vsel %vm1055_vm15, %v1047_v36, 0.0 }
 0x5a8   :  { %1116 = vst [vmem:[%s2309_s4 + $0x38] sm:$0xff] %v1057_v38 }
 0x5a9   :  { %1064 = vst [vmem:[%s2310_s5] sm:$0xff] %v1056_v15 }

</bundles_post_ra>
